<compile_context>
chip_gen: v7x
topology: tpu7x:2x2x1
jax: 0.10.0
libtpu: 0.0.40
codegen_flags: <defaults>
</compile_context>

<pallas_src>
import functools
import math
import random

import numpy as np
import jax
import jax.numpy as jnp
from jax.experimental import pallas as pl
from jax.experimental.pallas import tpu as pltpu

# ---- configuration mirroring LineOutlinerTsa.__init__ defaults (small patch) ----
PATCH_RATIO = 5
TSA_SIZE = 3
PATCH_SIZE = 16                       # small demo size instead of 64
CHANNELS = 3
PP = PATCH_SIZE * PATCH_SIZE          # 256 pixels per channel
FIN = CHANNELS * PP                   # 768 flattened NCHW patch features
H1 = 128                              # pre-memory feature width (stand-in)
HL = 128                              # memory (LSTM) hidden width (stand-in)
H2 = 512                              # must be 512 to feed nn.Linear(512, 6)
OUT_PAD = 128                         # 6 outputs padded to a lane-dense 128
RES_LANES = 128                       # result rows are written 128 lanes wide
FILL = 255.0 / 128.0 - 1.0


# ------------------------------ in-kernel helpers ------------------------------
def _sin_approx(a):
    """sin(a) via range reduction to [-pi/2, pi/2] + odd Taylor polynomial."""
    k = jnp.floor(a * (1.0 / math.pi) + 0.5)
    r = a - k * math.pi
    r2 = r * r
    s = r * (1.0 + r2 * (-1.0 / 6.0 + r2 * (1.0 / 120.0
             + r2 * (-1.0 / 5040.0 + r2 * (1.0 / 362880.0)))))
    parity = k - 2.0 * jnp.floor(k * 0.5)      # 0 if k even, 1 if odd
    return jnp.where(parity > 0.5, -s, s)


def _cos_approx(a):
    return _sin_approx(a + math.pi / 2.0)


def _row_scalar(row):
    """(1, N) row whose lanes all hold the same value -> (1, 1)."""
    return jnp.max(row, axis=1, keepdims=True)


# --------------------------- Pallas kernel (full rollout) ---------------------------
def _make_lol_kernel(n_iters, h_img, w_img):
    deg2rad = math.pi / 180.0

    def kernel(fs_ref, gt_ref, uv_ref, im_ref,
               w1_ref, b1_ref, wx_ref, wh_ref, bl_ref,
               w2_ref, b2_ref, wfc_ref, bfc_ref,
               res_ref, win_ref, st_ref):
        # ---- init: zero results, fill window, set geometric state ----
        res_ref[...] = jnp.zeros_like(res_ref)
        win_ref[...] = jnp.full((TSA_SIZE + 1, FIN), FILL, jnp.float32)

        zrow = jnp.zeros((1, RES_LANES), jnp.float32)
        st_ref[...] = jnp.zeros_like(st_ref)
        st_ref[0:1, :] = fs_ref[9] + zrow        # base x
        st_ref[1:2, :] = fs_ref[10] + zrow       # base y
        st_ref[2:3, :] = fs_ref[11] + zrow       # angle (degrees)
        st_ref[3:4, :] = 1.0 + zrow              # active flag

        move_scale = fs_ref[0]
        bound_a = fs_ref[1]          # img.shape[2]  ("img_width" in the torch code)
        bound_b = fs_ref[2]          # img.shape[3]  ("img_height" in the torch code)
        reset_thr = fs_ref[3]
        min_steps_f = fs_ref[4]
        use_reset = fs_ref[5]
        wtsa0 = fs_ref[6]
        wtsa1 = fs_ref[7]
        wtsa2 = fs_ref[8]

        # hoisted loop-invariant constants (kept out of the step loop)
        u0 = uv_ref[0:1, :]                                        # (1, PP) x offsets * scale
        v0 = uv_ref[1:2, :]                                        # (1, PP) y offsets * scale
        y_iota = jax.lax.broadcasted_iota(jnp.int32, (h_img, PP), 0).astype(jnp.float32)
        x_iota = jax.lax.broadcasted_iota(jnp.int32, (w_img, PP), 0).astype(jnp.float32)
        col8 = jax.lax.broadcasted_iota(jnp.int32, (1, OUT_PAD), 1)
        sig_mask = jnp.logical_and(col8 >= 3, col8 < 6)
        # (8,128) selector stack: row k picks lane k (k < 6) -> single reduction
        srow = jax.lax.broadcasted_iota(jnp.int32, (8, OUT_PAD), 0)
        scol = jax.lax.broadcasted_iota(jnp.int32, (8, OUT_PAD), 1)
        yv_sel = jnp.where(jnp.logical_and(srow == scol, srow < 6), 1.0, 0.0)
        colr = jax.lax.broadcasted_iota(jnp.int32, (1, RES_LANES), 1)
        res_m = [jnp.where(colr == k, 1.0, 0.0) for k in range(6)]

        @pl.loop(0, n_iters)
        def _(step):
            bx = _row_scalar(st_ref[0:1, :])                       # (1, 1)
            by = _row_scalar(st_ref[1:2, :])
            ang = _row_scalar(st_ref[2:3, :])                      # degrees
            active = _row_scalar(st_ref[3:4, :])

            # boundary checks BEFORE the step (faithful to the torch code,
            # including the second test that re-checks base[0] < 0 instead of
            # base[1] < 0, and the H/W naming swap)
            in_b = jnp.logical_and(
                jnp.logical_and(bx <= bound_a, bx >= 0.0),
                jnp.logical_and(by <= bound_b, bx >= 0.0))
            sv = active * jnp.where(in_b, 1.0, 0.0)                # step-valid (1, 1)

            # ---- affine bilinear patch extraction (tent-weight matmul gather) ----
            a_rad = ang * deg2rad
            cs = _cos_approx(a_rad)
            sn = _sin_approx(a_rad)
            ca, sa = cs, -sn                                       # patch angle = -deg2rad(angle)
            sx = bx + u0 * ca - v0 * sa                            # (1, PP)
            sy = by + u0 * sa + v0 * ca
            # fold fy0/fy1 (fx0/fx1) and the one-hot row (col) picks into single
            # tent-weight selectors; zero weight outside the image.
            wy = jnp.clip(1.0 - jnp.abs(y_iota - sy), 0.0, 1.0)    # (H, PP)
            wxm = jnp.clip(1.0 - jnp.abs(x_iota - sx), 0.0, 1.0)   # (W, PP)

            rows = jnp.dot(im_ref[...], wy.astype(jnp.bfloat16),
                           preferred_element_type=jnp.float32)     # (C*W, PP)

            # ---- roll temporal window, insert the new patch per channel slab ----
            older = win_ref[1:TSA_SIZE + 1, :]                     # (3, FIN)
            win_ref[0:TSA_SIZE, :] = older
            for c in range(CHANNELS):
                patch_c = jnp.sum(rows[c * w_img:(c + 1) * w_img, :] * wxm,
                                  axis=0, keepdims=True)           # (1, PP)
                win_ref[TSA_SIZE:TSA_SIZE + 1, c * PP:(c + 1) * PP] = patch_c

            # ---- TemporalAttension stand-in: per-pixel softmax over time ----
            x = win_ref[...]                                       # (4, FIN) f32
            xs = [x[:, c * PP:(c + 1) * PP] for c in range(CHANNELS)]
            logits = wtsa0 * xs[0] + wtsa1 * xs[1] + wtsa2 * xs[2]  # (4, PP)
            m = jnp.max(logits, axis=0, keepdims=True)
            e = jnp.exp(logits - m)
            attn = e * pl.reciprocal(jnp.sum(e, axis=0, keepdims=True), approx=True)

            # ---- PreLstmConvolutions stand-in: fused dense + ReLU (K=768) ----
            y_all = jnp.concatenate([xc * attn for xc in xs],
                                    axis=1).astype(jnp.bfloat16)   # (4, FIN)
            h1f = jnp.dot(y_all, w1_ref[...],
                          preferred_element_type=jnp.float32)      # (4, H1)
            h1 = jnp.maximum(h1f[1:, :] + b1_ref[...], 0.0)        # (3, H1): drop frame 0

            # ---- MemoryLayer stand-in: LSTM over 3 frames (input proj hoisted) ----
            gx = jnp.dot(h1.astype(jnp.bfloat16), wx_ref[...],
                         preferred_element_type=jnp.float32) + bl_ref[...]   # (3, 4*HL)
            whv = wh_ref[...]                                      # bf16, loaded once/step
            h = jnp.zeros((1, HL), jnp.float32)
            cst = jnp.zeros((1, HL), jnp.float32)
            for t in range(TSA_SIZE):                              # unrolled, trip count 3
                g = gx[t:t + 1, :] + jnp.dot(h.astype(jnp.bfloat16), whv,
                                             preferred_element_type=jnp.float32)
                ig = jax.nn.sigmoid(g[:, 0:HL])
                fg = jax.nn.sigmoid(g[:, HL:2 * HL])
                gg = jnp.tanh(g[:, 2 * HL:3 * HL])
                og = jax.nn.sigmoid(g[:, 3 * HL:4 * HL])
                cst = fg * cst + ig * gg
                h = og * jnp.tanh(cst)

            # ---- PostLstmConvolutions stand-in + Linear(512, 6) (lane padded) ----
            z = jnp.maximum(
                jnp.dot(h.astype(jnp.bfloat16), w2_ref[...],
                        preferred_element_type=jnp.float32) + b2_ref[...], 0.0)  # (1, 512)
            y6 = jnp.dot(z.astype(jnp.bfloat16), wfc_ref[...],
                         preferred_element_type=jnp.float32) + bfc_ref[...]      # (1, 128)
            ysel = jnp.where(sig_mask, jax.nn.sigmoid(y6), y6)     # sigmoid on y[3:6]

            # single cross-lane reduction extracts all 6 outputs as (1,1) rows
            yvcol = jnp.sum(ysel * yv_sel, axis=1, keepdims=True)  # (8, 1)
            y0 = yvcol[0:1, :]
            y1 = yvcol[1:2, :]
            y2 = yvcol[2:3, :]
            y3 = yvcol[3:4, :]
            y4 = yvcol[4:5, :]
            y5 = yvcol[5:6, :]

            # ---- geometric update: base += [y0,y1] @ R(angle)^T @ diag(scale) ----
            dx = (y0 * cs - y1 * sn) * move_scale
            dy = (y0 * sn + y1 * cs) * move_scale
            nbx = bx + sv * dx
            nby = by + sv * dy
            nang = ang + sv * y2

            # ---- post-step termination (reset threshold against GT base point) ----
            gt_x = gt_ref[2 * (step + 1)]
            gt_y = gt_ref[2 * (step + 1) + 1]
            ddx = nbx - gt_x
            ddy = nby - gt_y
            past_min = jnp.where((step + 1).astype(jnp.float32) >= min_steps_f, 1.0, 0.0)
            reset_hit = (jnp.where(ddx * ddx + ddy * ddy > reset_thr * reset_thr, 1.0, 0.0)
                         * use_reset * past_min)
            nactive = sv * (1.0 - reset_hit)

            st_ref[0:1, :] = nbx + zrow
            st_ref[1:2, :] = nby + zrow
            st_ref[2:3, :] = nang + zrow
            st_ref[3:4, :] = nactive + zrow

            row = (nbx * res_m[0] + nby * res_m[1] + y3 * res_m[2]
                   + y4 * res_m[3] + y5 * res_m[4] + sv * res_m[5])
            res_ref[pl.ds(step, 1), :] = row

    return kernel


@functools.lru_cache(maxsize=None)
def _build_forward(n_iters, h_img, w_img):
    n_rows = max(8, -(-n_iters // 8) * 8)
    kernel = _make_lol_kernel(n_iters, h_img, w_img)
    vmem = pl.BlockSpec(memory_space=pltpu.MemorySpace.VMEM)
    smem = pl.BlockSpec(memory_space=pltpu.MemorySpace.SMEM)
    call = pl.pallas_call(
        kernel,
        out_shape=jax.ShapeDtypeStruct((n_rows, RES_LANES), jnp.float32),
        in_specs=[smem, smem] + [vmem] * 11,
        out_specs=vmem,
        scratch_shapes=[pltpu.VMEM((TSA_SIZE + 1, FIN), jnp.float32),   # temporal window
                        pltpu.VMEM((8, 128), jnp.float32)],             # geometric state
    )
    return jax.jit(call)


# ------------------------------- parameter init -------------------------------
def init_params(key):
    ks = jax.random.split(key, 6)
    s = 0.05
    wtsa = jax.random.normal(ks[0], (CHANNELS,), jnp.float32)
    w1 = (jax.random.normal(ks[1], (FIN, H1), jnp.float32) * s).astype(jnp.bfloat16)
    b1 = jnp.zeros((1, H1), jnp.float32)
    wx = (jax.random.normal(ks[2], (H1, 4 * HL), jnp.float32) * s).astype(jnp.bfloat16)
    wh = (jax.random.normal(ks[3], (HL, 4 * HL), jnp.float32) * s).astype(jnp.bfloat16)
    bl = jnp.zeros((1, 4 * HL), jnp.float32)
    w2 = (jax.random.normal(ks[4], (HL, H2), jnp.float32) * s).astype(jnp.bfloat16)
    b2 = jnp.zeros((1, H2), jnp.float32)
    wfc6 = jax.random.normal(ks[5], (H2, 6), jnp.float32) * s
    wfc = jnp.concatenate([wfc6, jnp.zeros((H2, OUT_PAD - 6), jnp.float32)],
                          axis=1).astype(jnp.bfloat16)
    bfc = jnp.zeros((1, OUT_PAD), jnp.float32)
    return dict(wtsa=wtsa, w1=w1, b1=b1, wx=wx, wh=wh, bl=bl,
                w2=w2, b2=b2, wfc=wfc, bfc=bfc)


# ------------------------------ forward (host glue) ------------------------------
def line_outliner_tsa_forward(params, img, sol_tensor, steps,
                              reset_threshold=None, min_steps=None, max_steps=None,
                              disturb_sol=False, height_disturbance=0.2,
                              angle_disturbance=30.0, translate_disturbance=10.0):
    sol_np = np.asarray(sol_tensor, dtype=np.float32)
    steps_np = [np.asarray(s, dtype=np.float32) for s in steps]

    upper = sol_np[0].copy()
    base = sol_np[1].copy()
    angle = float(sol_np[3][0])
    if disturb_sol:
        random.seed(0)
        tx = random.uniform(0, translate_disturbance)
        ty = random.uniform(0, translate_disturbance)
        upper += np.array([tx, ty], np.float32)
        base += np.array([tx, ty], np.float32)
        angle += random.uniform(-angle_disturbance, angle_disturbance)

    current_height = float(np.linalg.norm(upper - base))
    if disturb_sol:
        current_height *= random.uniform(-height_disturbance, height_disturbance)  # (sic)
    current_scale = PATCH_RATIO * current_height / PATCH_SIZE
    sol_height = float(np.linalg.norm(upper - base))      # dist(upper, base) used per patch
    patch_scale = PATCH_RATIO * sol_height / PATCH_SIZE

    n_iters = int(max_steps) if max_steps is not None else max(len(steps_np) - 1, 0)
    if n_iters <= 0:
        return None

    C, H, W = int(img.shape[1]), int(img.shape[2]), int(img.shape[3])
    # image packed as (C*W, H): im_cxh[c*W + x, y] = img[0, c, y, x]; bf16 (MXU-native)
    im_cxh = jnp.transpose(img[0], (0, 2, 1)).reshape(C * W, H).astype(jnp.bfloat16)

    fscal = np.zeros((16,), np.float32)
    fscal[0] = current_scale
    fscal[1] = float(img.shape[2])
    fscal[2] = float(img.shape[3])
    fscal[3] = float(reset_threshold) if reset_threshold is not None else 0.0
    fscal[4] = float(min_steps) if min_steps is not None else 0.0
    fscal[5] = 1.0 if reset_threshold is not None else 0.0
    fscal[6:9] = np.asarray(params['wtsa'], np.float32)
    fscal[9] = base[0]
    fscal[10] = base[1]
    fscal[11] = angle

    gt = np.zeros((2 * (n_iters + 2),), np.float32)
    for j, s in enumerate(steps_np):
        if 2 * j + 1 < gt.shape[0]:
            gt[2 * j] = s[1][0]
            gt[2 * j + 1] = s[1][1]

    offs = np.arange(PATCH_SIZE, dtype=np.float32) - PATCH_SIZE / 2.0
    uu = np.tile(offs, PATCH_SIZE) * patch_scale           # column (x) offsets, NCHW pixel order
    vv = np.repeat(offs, PATCH_SIZE) * patch_scale         # row (y) offsets
    uvconst = np.stack([uu, vv]).astype(np.float32)        # (2, PP)

    run = _build_forward(n_iters, H, W)
    res = run(jnp.asarray(fscal), jnp.asarray(gt), jnp.asarray(uvconst), im_cxh,
              params['w1'], params['b1'], params['wx'], params['wh'], params['bl'],
              params['w2'], params['b2'], params['wfc'], params['bfc'])
    res = np.asarray(jax.block_until_ready(res))           # single device->host transfer
    n = int(np.sum(res[:n_iters, 5] > 0.5))
    if n == 0:
        return None
    return jnp.asarray(res[:n, :5])


# ------------------------------------ main ------------------------------------
if __name__ == "__main__":
    key = jax.random.PRNGKey(0)
    k_img, k_par = jax.random.split(key)
    params = init_params(k_par)

    img = jax.random.uniform(k_img, (1, CHANNELS, 48, 48), jnp.float32,
                             minval=-1.0, maxval=1.0)
    # sol_tensor rows: [upper_point, base_point, unused, [angle_deg, unused]]
    sol_tensor = jnp.array([[12.0, 8.0],
                            [12.0, 20.0],
                            [0.0, 0.0],
                            [-4.0, 0.0]], jnp.float32)
    steps = [jnp.array([[12.0 + 4.0 * i, 8.0],
                        [12.0 + 4.0 * i, 20.0],
                        [0.0, 0.0],
                        [-4.0, 0.0]], jnp.float32) for i in range(1, 7)]

    out = line_outliner_tsa_forward(params, img, sol_tensor, steps, disturb_sol=False)
    out = jax.block_until_ready(out)
    assert out is not None and out.ndim == 2 and out.shape[1] == 5
    print("KERNEL_OK")
</pallas_src>

<mosaic_0001>
module attributes {stable_mosaic.version = 11 : i64} {
  func.func @kernel(%arg0: memref<16xf32, #tpu.memory_space<smem>>, %arg1: memref<14xf32, #tpu.memory_space<smem>>, %arg2: memref<2x256xf32, #tpu.memory_space<vmem>>, %arg3: memref<144x48xbf16, #tpu.memory_space<vmem>>, %arg4: memref<768x128xbf16, #tpu.memory_space<vmem>>, %arg5: memref<1x128xf32, #tpu.memory_space<vmem>>, %arg6: memref<128x512xbf16, #tpu.memory_space<vmem>>, %arg7: memref<128x512xbf16, #tpu.memory_space<vmem>>, %arg8: memref<1x512xf32, #tpu.memory_space<vmem>>, %arg9: memref<128x512xbf16, #tpu.memory_space<vmem>>, %arg10: memref<1x512xf32, #tpu.memory_space<vmem>>, %arg11: memref<512x128xbf16, #tpu.memory_space<vmem>>, %arg12: memref<1x128xf32, #tpu.memory_space<vmem>>, %arg13: memref<8x128xf32, #tpu.memory_space<vmem>>, %arg14: memref<4x768xf32, #tpu.memory_space<vmem>>, %arg15: memref<8x128xf32, #tpu.memory_space<vmem>>) attributes {dimension_semantics = [], scalar_prefetch = 0 : i64, scratch_operands = 2 : i64, tpu.core_type = #tpu.core_type<tc>} {
    %cst = arith.constant 0.000000e+00 : f32
    %0 = vector.broadcast %cst : f32 to vector<8x128xf32>
    %c0 = arith.constant 0 : index
    %c0_0 = arith.constant 0 : index
    %1 = vector.load %arg13[%c0, %c0_0] : memref<8x128xf32, #tpu.memory_space<vmem>>, vector<8x128xf32>
    tpu.vector_store %arg13[%c0, %c0_0], %0 {strides = array<i32>} : memref<8x128xf32, #tpu.memory_space<vmem>>, vector<8x128xf32>,
    %cst_1 = arith.constant 0.9921875 : f32
    %2 = vector.broadcast %cst_1 : f32 to vector<4x768xf32>
    %c0_2 = arith.constant 0 : index
    %c0_3 = arith.constant 0 : index
    %3 = vector.load %arg14[%c0_2, %c0_3] : memref<4x768xf32, #tpu.memory_space<vmem>>, vector<4x768xf32>
    tpu.vector_store %arg14[%c0_2, %c0_3], %2 {strides = array<i32>} : memref<4x768xf32, #tpu.memory_space<vmem>>, vector<4x768xf32>,
    %cst_4 = arith.constant 0.000000e+00 : f32
    %4 = vector.broadcast %cst_4 : f32 to vector<1x128xf32>
    %cst_5 = arith.constant 0.000000e+00 : f32
    %5 = vector.broadcast %cst_5 : f32 to vector<8x128xf32>
    %c0_6 = arith.constant 0 : index
    %c0_7 = arith.constant 0 : index
    %6 = vector.load %arg15[%c0_6, %c0_7] : memref<8x128xf32, #tpu.memory_space<vmem>>, vector<8x128xf32>
    tpu.vector_store %arg15[%c0_6, %c0_7], %5 {strides = array<i32>} : memref<8x128xf32, #tpu.memory_space<vmem>>, vector<8x128xf32>,
    %c9 = arith.constant 9 : index
    %7 = memref.load %arg0[%c9] : memref<16xf32, #tpu.memory_space<smem>>
    %8 = vector.broadcast %7 : f32 to vector<1x128xf32>
    %9 = arith.addf %8, %4 : vector<1x128xf32>
    %c0_8 = arith.constant 0 : index
    %c0_9 = arith.constant 0 : index
    %10 = vector.load %arg15[%c0_8, %c0_9] : memref<8x128xf32, #tpu.memory_space<vmem>>, vector<1x128xf32>
    tpu.vector_store %arg15[%c0_8, %c0_9], %9 {strides = array<i32>} : memref<8x128xf32, #tpu.memory_space<vmem>>, vector<1x128xf32>,
    %c10 = arith.constant 10 : index
    %11 = memref.load %arg0[%c10] : memref<16xf32, #tpu.memory_space<smem>>
    %12 = vector.broadcast %11 : f32 to vector<1x128xf32>
    %13 = arith.addf %12, %4 : vector<1x128xf32>
    %c1 = arith.constant 1 : index
    %c0_10 = arith.constant 0 : index
    %14 = vector.load %arg15[%c1, %c0_10] : memref<8x128xf32, #tpu.memory_space<vmem>>, vector<1x128xf32>
    tpu.vector_store %arg15[%c1, %c0_10], %13 {strides = array<i32>} : memref<8x128xf32, #tpu.memory_space<vmem>>, vector<1x128xf32>,
    %c11 = arith.constant 11 : index
    %15 = memref.load %arg0[%c11] : memref<16xf32, #tpu.memory_space<smem>>
    %16 = vector.broadcast %15 : f32 to vector<1x128xf32>
    %17 = arith.addf %16, %4 : vector<1x128xf32>
    %c2 = arith.constant 2 : index
    %c0_11 = arith.constant 0 : index
    %18 = vector.load %arg15[%c2, %c0_11] : memref<8x128xf32, #tpu.memory_space<vmem>>, vector<1x128xf32>
    tpu.vector_store %arg15[%c2, %c0_11], %17 {strides = array<i32>} : memref<8x128xf32, #tpu.memory_space<vmem>>, vector<1x128xf32>,
    %cst_12 = arith.constant 1.000000e+00 : f32
    %19 = vector.broadcast %cst_12 : f32 to vector<1x128xf32>
    %20 = arith.addf %19, %4 : vector<1x128xf32>
    %c3 = arith.constant 3 : index
    %c0_13 = arith.constant 0 : index
    %21 = vector.load %arg15[%c3, %c0_13] : memref<8x128xf32, #tpu.memory_space<vmem>>, vector<1x128xf32>
    tpu.vector_store %arg15[%c3, %c0_13], %20 {strides = array<i32>} : memref<8x128xf32, #tpu.memory_space<vmem>>, vector<1x128xf32>,
    %c0_14 = arith.constant 0 : index
    %22 = memref.load %arg0[%c0_14] : memref<16xf32, #tpu.memory_space<smem>>
    %c1_15 = arith.constant 1 : index
    %23 = memref.load %arg0[%c1_15] : memref<16xf32, #tpu.memory_space<smem>>
    %c2_16 = arith.constant 2 : index
    %24 = memref.load %arg0[%c2_16] : memref<16xf32, #tpu.memory_space<smem>>
    %c3_17 = arith.constant 3 : index
    %25 = memref.load %arg0[%c3_17] : memref<16xf32, #tpu.memory_space<smem>>
    %c4 = arith.constant 4 : index
    %26 = memref.load %arg0[%c4] : memref<16xf32, #tpu.memory_space<smem>>
    %c5 = arith.constant 5 : index
    %27 = memref.load %arg0[%c5] : memref<16xf32, #tpu.memory_space<smem>>
    %c6 = arith.constant 6 : index
    %28 = memref.load %arg0[%c6] : memref<16xf32, #tpu.memory_space<smem>>
    %c7 = arith.constant 7 : index
    %29 = memref.load %arg0[%c7] : memref<16xf32, #tpu.memory_space<smem>>
    %c8 = arith.constant 8 : index
    %30 = memref.load %arg0[%c8] : memref<16xf32, #tpu.memory_space<smem>>
    %c0_18 = arith.constant 0 : index
    %c0_19 = arith.constant 0 : index
    %31 = vector.load %arg2[%c0_18, %c0_19] : memref<2x256xf32, #tpu.memory_space<vmem>>, vector<1x256xf32>
    %c1_20 = arith.constant 1 : index
    %c0_21 = arith.constant 0 : index
    %32 = vector.load %arg2[%c1_20, %c0_21] : memref<2x256xf32, #tpu.memory_space<vmem>>, vector<1x256xf32>
    %33 = tpu.iota {dimensions = array<i32: 0>} : vector<48x256xi32>
    %34 = arith.sitofp %33 : vector<48x256xi32> to vector<48x256xf32>
    %35 = tpu.iota {dimensions = array<i32: 0>} : vector<48x256xi32>
    %36 = arith.sitofp %35 : vector<48x256xi32> to vector<48x256xf32>
    %37 = tpu.iota {dimensions = array<i32: 1>} : vector<1x128xi32>
    %c3_i32 = arith.constant 3 : i32
    %38 = vector.broadcast %c3_i32 : i32 to vector<1x128xi32>
    %39 = arith.cmpi sge, %37, %38 : vector<1x128xi32>
    %c6_i32 = arith.constant 6 : i32
    %40 = vector.broadcast %c6_i32 : i32 to vector<1x128xi32>
    %41 = arith.cmpi slt, %37, %40 : vector<1x128xi32>
    %42 = arith.andi %39, %41 : vector<1x128xi1>
    %43 = tpu.iota {dimensions = array<i32: 0>} : vector<8x128xi32>
    %44 = tpu.iota {dimensions = array<i32: 1>} : vector<8x128xi32>
    %45 = arith.cmpi eq, %43, %44 : vector<8x128xi32>
    %c6_i32_22 = arith.constant 6 : i32
    %46 = vector.broadcast %c6_i32_22 : i32 to vector<8x128xi32>
    %47 = arith.cmpi slt, %43, %46 : vector<8x128xi32>
    %48 = arith.andi %45, %47 : vector<8x128xi1>
    %cst_23 = arith.constant 1.000000e+00 : f32
    %cst_24 = arith.constant 0.000000e+00 : f32
    %49 = vector.broadcast %cst_23 : f32 to vector<8x128xf32>
    %50 = vector.broadcast %cst_24 : f32 to vector<8x128xf32>
    %51 = arith.select %48, %49, %50 : vector<8x128xi1>, vector<8x128xf32>
    %52 = tpu.iota {dimensions = array<i32: 1>} : vector<1x128xi32>
    %c0_i32 = arith.constant 0 : i32
    %53 = vector.broadcast %c0_i32 : i32 to vector<1x128xi32>
    %54 = arith.cmpi eq, %52, %53 : vector<1x128xi32>
    %cst_25 = arith.constant 1.000000e+00 : f32
    %cst_26 = arith.constant 0.000000e+00 : f32
    %55 = vector.broadcast %cst_25 : f32 to vector<1x128xf32>
    %56 = vector.broadcast %cst_26 : f32 to vector<1x128xf32>
    %57 = arith.select %54, %55, %56 : vector<1x128xi1>, vector<1x128xf32>
    %c1_i32 = arith.constant 1 : i32
    %58 = vector.broadcast %c1_i32 : i32 to vector<1x128xi32>
    %59 = arith.cmpi eq, %52, %58 : vector<1x128xi32>
    %cst_27 = arith.constant 1.000000e+00 : f32
    %cst_28 = arith.constant 0.000000e+00 : f32
    %60 = vector.broadcast %cst_27 : f32 to vector<1x128xf32>
    %61 = vector.broadcast %cst_28 : f32 to vector<1x128xf32>
    %62 = arith.select %59, %60, %61 : vector<1x128xi1>, vector<1x128xf32>
    %c2_i32 = arith.constant 2 : i32
    %63 = vector.broadcast %c2_i32 : i32 to vector<1x128xi32>
    %64 = arith.cmpi eq, %52, %63 : vector<1x128xi32>
    %cst_29 = arith.constant 1.000000e+00 : f32
    %cst_30 = arith.constant 0.000000e+00 : f32
    %65 = vector.broadcast %cst_29 : f32 to vector<1x128xf32>
    %66 = vector.broadcast %cst_30 : f32 to vector<1x128xf32>
    %67 = arith.select %64, %65, %66 : vector<1x128xi1>, vector<1x128xf32>
    %c3_i32_31 = arith.constant 3 : i32
    %68 = vector.broadcast %c3_i32_31 : i32 to vector<1x128xi32>
    %69 = arith.cmpi eq, %52, %68 : vector<1x128xi32>
    %cst_32 = arith.constant 1.000000e+00 : f32
    %cst_33 = arith.constant 0.000000e+00 : f32
    %70 = vector.broadcast %cst_32 : f32 to vector<1x128xf32>
    %71 = vector.broadcast %cst_33 : f32 to vector<1x128xf32>
    %72 = arith.select %69, %70, %71 : vector<1x128xi1>, vector<1x128xf32>
    %c4_i32 = arith.constant 4 : i32
    %73 = vector.broadcast %c4_i32 : i32 to vector<1x128xi32>
    %74 = arith.cmpi eq, %52, %73 : vector<1x128xi32>
    %cst_34 = arith.constant 1.000000e+00 : f32
    %cst_35 = arith.constant 0.000000e+00 : f32
    %75 = vector.broadcast %cst_34 : f32 to vector<1x128xf32>
    %76 = vector.broadcast %cst_35 : f32 to vector<1x128xf32>
    %77 = arith.select %74, %75, %76 : vector<1x128xi1>, vector<1x128xf32>
    %c5_i32 = arith.constant 5 : i32
    %78 = vector.broadcast %c5_i32 : i32 to vector<1x128xi32>
    %79 = arith.cmpi eq, %52, %78 : vector<1x128xi32>
    %cst_36 = arith.constant 1.000000e+00 : f32
    %cst_37 = arith.constant 0.000000e+00 : f32
    %80 = vector.broadcast %cst_36 : f32 to vector<1x128xf32>
    %81 = vector.broadcast %cst_37 : f32 to vector<1x128xf32>
    %82 = arith.select %79, %80, %81 : vector<1x128xi1>, vector<1x128xf32>
    %c0_i32_38 = arith.constant 0 : i32
    %c5_i32_39 = arith.constant 5 : i32
    %83 = arith.addi %c0_i32_38, %c5_i32_39 : i32
    %c1_i32_40 = arith.constant 1 : i32
    scf.for %arg16 = %c0_i32_38 to %83 step %c1_i32_40  : i32 {
      %c1_i32_42 = arith.constant 1 : i32
      %84 = arith.muli %arg16, %c1_i32_42 : i32
      %c0_i32_43 = arith.constant 0 : i32
      %85 = arith.addi %c0_i32_43, %84 : i32
      %c0_44 = arith.constant 0 : index
      %c0_45 = arith.constant 0 : index
      %86 = vector.load %arg15[%c0_44, %c0_45] : memref<8x128xf32, #tpu.memory_space<vmem>>, vector<1x128xf32>
      %cst_46 = arith.constant dense<0xFF800000> : vector<1xf32>
      %87 = vector.multi_reduction <maximumf>, %86, %cst_46 [1] : vector<1x128xf32> to vector<1xf32>
      %88 = vector.shape_cast %87 : vector<1xf32> to vector<1x1xf32>
      %c1_47 = arith.constant 1 : index
      %c0_48 = arith.constant 0 : index
      %89 = vector.load %arg15[%c1_47, %c0_48] : memref<8x128xf32, #tpu.memory_space<vmem>>, vector<1x128xf32>
      %cst_49 = arith.constant dense<0xFF800000> : vector<1xf32>
      %90 = vector.multi_reduction <maximumf>, %89, %cst_49 [1] : vector<1x128xf32> to vector<1xf32>
      %91 = vector.shape_cast %90 : vector<1xf32> to vector<1x1xf32>
      %c2_50 = arith.constant 2 : index
      %c0_51 = arith.constant 0 : index
      %92 = vector.load %arg15[%c2_50, %c0_51] : memref<8x128xf32, #tpu.memory_space<vmem>>, vector<1x128xf32>
      %cst_52 = arith.constant dense<0xFF800000> : vector<1xf32>
      %93 = vector.multi_reduction <maximumf>, %92, %cst_52 [1] : vector<1x128xf32> to vector<1xf32>
      %94 = vector.shape_cast %93 : vector<1xf32> to vector<1x1xf32>
      %c3_53 = arith.constant 3 : index
      %c0_54 = arith.constant 0 : index
      %95 = vector.load %arg15[%c3_53, %c0_54] : memref<8x128xf32, #tpu.memory_space<vmem>>, vector<1x128xf32>
      %cst_55 = arith.constant dense<0xFF800000> : vector<1xf32>
      %96 = vector.multi_reduction <maximumf>, %95, %cst_55 [1] : vector<1x128xf32> to vector<1xf32>
      %97 = vector.shape_cast %96 : vector<1xf32> to vector<1x1xf32>
      %98 = vector.broadcast %23 : f32 to vector<1x1xf32>
      %99 = arith.cmpf ole, %88, %98 : vector<1x1xf32>
      %cst_56 = arith.constant 0.000000e+00 : f32
      %100 = vector.broadcast %cst_56 : f32 to vector<1x1xf32>
      %101 = arith.cmpf oge, %88, %100 : vector<1x1xf32>
      %102 = arith.andi %99, %101 : vector<1x1xi1>
      %103 = vector.broadcast %24 : f32 to vector<1x1xf32>
      %104 = arith.cmpf ole, %91, %103 : vector<1x1xf32>
      %cst_57 = arith.constant 0.000000e+00 : f32
      %105 = vector.broadcast %cst_57 : f32 to vector<1x1xf32>
      %106 = arith.cmpf oge, %88, %105 : vector<1x1xf32>
      %107 = arith.andi %104, %106 : vector<1x1xi1>
      %108 = arith.andi %102, %107 : vector<1x1xi1>
      %cst_58 = arith.constant 1.000000e+00 : f32
      %cst_59 = arith.constant 0.000000e+00 : f32
      %109 = vector.broadcast %cst_58 : f32 to vector<1x1xf32>
      %110 = vector.broadcast %cst_59 : f32 to vector<1x1xf32>
      %111 = arith.select %108, %109, %110 : vector<1x1xi1>, vector<1x1xf32>
      %112 = arith.mulf %97, %111 : vector<1x1xf32>
      %cst_60 = arith.constant 0.0174532924 : f32
      %113 = vector.broadcast %cst_60 : f32 to vector<1x1xf32>
      %114 = arith.mulf %94, %113 : vector<1x1xf32>
      %cst_61 = arith.constant 1.57079637 : f32
      %115 = vector.broadcast %cst_61 : f32 to vector<1x1xf32>
      %116 = arith.addf %114, %115 : vector<1x1xf32>
      %cst_62 = arith.constant 0.318309873 : f32
      %117 = vector.broadcast %cst_62 : f32 to vector<1x1xf32>
      %118 = arith.mulf %116, %117 : vector<1x1xf32>
      %cst_63 = arith.constant 5.000000e-01 : f32
      %119 = vector.broadcast %cst_63 : f32 to vector<1x1xf32>
      %120 = arith.addf %118, %119 : vector<1x1xf32>
      %121 = math.floor %120 : vector<1x1xf32>
      %cst_64 = arith.constant 3.14159274 : f32
      %122 = vector.broadcast %cst_64 : f32 to vector<1x1xf32>
      %123 = arith.mulf %121, %122 : vector<1x1xf32>
      %124 = arith.subf %116, %123 : vector<1x1xf32>
      %125 = arith.mulf %124, %124 : vector<1x1xf32>
      %cst_65 = arith.constant 2.75573188E-6 : f32
      %126 = vector.broadcast %cst_65 : f32 to vector<1x1xf32>
      %127 = arith.mulf %125, %126 : vector<1x1xf32>
      %cst_66 = arith.constant -1.98412701E-4 : f32
      %128 = vector.broadcast %cst_66 : f32 to vector<1x1xf32>
      %129 = arith.addf %128, %127 : vector<1x1xf32>
      %130 = arith.mulf %125, %129 : vector<1x1xf32>
      %cst_67 = arith.constant 0.00833333377 : f32
      %131 = vector.broadcast %cst_67 : f32 to vector<1x1xf32>
      %132 = arith.addf %131, %130 : vector<1x1xf32>
      %133 = arith.mulf %125, %132 : vector<1x1xf32>
      %cst_68 = arith.constant -0.166666672 : f32
      %134 = vector.broadcast %cst_68 : f32 to vector<1x1xf32>
      %135 = arith.addf %134, %133 : vector<1x1xf32>
      %136 = arith.mulf %125, %135 : vector<1x1xf32>
      %cst_69 = arith.constant 1.000000e+00 : f32
      %137 = vector.broadcast %cst_69 : f32 to vector<1x1xf32>
      %138 = arith.addf %137, %136 : vector<1x1xf32>
      %139 = arith.mulf %124, %138 : vector<1x1xf32>
      %cst_70 = arith.constant 5.000000e-01 : f32
      %140 = vector.broadcast %cst_70 : f32 to vector<1x1xf32>
      %141 = arith.mulf %121, %140 : vector<1x1xf32>
      %142 = math.floor %141 : vector<1x1xf32>
      %cst_71 = arith.constant 2.000000e+00 : f32
      %143 = vector.broadcast %cst_71 : f32 to vector<1x1xf32>
      %144 = arith.mulf %143, %142 : vector<1x1xf32>
      %145 = arith.subf %121, %144 : vector<1x1xf32>
      %cst_72 = arith.constant 5.000000e-01 : f32
      %146 = vector.broadcast %cst_72 : f32 to vector<1x1xf32>
      %147 = arith.cmpf ogt, %145, %146 : vector<1x1xf32>
      %cst_73 = arith.constant 0.000000e+00 : f32
      %148 = vector.broadcast %cst_73 : f32 to vector<1x1xf32>
      %149 = arith.subf %148, %139 : vector<1x1xf32>
      %150 = arith.select %147, %149, %139 : vector<1x1xi1>, vector<1x1xf32>
      %cst_74 = arith.constant 0.318309873 : f32
      %151 = vector.broadcast %cst_74 : f32 to vector<1x1xf32>
      %152 = arith.mulf %114, %151 : vector<1x1xf32>
      %cst_75 = arith.constant 5.000000e-01 : f32
      %153 = vector.broadcast %cst_75 : f32 to vector<1x1xf32>
      %154 = arith.addf %152, %153 : vector<1x1xf32>
      %155 = math.floor %154 : vector<1x1xf32>
      %cst_76 = arith.constant 3.14159274 : f32
      %156 = vector.broadcast %cst_76 : f32 to vector<1x1xf32>
      %157 = arith.mulf %155, %156 : vector<1x1xf32>
      %158 = arith.subf %114, %157 : vector<1x1xf32>
      %159 = arith.mulf %158, %158 : vector<1x1xf32>
      %cst_77 = arith.constant 2.75573188E-6 : f32
      %160 = vector.broadcast %cst_77 : f32 to vector<1x1xf32>
      %161 = arith.mulf %159, %160 : vector<1x1xf32>
      %cst_78 = arith.constant -1.98412701E-4 : f32
      %162 = vector.broadcast %cst_78 : f32 to vector<1x1xf32>
      %163 = arith.addf %162, %161 : vector<1x1xf32>
      %164 = arith.mulf %159, %163 : vector<1x1xf32>
      %cst_79 = arith.constant 0.00833333377 : f32
      %165 = vector.broadcast %cst_79 : f32 to vector<1x1xf32>
      %166 = arith.addf %165, %164 : vector<1x1xf32>
      %167 = arith.mulf %159, %166 : vector<1x1xf32>
      %cst_80 = arith.constant -0.166666672 : f32
      %168 = vector.broadcast %cst_80 : f32 to vector<1x1xf32>
      %169 = arith.addf %168, %167 : vector<1x1xf32>
      %170 = arith.mulf %159, %169 : vector<1x1xf32>
      %cst_81 = arith.constant 1.000000e+00 : f32
      %171 = vector.broadcast %cst_81 : f32 to vector<1x1xf32>
      %172 = arith.addf %171, %170 : vector<1x1xf32>
      %173 = arith.mulf %158, %172 : vector<1x1xf32>
      %cst_82 = arith.constant 5.000000e-01 : f32
      %174 = vector.broadcast %cst_82 : f32 to vector<1x1xf32>
      %175 = arith.mulf %155, %174 : vector<1x1xf32>
      %176 = math.floor %175 : vector<1x1xf32>
      %cst_83 = arith.constant 2.000000e+00 : f32
      %177 = vector.broadcast %cst_83 : f32 to vector<1x1xf32>
      %178 = arith.mulf %177, %176 : vector<1x1xf32>
      %179 = arith.subf %155, %178 : vector<1x1xf32>
      %cst_84 = arith.constant 5.000000e-01 : f32
      %180 = vector.broadcast %cst_84 : f32 to vector<1x1xf32>
      %181 = arith.cmpf ogt, %179, %180 : vector<1x1xf32>
      %cst_85 = arith.constant 0.000000e+00 : f32
      %182 = vector.broadcast %cst_85 : f32 to vector<1x1xf32>
      %183 = arith.subf %182, %173 : vector<1x1xf32>
      %184 = arith.select %181, %183, %173 : vector<1x1xi1>, vector<1x1xf32>
      %cst_86 = arith.constant 0.000000e+00 : f32
      %185 = vector.broadcast %cst_86 : f32 to vector<1x1xf32>
      %186 = arith.subf %185, %184 : vector<1x1xf32>
      %187 = vector.broadcast %150 : vector<1x1xf32> to vector<1x256xf32>
      %188 = arith.mulf %31, %187 : vector<1x256xf32>
      %189 = vector.broadcast %88 : vector<1x1xf32> to vector<1x256xf32>
      %190 = arith.addf %189, %188 : vector<1x256xf32>
      %191 = vector.broadcast %186 : vector<1x1xf32> to vector<1x256xf32>
      %192 = arith.mulf %32, %191 : vector<1x256xf32>
      %193 = arith.subf %190, %192 : vector<1x256xf32>
      %194 = vector.broadcast %186 : vector<1x1xf32> to vector<1x256xf32>
      %195 = arith.mulf %31, %194 : vector<1x256xf32>
      %196 = vector.broadcast %91 : vector<1x1xf32> to vector<1x256xf32>
      %197 = arith.addf %196, %195 : vector<1x256xf32>
      %198 = vector.broadcast %150 : vector<1x1xf32> to vector<1x256xf32>
      %199 = arith.mulf %32, %198 : vector<1x256xf32>
      %200 = arith.addf %197, %199 : vector<1x256xf32>
      %201 = vector.broadcast %200 : vector<1x256xf32> to vector<48x256xf32>
      %202 = arith.subf %34, %201 : vector<48x256xf32>
      %203 = math.absf %202 : vector<48x256xf32>
      %cst_87 = arith.constant 1.000000e+00 : f32
      %204 = vector.broadcast %cst_87 : f32 to vector<48x256xf32>
      %205 = arith.subf %204, %203 : vector<48x256xf32>
      %cst_88 = arith.constant 0.000000e+00 : f32
      %cst_89 = arith.constant 1.000000e+00 : f32
      %206 = vector.broadcast %cst_88 : f32 to vector<48x256xf32>
      %207 = arith.maximumf %206, %205 : vector<48x256xf32>
      %208 = vector.broadcast %cst_89 : f32 to vector<48x256xf32>
      %209 = arith.minimumf %208, %207 : vector<48x256xf32>
      %210 = vector.broadcast %193 : vector<1x256xf32> to vector<48x256xf32>
      %211 = arith.subf %36, %210 : vector<48x256xf32>
      %212 = math.absf %211 : vector<48x256xf32>
      %cst_90 = arith.constant 1.000000e+00 : f32
      %213 = vector.broadcast %cst_90 : f32 to vector<48x256xf32>
      %214 = arith.subf %213, %212 : vector<48x256xf32>
      %cst_91 = arith.constant 0.000000e+00 : f32
      %cst_92 = arith.constant 1.000000e+00 : f32
      %215 = vector.broadcast %cst_91 : f32 to vector<48x256xf32>
      %216 = arith.maximumf %215, %214 : vector<48x256xf32>
      %217 = vector.broadcast %cst_92 : f32 to vector<48x256xf32>
      %218 = arith.minimumf %217, %216 : vector<48x256xf32>
      %c0_93 = arith.constant 0 : index
      %c0_94 = arith.constant 0 : index
      %219 = vector.load %arg3[%c0_93, %c0_94] : memref<144x48xbf16, #tpu.memory_space<vmem>>, vector<144x48xbf16>
      %220 = arith.truncf %209 : vector<48x256xf32> to vector<48x256xbf16>
      %cst_95 = arith.constant dense<0.000000e+00> : vector<144x256xf32>
      %221 = tpu.matmul %219, %220, %cst_95 {dimension_numbers = #tpu.dot_dimension_numbers<[1], [0], [0], [1], [0, 0, 1, 1], [], []>} : vector<144x48xbf16>, vector<48x256xbf16>, vector<144x256xf32> -> vector<144x256xf32>
      %c1_96 = arith.constant 1 : index
      %c0_97 = arith.constant 0 : index
      %222 = vector.load %arg14[%c1_96, %c0_97] : memref<4x768xf32, #tpu.memory_space<vmem>>, vector<3x768xf32>
      %c0_98 = arith.constant 0 : index
      %c0_99 = arith.constant 0 : index
      %223 = vector.load %arg14[%c0_98, %c0_99] : memref<4x768xf32, #tpu.memory_space<vmem>>, vector<3x768xf32>
      tpu.vector_store %arg14[%c0_98, %c0_99], %222 {strides = array<i32>} : memref<4x768xf32, #tpu.memory_space<vmem>>, vector<3x768xf32>,
      %224 = vector.extract_strided_slice %221 {offsets = [0, 0], sizes = [48, 256], strides = [1, 1]} : vector<144x256xf32> to vector<48x256xf32>
      %225 = arith.mulf %224, %218 : vector<48x256xf32>
      %cst_100 = arith.constant dense<0.000000e+00> : vector<256xf32>
      %226 = vector.multi_reduction <add>, %225, %cst_100 [0] : vector<48x256xf32> to vector<256xf32>
      %227 = vector.shape_cast %226 : vector<256xf32> to vector<1x256xf32>
      %c3_101 = arith.constant 3 : index
      %c0_102 = arith.constant 0 : index
      %228 = vector.load %arg14[%c3_101, %c0_102] : memref<4x768xf32, #tpu.memory_space<vmem>>, vector<1x256xf32>
      tpu.vector_store %arg14[%c3_101, %c0_102], %227 {strides = array<i32>} : memref<4x768xf32, #tpu.memory_space<vmem>>, vector<1x256xf32>,
      %229 = vector.extract_strided_slice %221 {offsets = [48, 0], sizes = [48, 256], strides = [1, 1]} : vector<144x256xf32> to vector<48x256xf32>
      %230 = arith.mulf %229, %218 : vector<48x256xf32>
      %cst_103 = arith.constant dense<0.000000e+00> : vector<256xf32>
      %231 = vector.multi_reduction <add>, %230, %cst_103 [0] : vector<48x256xf32> to vector<256xf32>
      %232 = vector.shape_cast %231 : vector<256xf32> to vector<1x256xf32>
      %c3_104 = arith.constant 3 : index
      %c256 = arith.constant 256 : index
      %233 = vector.load %arg14[%c3_104, %c256] : memref<4x768xf32, #tpu.memory_space<vmem>>, vector<1x256xf32>
      tpu.vector_store %arg14[%c3_104, %c256], %232 {strides = array<i32>} : memref<4x768xf32, #tpu.memory_space<vmem>>, vector<1x256xf32>,
      %234 = vector.extract_strided_slice %221 {offsets = [96, 0], sizes = [48, 256], strides = [1, 1]} : vector<144x256xf32> to vector<48x256xf32>
      %235 = arith.mulf %234, %218 : vector<48x256xf32>
      %cst_105 = arith.constant dense<0.000000e+00> : vector<256xf32>
      %236 = vector.multi_reduction <add>, %235, %cst_105 [0] : vector<48x256xf32> to vector<256xf32>
      %237 = vector.shape_cast %236 : vector<256xf32> to vector<1x256xf32>
      %c3_106 = arith.constant 3 : index
      %c512 = arith.constant 512 : index
      %238 = vector.load %arg14[%c3_106, %c512] : memref<4x768xf32, #tpu.memory_space<vmem>>, vector<1x256xf32>
      tpu.vector_store %arg14[%c3_106, %c512], %237 {strides = array<i32>} : memref<4x768xf32, #tpu.memory_space<vmem>>, vector<1x256xf32>,
      %c0_107 = arith.constant 0 : index
      %c0_108 = arith.constant 0 : index
      %239 = vector.load %arg14[%c0_107, %c0_108] : memref<4x768xf32, #tpu.memory_space<vmem>>, vector<4x768xf32>
      %240 = vector.extract_strided_slice %239 {offsets = [0, 0], sizes = [4, 256], strides = [1, 1]} : vector<4x768xf32> to vector<4x256xf32>
      %241 = vector.extract_strided_slice %239 {offsets = [0, 256], sizes = [4, 256], strides = [1, 1]} : vector<4x768xf32> to vector<4x256xf32>
      %242 = vector.extract_strided_slice %239 {offsets = [0, 512], sizes = [4, 256], strides = [1, 1]} : vector<4x768xf32> to vector<4x256xf32>
      %243 = vector.broadcast %28 : f32 to vector<4x256xf32>
      %244 = arith.mulf %243, %240 : vector<4x256xf32>
      %245 = vector.broadcast %29 : f32 to vector<4x256xf32>
      %246 = arith.mulf %245, %241 : vector<4x256xf32>
      %247 = arith.addf %244, %246 : vector<4x256xf32>
      %248 = vector.broadcast %30 : f32 to vector<4x256xf32>
      %249 = arith.mulf %248, %242 : vector<4x256xf32>
      %250 = arith.addf %247, %249 : vector<4x256xf32>
      %cst_109 = arith.constant dense<0xFF800000> : vector<256xf32>
      %251 = vector.multi_reduction <maximumf>, %250, %cst_109 [0] : vector<4x256xf32> to vector<256xf32>
      %252 = vector.shape_cast %251 : vector<256xf32> to vector<1x256xf32>
      %253 = vector.broadcast %252 : vector<1x256xf32> to vector<4x256xf32>
      %254 = arith.subf %250, %253 : vector<4x256xf32>
      %255 = math.exp %254 : vector<4x256xf32>
      %cst_110 = arith.constant dense<0.000000e+00> : vector<256xf32>
      %256 = vector.multi_reduction <add>, %255, %cst_110 [0] : vector<4x256xf32> to vector<256xf32>
      %257 = vector.shape_cast %256 : vector<256xf32> to vector<1x256xf32>
      %258 = tpu.reciprocal %257 {approx = true} : vector<1x256xf32> -> vector<1x256xf32>
      %259 = vector.broadcast %258 : vector<1x256xf32> to vector<4x256xf32>
      %260 = arith.mulf %255, %259 : vector<4x256xf32>
      %261 = arith.mulf %240, %260 : vector<4x256xf32>
      %262 = arith.mulf %241, %260 : vector<4x256xf32>
      %263 = arith.mulf %242, %260 : vector<4x256xf32>
      %264 = tpu.concatenate %261, %262, %263 in 1 : vector<4x256xf32>, vector<4x256xf32>, vector<4x256xf32> -> vector<4x768xf32>
      %265 = arith.truncf %264 : vector<4x768xf32> to vector<4x768xbf16>
      %c0_111 = arith.constant 0 : index
      %c0_112 = arith.constant 0 : index
      %266 = vector.load %arg4[%c0_111, %c0_112] : memref<768x128xbf16, #tpu.memory_space<vmem>>, vector<768x128xbf16>
      %cst_113 = arith.constant dense<0.000000e+00> : vector<4x128xf32>
      %267 = tpu.matmul %265, %266, %cst_113 {dimension_numbers = #tpu.dot_dimension_numbers<[1], [0], [0], [1], [0, 0, 1, 1], [], []>} : vector<4x768xbf16>, vector<768x128xbf16>, vector<4x128xf32> -> vector<4x128xf32>
      %268 = vector.extract_strided_slice %267 {offsets = [1, 0], sizes = [3, 128], strides = [1, 1]} : vector<4x128xf32> to vector<3x128xf32>
      %c0_114 = arith.constant 0 : index
      %c0_115 = arith.constant 0 : index
      %269 = vector.load %arg5[%c0_114, %c0_115] : memref<1x128xf32, #tpu.memory_space<vmem>>, vector<1x128xf32>
      %270 = vector.broadcast %269 : vector<1x128xf32> to vector<3x128xf32>
      %271 = arith.addf %268, %270 : vector<3x128xf32>
      %cst_116 = arith.constant 0.000000e+00 : f32
      %272 = vector.broadcast %cst_116 : f32 to vector<3x128xf32>
      %273 = arith.maximumf %271, %272 : vector<3x128xf32>
      %274 = arith.truncf %273 : vector<3x128xf32> to vector<3x128xbf16>
      %c0_117 = arith.constant 0 : index
      %c0_118 = arith.constant 0 : index
      %275 = vector.load %arg6[%c0_117, %c0_118] : memref<128x512xbf16, #tpu.memory_space<vmem>>, vector<128x512xbf16>
      %cst_119 = arith.constant dense<0.000000e+00> : vector<3x512xf32>
      %276 = tpu.matmul %274, %275, %cst_119 {dimension_numbers = #tpu.dot_dimension_numbers<[1], [0], [0], [1], [0, 0, 1, 1], [], []>} : vector<3x128xbf16>, vector<128x512xbf16>, vector<3x512xf32> -> vector<3x512xf32>
      %c0_120 = arith.constant 0 : index
      %c0_121 = arith.constant 0 : index
      %277 = vector.load %arg8[%c0_120, %c0_121] : memref<1x512xf32, #tpu.memory_space<vmem>>, vector<1x512xf32>
      %278 = vector.broadcast %277 : vector<1x512xf32> to vector<3x512xf32>
      %279 = arith.addf %276, %278 : vector<3x512xf32>
      %c0_122 = arith.constant 0 : index
      %c0_123 = arith.constant 0 : index
      %280 = vector.load %arg7[%c0_122, %c0_123] : memref<128x512xbf16, #tpu.memory_space<vmem>>, vector<128x512xbf16>
      %cst_124 = arith.constant 0.000000e+00 : f32
      %281 = vector.broadcast %cst_124 : f32 to vector<1x128xf32>
      %cst_125 = arith.constant 0.000000e+00 : f32
      %282 = vector.broadcast %cst_125 : f32 to vector<1x128xf32>
      %283 = vector.extract_strided_slice %279 {offsets = [0, 0], sizes = [1, 512], strides = [1, 1]} : vector<3x512xf32> to vector<1x512xf32>
      %284 = arith.truncf %281 : vector<1x128xf32> to vector<1x128xbf16>
      %cst_126 = arith.constant dense<0.000000e+00> : vector<1x512xf32>
      %285 = tpu.matmul %284, %280, %cst_126 {dimension_numbers = #tpu.dot_dimension_numbers<[1], [0], [0], [1], [0, 0, 1, 1], [], []>} : vector<1x128xbf16>, vector<128x512xbf16>, vector<1x512xf32> -> vector<1x512xf32>
      %286 = arith.addf %283, %285 : vector<1x512xf32>
      %287 = vector.extract_strided_slice %286 {offsets = [0, 0], sizes = [1, 128], strides = [1, 1]} : vector<1x512xf32> to vector<1x128xf32>
      %288 = arith.negf %287 : vector<1x128xf32>
      %289 = math.exp %288 : vector<1x128xf32>
      %cst_127 = arith.constant 1.000000e+00 : f32
      %290 = vector.broadcast %cst_127 : f32 to vector<1x128xf32>
      %291 = arith.addf %290, %289 : vector<1x128xf32>
      %292 = arith.divf %290, %291 : vector<1x128xf32>
      %293 = vector.extract_strided_slice %286 {offsets = [0, 128], sizes = [1, 128], strides = [1, 1]} : vector<1x512xf32> to vector<1x128xf32>
      %294 = arith.negf %293 : vector<1x128xf32>
      %295 = math.exp %294 : vector<1x128xf32>
      %cst_128 = arith.constant 1.000000e+00 : f32
      %296 = vector.broadcast %cst_128 : f32 to vector<1x128xf32>
      %297 = arith.addf %296, %295 : vector<1x128xf32>
      %298 = arith.divf %296, %297 : vector<1x128xf32>
      %299 = vector.extract_strided_slice %286 {offsets = [0, 256], sizes = [1, 128], strides = [1, 1]} : vector<1x512xf32> to vector<1x128xf32>
      %300 = math.tanh %299 : vector<1x128xf32>
      %301 = vector.extract_strided_slice %286 {offsets = [0, 384], sizes = [1, 128], strides = [1, 1]} : vector<1x512xf32> to vector<1x128xf32>
      %302 = arith.negf %301 : vector<1x128xf32>
      %303 = math.exp %302 : vector<1x128xf32>
      %cst_129 = arith.constant 1.000000e+00 : f32
      %304 = vector.broadcast %cst_129 : f32 to vector<1x128xf32>
      %305 = arith.addf %304, %303 : vector<1x128xf32>
      %306 = arith.divf %304, %305 : vector<1x128xf32>
      %307 = arith.mulf %298, %282 : vector<1x128xf32>
      %308 = arith.mulf %292, %300 : vector<1x128xf32>
      %309 = arith.addf %307, %308 : vector<1x128xf32>
      %310 = math.tanh %309 : vector<1x128xf32>
      %311 = arith.mulf %306, %310 : vector<1x128xf32>
      %312 = vector.extract_strided_slice %279 {offsets = [1, 0], sizes = [1, 512], strides = [1, 1]} : vector<3x512xf32> to vector<1x512xf32>
      %313 = arith.truncf %311 : vector<1x128xf32> to vector<1x128xbf16>
      %cst_130 = arith.constant dense<0.000000e+00> : vector<1x512xf32>
      %314 = tpu.matmul %313, %280, %cst_130 {dimension_numbers = #tpu.dot_dimension_numbers<[1], [0], [0], [1], [0, 0, 1, 1], [], []>} : vector<1x128xbf16>, vector<128x512xbf16>, vector<1x512xf32> -> vector<1x512xf32>
      %315 = arith.addf %312, %314 : vector<1x512xf32>
      %316 = vector.extract_strided_slice %315 {offsets = [0, 0], sizes = [1, 128], strides = [1, 1]} : vector<1x512xf32> to vector<1x128xf32>
      %317 = arith.negf %316 : vector<1x128xf32>
      %318 = math.exp %317 : vector<1x128xf32>
      %cst_131 = arith.constant 1.000000e+00 : f32
      %319 = vector.broadcast %cst_131 : f32 to vector<1x128xf32>
      %320 = arith.addf %319, %318 : vector<1x128xf32>
      %321 = arith.divf %319, %320 : vector<1x128xf32>
      %322 = vector.extract_strided_slice %315 {offsets = [0, 128], sizes = [1, 128], strides = [1, 1]} : vector<1x512xf32> to vector<1x128xf32>
      %323 = arith.negf %322 : vector<1x128xf32>
      %324 = math.exp %323 : vector<1x128xf32>
      %cst_132 = arith.constant 1.000000e+00 : f32
      %325 = vector.broadcast %cst_132 : f32 to vector<1x128xf32>
      %326 = arith.addf %325, %324 : vector<1x128xf32>
      %327 = arith.divf %325, %326 : vector<1x128xf32>
      %328 = vector.extract_strided_slice %315 {offsets = [0, 256], sizes = [1, 128], strides = [1, 1]} : vector<1x512xf32> to vector<1x128xf32>
      %329 = math.tanh %328 : vector<1x128xf32>
      %330 = vector.extract_strided_slice %315 {offsets = [0, 384], sizes = [1, 128], strides = [1, 1]} : vector<1x512xf32> to vector<1x128xf32>
      %331 = arith.negf %330 : vector<1x128xf32>
      %332 = math.exp %331 : vector<1x128xf32>
      %cst_133 = arith.constant 1.000000e+00 : f32
      %333 = vector.broadcast %cst_133 : f32 to vector<1x128xf32>
      %334 = arith.addf %333, %332 : vector<1x128xf32>
      %335 = arith.divf %333, %334 : vector<1x128xf32>
      %336 = arith.mulf %327, %309 : vector<1x128xf32>
      %337 = arith.mulf %321, %329 : vector<1x128xf32>
      %338 = arith.addf %336, %337 : vector<1x128xf32>
      %339 = math.tanh %338 : vector<1x128xf32>
      %340 = arith.mulf %335, %339 : vector<1x128xf32>
      %341 = vector.extract_strided_slice %279 {offsets = [2, 0], sizes = [1, 512], strides = [1, 1]} : vector<3x512xf32> to vector<1x512xf32>
      %342 = arith.truncf %340 : vector<1x128xf32> to vector<1x128xbf16>
      %cst_134 = arith.constant dense<0.000000e+00> : vector<1x512xf32>
      %343 = tpu.matmul %342, %280, %cst_134 {dimension_numbers = #tpu.dot_dimension_numbers<[1], [0], [0], [1], [0, 0, 1, 1], [], []>} : vector<1x128xbf16>, vector<128x512xbf16>, vector<1x512xf32> -> vector<1x512xf32>
      %344 = arith.addf %341, %343 : vector<1x512xf32>
      %345 = vector.extract_strided_slice %344 {offsets = [0, 0], sizes = [1, 128], strides = [1, 1]} : vector<1x512xf32> to vector<1x128xf32>
      %346 = arith.negf %345 : vector<1x128xf32>
      %347 = math.exp %346 : vector<1x128xf32>
      %cst_135 = arith.constant 1.000000e+00 : f32
      %348 = vector.broadcast %cst_135 : f32 to vector<1x128xf32>
      %349 = arith.addf %348, %347 : vector<1x128xf32>
      %350 = arith.divf %348, %349 : vector<1x128xf32>
      %351 = vector.extract_strided_slice %344 {offsets = [0, 128], sizes = [1, 128], strides = [1, 1]} : vector<1x512xf32> to vector<1x128xf32>
      %352 = arith.negf %351 : vector<1x128xf32>
      %353 = math.exp %352 : vector<1x128xf32>
      %cst_136 = arith.constant 1.000000e+00 : f32
      %354 = vector.broadcast %cst_136 : f32 to vector<1x128xf32>
      %355 = arith.addf %354, %353 : vector<1x128xf32>
      %356 = arith.divf %354, %355 : vector<1x128xf32>
      %357 = vector.extract_strided_slice %344 {offsets = [0, 256], sizes = [1, 128], strides = [1, 1]} : vector<1x512xf32> to vector<1x128xf32>
      %358 = math.tanh %357 : vector<1x128xf32>
      %359 = vector.extract_strided_slice %344 {offsets = [0, 384], sizes = [1, 128], strides = [1, 1]} : vector<1x512xf32> to vector<1x128xf32>
      %360 = arith.negf %359 : vector<1x128xf32>
      %361 = math.exp %360 : vector<1x128xf32>
      %cst_137 = arith.constant 1.000000e+00 : f32
      %362 = vector.broadcast %cst_137 : f32 to vector<1x128xf32>
      %363 = arith.addf %362, %361 : vector<1x128xf32>
      %364 = arith.divf %362, %363 : vector<1x128xf32>
      %365 = arith.mulf %356, %338 : vector<1x128xf32>
      %366 = arith.mulf %350, %358 : vector<1x128xf32>
      %367 = arith.addf %365, %366 : vector<1x128xf32>
      %368 = math.tanh %367 : vector<1x128xf32>
      %369 = arith.mulf %364, %368 : vector<1x128xf32>
      %370 = arith.truncf %369 : vector<1x128xf32> to vector<1x128xbf16>
      %c0_138 = arith.constant 0 : index
      %c0_139 = arith.constant 0 : index
      %371 = vector.load %arg9[%c0_138, %c0_139] : memref<128x512xbf16, #tpu.memory_space<vmem>>, vector<128x512xbf16>
      %cst_140 = arith.constant dense<0.000000e+00> : vector<1x512xf32>
      %372 = tpu.matmul %370, %371, %cst_140 {dimension_numbers = #tpu.dot_dimension_numbers<[1], [0], [0], [1], [0, 0, 1, 1], [], []>} : vector<1x128xbf16>, vector<128x512xbf16>, vector<1x512xf32> -> vector<1x512xf32>
      %c0_141 = arith.constant 0 : index
      %c0_142 = arith.constant 0 : index
      %373 = vector.load %arg10[%c0_141, %c0_142] : memref<1x512xf32, #tpu.memory_space<vmem>>, vector<1x512xf32>
      %374 = arith.addf %372, %373 : vector<1x512xf32>
      %cst_143 = arith.constant 0.000000e+00 : f32
      %375 = vector.broadcast %cst_143 : f32 to vector<1x512xf32>
      %376 = arith.maximumf %374, %375 : vector<1x512xf32>
      %377 = arith.truncf %376 : vector<1x512xf32> to vector<1x512xbf16>
      %c0_144 = arith.constant 0 : index
      %c0_145 = arith.constant 0 : index
      %378 = vector.load %arg11[%c0_144, %c0_145] : memref<512x128xbf16, #tpu.memory_space<vmem>>, vector<512x128xbf16>
      %cst_146 = arith.constant dense<0.000000e+00> : vector<1x128xf32>
      %379 = tpu.matmul %377, %378, %cst_146 {dimension_numbers = #tpu.dot_dimension_numbers<[1], [0], [0], [1], [0, 0, 1, 1], [], []>} : vector<1x512xbf16>, vector<512x128xbf16>, vector<1x128xf32> -> vector<1x128xf32>
      %c0_147 = arith.constant 0 : index
      %c0_148 = arith.constant 0 : index
      %380 = vector.load %arg12[%c0_147, %c0_148] : memref<1x128xf32, #tpu.memory_space<vmem>>, vector<1x128xf32>
      %381 = arith.addf %379, %380 : vector<1x128xf32>
      %382 = arith.negf %381 : vector<1x128xf32>
      %383 = math.exp %382 : vector<1x128xf32>
      %cst_149 = arith.constant 1.000000e+00 : f32
      %384 = vector.broadcast %cst_149 : f32 to vector<1x128xf32>
      %385 = arith.addf %384, %383 : vector<1x128xf32>
      %386 = arith.divf %384, %385 : vector<1x128xf32>
      %387 = arith.select %42, %386, %381 : vector<1x128xi1>, vector<1x128xf32>
      %388 = vector.broadcast %387 : vector<1x128xf32> to vector<8x128xf32>
      %389 = arith.mulf %388, %51 : vector<8x128xf32>
      %cst_150 = arith.constant dense<0.000000e+00> : vector<8xf32>
      %390 = vector.multi_reduction <add>, %389, %cst_150 [1] : vector<8x128xf32> to vector<8xf32>
      %391 = vector.shape_cast %390 : vector<8xf32> to vector<8x1xf32>
      %392 = vector.extract_strided_slice %391 {offsets = [0, 0], sizes = [1, 1], strides = [1, 1]} : vector<8x1xf32> to vector<1x1xf32>
      %393 = vector.extract_strided_slice %391 {offsets = [1, 0], sizes = [1, 1], strides = [1, 1]} : vector<8x1xf32> to vector<1x1xf32>
      %394 = vector.extract_strided_slice %391 {offsets = [2, 0], sizes = [1, 1], strides = [1, 1]} : vector<8x1xf32> to vector<1x1xf32>
      %395 = vector.extract_strided_slice %391 {offsets = [3, 0], sizes = [1, 1], strides = [1, 1]} : vector<8x1xf32> to vector<1x1xf32>
      %396 = vector.extract_strided_slice %391 {offsets = [4, 0], sizes = [1, 1], strides = [1, 1]} : vector<8x1xf32> to vector<1x1xf32>
      %397 = vector.extract_strided_slice %391 {offsets = [5, 0], sizes = [1, 1], strides = [1, 1]} : vector<8x1xf32> to vector<1x1xf32>
      %398 = arith.mulf %392, %150 : vector<1x1xf32>
      %399 = arith.mulf %393, %184 : vector<1x1xf32>
      %400 = arith.subf %398, %399 : vector<1x1xf32>
      %401 = vector.broadcast %22 : f32 to vector<1x1xf32>
      %402 = arith.mulf %400, %401 : vector<1x1xf32>
      %403 = arith.mulf %392, %184 : vector<1x1xf32>
      %404 = arith.mulf %393, %150 : vector<1x1xf32>
      %405 = arith.addf %403, %404 : vector<1x1xf32>
      %406 = vector.broadcast %22 : f32 to vector<1x1xf32>
      %407 = arith.mulf %405, %406 : vector<1x1xf32>
      %408 = arith.mulf %112, %402 : vector<1x1xf32>
      %409 = arith.addf %88, %408 : vector<1x1xf32>
      %410 = arith.mulf %112, %407 : vector<1x1xf32>
      %411 = arith.addf %91, %410 : vector<1x1xf32>
      %412 = arith.mulf %112, %394 : vector<1x1xf32>
      %413 = arith.addf %94, %412 : vector<1x1xf32>
      %c1_i32_151 = arith.constant 1 : i32
      %414 = arith.addi %85, %c1_i32_151 : i32
      %c2_i32_152 = arith.constant 2 : i32
      %415 = arith.muli %c2_i32_152, %414 : i32
      %416 = arith.index_cast %415 : i32 to index
      %417 = memref.load %arg1[%416] : memref<14xf32, #tpu.memory_space<smem>>
      %c1_i32_153 = arith.constant 1 : i32
      %418 = arith.addi %85, %c1_i32_153 : i32
      %c2_i32_154 = arith.constant 2 : i32
      %419 = arith.muli %c2_i32_154, %418 : i32
      %c1_i32_155 = arith.constant 1 : i32
      %420 = arith.addi %419, %c1_i32_155 : i32
      %421 = arith.index_cast %420 : i32 to index
      %422 = memref.load %arg1[%421] : memref<14xf32, #tpu.memory_space<smem>>
      %423 = vector.broadcast %417 : f32 to vector<1x1xf32>
      %424 = arith.subf %409, %423 : vector<1x1xf32>
      %425 = vector.broadcast %422 : f32 to vector<1x1xf32>
      %426 = arith.subf %411, %425 : vector<1x1xf32>
      %c1_i32_156 = arith.constant 1 : i32
      %427 = arith.addi %85, %c1_i32_156 : i32
      %428 = arith.sitofp %427 : i32 to f32
      %429 = arith.cmpf oge, %428, %26 : f32
      %cst_157 = arith.constant 1.000000e+00 : f32
      %cst_158 = arith.constant 0.000000e+00 : f32
      %430 = arith.select %429, %cst_157, %cst_158 : f32
      %431 = arith.mulf %424, %424 : vector<1x1xf32>
      %432 = arith.mulf %426, %426 : vector<1x1xf32>
      %433 = arith.addf %431, %432 : vector<1x1xf32>
      %434 = arith.mulf %25, %25 : f32
      %435 = vector.broadcast %434 : f32 to vector<1x1xf32>
      %436 = arith.cmpf ogt, %433, %435 : vector<1x1xf32>
      %cst_159 = arith.constant 1.000000e+00 : f32
      %cst_160 = arith.constant 0.000000e+00 : f32
      %437 = vector.broadcast %cst_159 : f32 to vector<1x1xf32>
      %438 = vector.broadcast %cst_160 : f32 to vector<1x1xf32>
      %439 = arith.select %436, %437, %438 : vector<1x1xi1>, vector<1x1xf32>
      %440 = vector.broadcast %27 : f32 to vector<1x1xf32>
      %441 = arith.mulf %439, %440 : vector<1x1xf32>
      %442 = vector.broadcast %430 : f32 to vector<1x1xf32>
      %443 = arith.mulf %441, %442 : vector<1x1xf32>
      %cst_161 = arith.constant 1.000000e+00 : f32
      %444 = vector.broadcast %cst_161 : f32 to vector<1x1xf32>
      %445 = arith.subf %444, %443 : vector<1x1xf32>
      %446 = arith.mulf %112, %445 : vector<1x1xf32>
      %447 = vector.broadcast %409 : vector<1x1xf32> to vector<1x128xf32>
      %448 = arith.addf %447, %4 : vector<1x128xf32>
      %c0_162 = arith.constant 0 : index
      %c0_163 = arith.constant 0 : index
      %449 = vector.load %arg15[%c0_162, %c0_163] : memref<8x128xf32, #tpu.memory_space<vmem>>, vector<1x128xf32>
      tpu.vector_store %arg15[%c0_162, %c0_163], %448 {strides = array<i32>} : memref<8x128xf32, #tpu.memory_space<vmem>>, vector<1x128xf32>,
      %450 = vector.broadcast %411 : vector<1x1xf32> to vector<1x128xf32>
      %451 = arith.addf %450, %4 : vector<1x128xf32>
      %c1_164 = arith.constant 1 : index
      %c0_165 = arith.constant 0 : index
      %452 = vector.load %arg15[%c1_164, %c0_165] : memref<8x128xf32, #tpu.memory_space<vmem>>, vector<1x128xf32>
      tpu.vector_store %arg15[%c1_164, %c0_165], %451 {strides = array<i32>} : memref<8x128xf32, #tpu.memory_space<vmem>>, vector<1x128xf32>,
      %453 = vector.broadcast %413 : vector<1x1xf32> to vector<1x128xf32>
      %454 = arith.addf %453, %4 : vector<1x128xf32>
      %c2_166 = arith.constant 2 : index
      %c0_167 = arith.constant 0 : index
      %455 = vector.load %arg15[%c2_166, %c0_167] : memref<8x128xf32, #tpu.memory_space<vmem>>, vector<1x128xf32>
      tpu.vector_store %arg15[%c2_166, %c0_167], %454 {strides = array<i32>} : memref<8x128xf32, #tpu.memory_space<vmem>>, vector<1x128xf32>,
      %456 = vector.broadcast %446 : vector<1x1xf32> to vector<1x128xf32>
      %457 = arith.addf %456, %4 : vector<1x128xf32>
      %c3_168 = arith.constant 3 : index
      %c0_169 = arith.constant 0 : index
      %458 = vector.load %arg15[%c3_168, %c0_169] : memref<8x128xf32, #tpu.memory_space<vmem>>, vector<1x128xf32>
      tpu.vector_store %arg15[%c3_168, %c0_169], %457 {strides = array<i32>} : memref<8x128xf32, #tpu.memory_space<vmem>>, vector<1x128xf32>,
      %459 = vector.broadcast %409 : vector<1x1xf32> to vector<1x128xf32>
      %460 = arith.mulf %459, %57 : vector<1x128xf32>
      %461 = vector.broadcast %411 : vector<1x1xf32> to vector<1x128xf32>
      %462 = arith.mulf %461, %62 : vector<1x128xf32>
      %463 = arith.addf %460, %462 : vector<1x128xf32>
      %464 = vector.broadcast %395 : vector<1x1xf32> to vector<1x128xf32>
      %465 = arith.mulf %464, %67 : vector<1x128xf32>
      %466 = arith.addf %463, %465 : vector<1x128xf32>
      %467 = vector.broadcast %396 : vector<1x1xf32> to vector<1x128xf32>
      %468 = arith.mulf %467, %72 : vector<1x128xf32>
      %469 = arith.addf %466, %468 : vector<1x128xf32>
      %470 = vector.broadcast %397 : vector<1x1xf32> to vector<1x128xf32>
      %471 = arith.mulf %470, %77 : vector<1x128xf32>
      %472 = arith.addf %469, %471 : vector<1x128xf32>
      %473 = vector.broadcast %112 : vector<1x1xf32> to vector<1x128xf32>
      %474 = arith.mulf %473, %82 : vector<1x128xf32>
      %475 = arith.addf %472, %474 : vector<1x128xf32>
      %476 = arith.index_cast %85 : i32 to index
      %c0_170 = arith.constant 0 : index
      %477 = vector.load %arg13[%476, %c0_170] : memref<8x128xf32, #tpu.memory_space<vmem>>, vector<1x128xf32>
      tpu.vector_store %arg13[%476, %c0_170], %475 {strides = array<i32>} : memref<8x128xf32, #tpu.memory_space<vmem>>, vector<1x128xf32>,
    }
    %c5_i32_41 = arith.constant 5 : i32
    return
  }
}

</mosaic_0001>

<bundles_post_ra>
// kernel: tpu_custom_call.1
= control target key start
LH: loop header
LB: loop body
LE: loop exit
PB: predicated region body
PF: predicated region fallthrough
CT: control target
= control target key end

     0   :  { %18 = vsyncpa [#allocation7], 0  ;;  %s4719_s0 = inlined_call_operand.vmem [shape: f32[16], index: 0, kind: input, shape index: {}]   ;;  %s4720_s1 = inlined_call_operand.vmem [shape: f32[14], index: 1, kind: input, shape index: {}]   ;;  %s4721_s2 = inlined_call_operand.vmem [shape: f32[2,256], index: 2, kind: input, shape index: {}]   ;;  %s4722_s3 = inlined_call_operand.vmem [shape: bf16[144,48], index: 3, kind: input, shape index: {}]   ;;  %s4723_s4 = inlined_call_operand.hbm [shape: bf16[768,128], index: 4, kind: input, shape index: {}]   ;;  %s4724_s5 = inlined_call_operand.vmem [shape: f32[1,128], index: 5, kind: input, shape index: {}]   ;;  %s4725_s6 = inlined_call_operand.hbm [shape: bf16[128,512], index: 6, kind: input, shape index: {}]   ;;  %s4726_s7 = inlined_call_operand.hbm [shape: bf16[128,512], index: 7, kind: input, shape index: {}]   ;;  %s4727_s8 = inlined_call_operand.vmem [shape: f32[1,512], index: 8, kind: input, shape index: {}]   ;;  %s4728_s9 = inlined_call_operand.hbm [shape: bf16[128,512], index: 9, kind: input, shape index: {}]   ;;  %s4729_s10 = inlined_call_operand.vmem [shape: f32[1,512], index: 10, kind: input, shape index: {}]   ;;  %s4730_s11 = inlined_call_operand.hbm [shape: bf16[512,128], index: 11, kind: input, shape index: {}]   ;;  %s4731_s12 = inlined_call_operand.vmem [shape: f32[1,128], index: 12, kind: input, shape index: {}]   ;;  %s4732_s13 = inlined_call_operand.hbm [shape: f32[8,128], index: 13, kind: output, shape index: {}]  }
   0x1   :  { %19 = vsyncpa [#allocation9], 0 }
   0x2   :  { %20 = vsyncpa [#allocation5], 0 }
   0x3   :  { %21 = vsyncpa [#allocation12], 0 }
   0x4   :  { %22 = vsyncpa [#allocation15], 0 }
   0x5   :  { %23 = vsyncpa [#allocation6], 0  ;;  %s3961_s25 = smov [#allocation11]   ;;  %s3785_s29 = scalar_lea.hbm %s4725_s6, 4096 }
   0x6   :  { %s67_s26 = sshll.u32 %s3961_s25, 4  ;;  %p3786_p0 = scmp.ne.s32.totalorder %s4725_s6, %s3785_s29  ;;  %s68_s26 = int_to_ptr.vmem [resolvable:$true] %s67_s26 }
   0x7   :  { %p3789_p1 = scmp.lt.u32.totalorder %s3785_s29, %s4725_s6 }
   0x9   :  { %p3791_p2 = pnand %p3789_p1, %p3786_p0 }
   0xb   :  { %3794 = shalt.err (!%p3791_p2)
}
   0xc   :  { %s3795_s17 = scalar_lea.vmem %s68_s26, 4096  ;;  %p3800_p4 = scmp.lt.s32.totalorder %s68_s26, %s68_s26 }
   0xd   :  { %p3796_p3 = scmp.ne.s32.totalorder %s68_s26, %s3795_s17  ;;  %p3801_p5 = scmp.lt.s32.totalorder %s3795_s17, %s3795_s17 }
   0xf   :  { %p3802_p6 = por %p3801_p5, %p3800_p4 }
  0x11   :  { %p3803_p7 = pnand %p3802_p6, %p3796_p3 }
  0x13   :  { %3806 = shalt.err (!%p3803_p7)
}
  0x14   :  { %s3962_s18 = smov 256   ;;  %s3963_s19 = smov 16  }
  0x15   :  { %73 = dma.hbm_to_vmem [thread:$0]  %s4725_s6, 4096, %s68_s26, [#allocation12], %s3962_s18, %s3962_s18, %s3963_s19  }
  0x16   :  { %s3964_s22 = smov [#allocation14]   ;;  %s30_s27 = sshll.u32 %s4719_s0, 4  ;;  %s31_s27 = int_to_ptr.vmem [resolvable:$true] %s30_s27 }
  0x17   :  { %s93_s23 = sshll.u32 %s3964_s22, 4  ;;  %s3807_s30 = scalar_lea.hbm %s4728_s9, 4096  ;;  %s94_s23 = int_to_ptr.vmem [resolvable:$true] %s93_s23 }
  0x18   :  { %p3808_p8 = scmp.ne.s32.totalorder %s4728_s9, %s3807_s30  ;;  %p3811_p9 = scmp.lt.u32.totalorder %s3807_s30, %s4728_s9 }
  0x1a   :  { %p3813_p10 = pnand %p3811_p9, %p3808_p8 }
  0x1c   :  { %3816 = shalt.err (!%p3813_p10)
}
  0x1d   :  { %s3817_s6 = scalar_lea.vmem %s94_s23, 4096  ;;  %p3822_p12 = scmp.lt.s32.totalorder %s94_s23, %s94_s23 }
  0x1e   :  { %p3818_p11 = scmp.ne.s32.totalorder %s94_s23, %s3817_s6  ;;  %p3823_p13 = scmp.lt.s32.totalorder %s3817_s6, %s3817_s6 }
  0x20   :  { %p3824_p0 = por %p3823_p13, %p3822_p12 }
  0x22   :  { %p3825_p1 = pnand %p3824_p0, %p3818_p11 }
  0x24   :  { %3828 = shalt.err (!%p3825_p1)
}
  0x25   :  { %99 = dma.hbm_to_vmem [thread:$0]  %s4728_s9, 4096, %s94_s23, [#allocation15], %s3962_s18, %s3962_s18, %s3963_s19  }
  0x26   :  { %s40_s22 = sshll.u32 %s4720_s1, 4  ;;  %s3829_s24 = scalar_lea.vmem %s31_s27, 16  ;;  %s41_s22 = int_to_ptr.vmem [resolvable:$true] %s40_s22 }
  0x27   :  { %p3830_p2 = scmp.ne.s32.totalorder %s31_s27, %s3829_s24  ;;  %p3834_p3 = scmp.lt.s32.totalorder %s31_s27, %s31_s27 }
  0x28   :  { %p3835_p4 = scmp.lt.s32.totalorder %s3829_s24, %s3829_s24 }
  0x2a   :  { %p3836_p5 = por %p3835_p4, %p3834_p3 }
  0x2c   :  { %p3837_p6 = pnand %p3836_p5, %p3830_p2 }
  0x2e   :  { %3840 = shalt.err (!%p3837_p6)
}
  0x2f   :  { %s3965_s25 = smov [#allocation4]   ;;  %s3841_s28 = scalar_lea.vmem %s41_s22, 16 }
  0x30   :  { %33 = dma.vmem_to_smem %s31_s27, 16, %s3965_s25, [#allocation7]  }
  0x31   :  { %p3842_p7 = scmp.ne.s32.totalorder %s41_s22, %s3841_s28  ;;  %p3846_p8 = scmp.lt.s32.totalorder %s41_s22, %s41_s22 }
  0x32   :  { %p3847_p9 = scmp.lt.s32.totalorder %s3841_s28, %s3841_s28 }
  0x34   :  { %p3848_p10 = por %p3847_p9, %p3846_p8 }
  0x36   :  { %p3849_p11 = pnand %p3848_p10, %p3842_p7 }
  0x38   :  { %3852 = shalt.err (!%p3849_p11)
}
  0x39   :  { %s3966_s9 = smov [#allocation8]   ;;  %s3967_s1 = smov [#allocation10]  }
  0x3a   :  { %43 = dma.vmem_to_smem %s41_s22, 16, %s3966_s9, [#allocation9]  }
  0x3b   :  { %s53_s23 = sshll.u32 %s3967_s1, 4  ;;  %s3853_s14 = scalar_lea.hbm %s4723_s4, 6144  ;;  %s54_s23 = int_to_ptr.vmem [resolvable:$true] %s53_s23 }
  0x3c   :  { %p3854_p12 = scmp.ne.s32.totalorder %s4723_s4, %s3853_s14  ;;  %p3857_p13 = scmp.lt.u32.totalorder %s3853_s14, %s4723_s4 }
  0x3e   :  { %p3859_p0 = pnand %p3857_p13, %p3854_p12 }
  0x40   :  { %3862 = shalt.err (!%p3859_p0)
}
  0x41   :  { %s3863_s6 = scalar_lea.vmem %s54_s23, 6144  ;;  %p3868_p2 = scmp.lt.s32.totalorder %s54_s23, %s54_s23 }
  0x42   :  { %p3864_p1 = scmp.ne.s32.totalorder %s54_s23, %s3863_s6  ;;  %p3869_p3 = scmp.lt.s32.totalorder %s3863_s6, %s3863_s6 }
  0x44   :  { %p3870_p4 = por %p3869_p3, %p3868_p2 }
  0x46   :  { %p3871_p5 = pnand %p3870_p4, %p3864_p1 }
  0x48   :  { %3874 = shalt.err (!%p3871_p5)
}
  0x49   :  { %s3968_s0 = smov 64   ;;  %s3969_s26 = smov 4  }
  0x4a   :  { %59 = dma.hbm_to_vmem [thread:$0]  %s4723_s4, 6144, %s54_s23, [#allocation5], %s3968_s0, %s3968_s0, %s3969_s26  }
  0x4b   :  { %s3970_s22 = smov [#allocation13]   ;;  %s3971_s25 = smov [#allocation16]  }
  0x4c   :  { %s79_s24 = sshll.u32 %s3970_s22, 4  ;;  %s107_s28 = sshll.u32 %s3971_s25, 4  ;;  %s80_s24 = int_to_ptr.vmem [resolvable:$true] %s79_s24  ;;  %s108_s28 = int_to_ptr.vmem [resolvable:$true] %s107_s28 }
  0x4d   :  { %s3875_s29 = scalar_lea.hbm %s4726_s7, 4096 }
  0x4e   :  { %p3876_p6 = scmp.ne.s32.totalorder %s4726_s7, %s3875_s29  ;;  %p3879_p7 = scmp.lt.u32.totalorder %s3875_s29, %s4726_s7 }
  0x50   :  { %p3881_p8 = pnand %p3879_p7, %p3876_p6 }
  0x52   :  { %3884 = shalt.err (!%p3881_p8)
}
  0x53   :  { %s3885_s4 = scalar_lea.vmem %s80_s24, 4096  ;;  %p3890_p10 = scmp.lt.s32.totalorder %s80_s24, %s80_s24 }
  0x54   :  { %p3886_p9 = scmp.ne.s32.totalorder %s80_s24, %s3885_s4  ;;  %p3891_p11 = scmp.lt.s32.totalorder %s3885_s4, %s3885_s4 }
  0x56   :  { %p3892_p12 = por %p3891_p11, %p3890_p10 }
  0x58   :  { %p3893_p13 = pnand %p3892_p12, %p3886_p9 }
  0x5a   :  { %3896 = shalt.err (!%p3893_p13)
}
  0x5b   :  { %85 = dma.hbm_to_vmem [thread:$0]  %s4726_s7, 4096, %s80_s24, [#allocation12], %s3962_s18, %s3962_s18, %s3963_s19  }
  0x5c   :  { %s3897_s20 = scalar_lea.hbm %s4730_s11, 4096 }
  0x5d   :  { %p3898_p0 = scmp.ne.s32.totalorder %s4730_s11, %s3897_s20  ;;  %p3901_p1 = scmp.lt.u32.totalorder %s3897_s20, %s4730_s11 }
  0x5f   :  { %p3903_p2 = pnand %p3901_p1, %p3898_p0 }
  0x61   :  { %3906 = shalt.err (!%p3903_p2)
}
  0x62   :  { %s3907_s1 = scalar_lea.vmem %s108_s28, 4096  ;;  %p3912_p4 = scmp.lt.s32.totalorder %s108_s28, %s108_s28 }
  0x63   :  { %p3908_p3 = scmp.ne.s32.totalorder %s108_s28, %s3907_s1  ;;  %p3913_p5 = scmp.lt.s32.totalorder %s3907_s1, %s3907_s1 }
  0x65   :  { %p3914_p6 = por %p3913_p5, %p3912_p4 }
  0x67   :  { %p3915_p7 = pnand %p3914_p6, %p3908_p3 }
  0x69   :  { %3918 = shalt.err (!%p3915_p7)
}
  0x6a   :  { %113 = dma.hbm_to_vmem [thread:$0]  %s4730_s11, 4096, %s108_s28, [#allocation15], %s3968_s0, %s3968_s0, %s3969_s26  }
  0x6b   :  { %3945 = dma.done.wait [#allocation7], 16  }
  0x6c   :  { %3946 = vsyncadd [#allocation7], 4294967280 }
  0x6d   :  { %3947 = dma.done.wait [#allocation9], 16  }
  0x6e   :  { %3948 = vsyncadd [#allocation9], 4294967280 }
  0x6f   :  { %3949 = dma.done.wait [#allocation5], 6144  }
  0x70   :  { %3950 = vsyncadd [#allocation5], 4294961152 }
  0x71   :  { %3951 = dma.done.wait [#allocation12], 8192  }
  0x72   :  { %3952 = vsyncadd [#allocation12], 4294959104 }
  0x73   :  { %3953 = dma.done.wait [#allocation15], 8192  }
  0x74   :  { %3954 = vsyncadd [#allocation15], 4294959104 }
  0x75   :  { %137 = sfence }
  0x76   :  { %v4733_v0 = vlaneseq  ;;  %s4130_s19 = sld [smem:[#allocation4]]  ;;  %s4132_s24 = sld [smem:[#allocation4 + $0x1]]  ;;  %v3972_v1 = vmov 0.0   ;;  %v3973_v2 = vmov 0.9921875   ;;  %v3974_v5 = vmov 1.0  }
  0x77   :  { %143 = vst [vmem:[#allocation3] sm:$0xff] %v3972_v1  ;;  %139 = vst [vmem:[#allocation17] sm:$0xff] %v3972_v1  ;;  %s4134_s11 = sld [smem:[#allocation4 + $0x2]]  ;;  %s4136_s0 = sld [smem:[#allocation4 + $0x3]] }
  0x78   :  { %140 = vst [vmem:[#allocation2] sm:$0xff] %v3973_v2  ;;  %141 = vst [vmem:[#allocation2 + $0x8] sm:$0xff] %v3973_v2  ;;  %v4139_v3 = vshrl.u32 %v4733_v0, 7  ;;  %v183_v4 = vand.u32 127, %v4733_v0  ;;  %s4142_s26 = sld [smem:[#allocation4 + $0x4]]  ;;  %s4144_s28 = sld [smem:[#allocation4 + $0x5]] }
  0x79   :  { %142 = vst [vmem:[#allocation2 + $0x10] sm:$0xff] %v3973_v2  ;;  %156 = vst [vmem:[#allocation3 + $0x3] sm:$0x1] %v3974_v5  ;;  %s4146_s29 = sld [smem:[#allocation4 + $0x6]]  ;;  %s4148_s30 = sld [smem:[#allocation4 + $0x7]] }
  0x7a   :  { %v171_v6 = vadd.s32 8, %v4139_v3  ;;  %v172_v7 = vadd.s32 16, %v4139_v3  ;;  %v173_v8 = vadd.s32 24, %v4139_v3  ;;  %v174_v9 = vadd.s32 32, %v4139_v3  ;;  %s4154_s14 = sld [smem:[#allocation4 + $0x8]]  ;;  %s3133_s27 = sld [smem:[#allocation4 + $0x9]] }
  0x7b   :  { %v175_v10 = vadd.s32 40, %v4139_v3  ;;  %v4158_v11 = vcvt.s32.f32 %v4139_v3  ;;  %vm184_vm0 = vcmp.ge.s32.totalorder %v183_v4, 3  ;;  %vm185_vm1 = vcmp.lt.s32.totalorder %v183_v4, 6  ;;  %v4163_v12 = vld [vmem:[%s4721_s2] ss:$2 sm:$0x3] }
  0x7c   :  { %4746 = vst [vmem:[#allocation25_spill] sm:$0xff] %v4163_v12  ;;  %v4165_v13 = vcvt.s32.f32 %v171_v6  ;;  %v4167_v14 = vcvt.s32.f32 %v172_v7  ;;  %v4169_v15 = vcvt.s32.f32 %v173_v8  ;;  %v4171_v16 = vcvt.s32.f32 %v174_v9  ;;  %vm4173_vm2 = vmand %vm184_vm0, %vm185_vm1  ;;  %v4180_v18 = vld [vmem:[%s4721_s2 + $0x1] ss:$2 sm:$0x3]  ;;  %s3134_s17 = sld [smem:[#allocation4 + $0xa]]  ;;  %s3135_s6 = sld [smem:[#allocation4 + $0xb]] }
  0x7d   :  { %4745 = vst [vmem:[#allocation24_spill] sm:$0xff] %v4158_v11  ;;  %4753 = vst [vmem:[#allocation30_spill] sm:$0xff] %v4180_v18  ;;  %v4182_v19 = vcvt.s32.f32 %v175_v10  ;;  %vm187_vm3 = vcmp.eq.s32.totalorder %v4139_v3, %v183_v4  ;;  %vm188_vm4 = vcmp.lt.s32.totalorder %v4139_v3, 6  ;;  %vm191_vm5 = vcmp.eq.s32.totalorder %v183_v4, 0  ;;  %s4200_s2 = smov 0  }
  0x7e   :  { %4747 = vst [vmem:[#allocation26_spill] sm:$0xff] %v4165_v13  ;;  %4748 = vst [vmem:[#allocation27_spill] sm:$0xff] %v4167_v14  ;;  %v4186_v20 = vsel %vm191_vm5, 1.0, %v3972_v1  ;;  %vm193_vm7 = vcmp.eq.s32.totalorder %v183_v4, 1  ;;  %vm195_vm8 = vcmp.eq.s32.totalorder %v183_v4, 2  ;;  %vm197_vm9 = vcmp.eq.s32.totalorder %v183_v4, 3 }
  0x7f   :  { %4749 = vst [vmem:[#allocation28_spill] sm:$0xff] %v4169_v15  ;;  %4750 = vst [vmem:[#allocation29_spill] sm:$0xff] %v4171_v16  ;;  %v4190_v22 = vsel %vm193_vm7, 1.0, %v3972_v1  ;;  %v4192_v23 = vsel %vm195_vm8, 1.0, %v3972_v1  ;;  %v4194_v24 = vsel %vm197_vm9, 1.0, %v3972_v1  ;;  %vm199_vm10 = vcmp.eq.s32.totalorder %v183_v4, 4 }
  0x80   :  { %4754 = vst [vmem:[#allocation31_spill] sm:$0xff] %v4182_v19  ;;  %vm189_vm6 = vmand %vm187_vm3, %vm188_vm4  ;;  %vm201_vm11 = vcmp.eq.s32.totalorder %v183_v4, 5  ;;  %v4196_v25 = vsel %vm199_vm10, 1.0, %v3972_v1  ;;  %v145_v27 = vstv %s3133_s27 }
  0x81   :  { %4755 = vst [vmem:[#allocation32_spill] sm:$0xff] %v4186_v20  ;;  %v4188_v21 = vsel %vm189_vm6, 1.0, %v3972_v1  ;;  %4756 = vst [vmem:[#allocation33_spill] sm:$0xff] %v4190_v22  ;;  %v4198_v26 = vsel %vm201_vm11, 1.0, %v3972_v1 }
  0x82   :  { %4757 = vst [vmem:[#allocation34_spill] sm:$0xff] %v4194_v24  ;;  %4758 = vst [vmem:[#allocation35_spill] sm:$0xff] %v4196_v25  ;;  %v149_v28 = vstv %s3134_s17  ;;  %v153_v29 = vstv %s3135_s6 }
  0x83   :  { %4759 = vst [vmem:[#allocation36_spill] sm:$0xff] %v4198_v26  ;;  %147 = vst [vmem:[#allocation3] sm:$0x1] %v145_v27 }
  0x84   :  { %151 = vst [vmem:[#allocation3 + $0x1] sm:$0x1] %v149_v28  ;;  %155 = vst [vmem:[#allocation3 + $0x2] sm:$0x1] %v153_v29 }
  0x85 LB: > { %v4761_v18 = vld [vmem:[#allocation30_spill] sm:$0xff]  ;;  %v4764_v14 = vld [vmem:[#allocation27_spill] sm:$0xff]  ;;  %v4766_v12 = vld [vmem:[#allocation25_spill] sm:$0xff]  ;;  %vm210_vm12 = vcmask 1040384   ;;  %v4734_v38 = vmov 0   ;;  %vm556_vm15 = vcmask 392192   ;;  %v4768_v0 = vlaneseq  ;;  %s3048_s9 = smul.f32 %s4136_s0, %s4136_s0  ;;  %s3959_s2 = sphi %s4200_s2, %s4783_s2  }
  0x86   : > { %v4762_v16 = vld [vmem:[#allocation29_spill] sm:$0xff]  ;;  %v4763_v15 = vld [vmem:[#allocation28_spill] sm:$0xff]  ;;  %v4765_v13 = vld [vmem:[#allocation26_spill] sm:$0xff]  ;;  %616 = vmatprep.mubr.bf16.mxu0 %v4734_v38  ;;  %3493 = vset.pattern.permute.xlu0 %v4734_v38  ;;  %vm905_vm1 = vcmask 1043456   ;;  %v1527_v25 = vsub.s32 2, %v4139_v3  ;;  %s3354_s23 = sshll.u32 %s3959_s2, 1 }
  0x87   : > { %v4760_v19 = vld [vmem:[#allocation31_spill] sm:$0xff]  ;;  %v4767_v11 = vld [vmem:[#allocation24_spill] sm:$0xff]  ;;  %v222_v35 = vld [vmem:[#allocation3 + $0x3] sm:$0x1]  ;;  %3492 = vset.pattern.permute.xlu1 %v4734_v38  ;;  %vm4388_vm0 = vcmp.lt.s32.totalorder %v4768_v0, 256  ;;  %s3355_s27 = sadd.s32 2, %s3354_s23 }
  0x88   : > { %v223_v37 = vsel %vm210_vm12, %v222_v35, -inf  ;;  %v4212_v35 = vsub.s32 0, %v4139_v3  ;;  %s3036_s17 = sadd.s32 1, %s3355_s27  ;;  %s3035_s20 = sld [smem:[#allocation8 + %s3355_s27]] }
  0x89   : > { %s3037_s6 = sld [smem:[#allocation8 + %s3036_s17]]  ;;  %s4680_s21 = sadd.s32 1, %s3959_s2  }
  0x8a   : > { %v209_v34 = vld [vmem:[#allocation3] sm:$0x1]  ;;  %s3042_s22 = scvt.s32.f32 %s4680_s21  ;;  %s3106_s7 = scalar_lea.vmem [#allocation17], %s3959_s2 }
  0x8b   : > { %v218_v30 = vld [vmem:[#allocation3 + $0x2] sm:$0x1]  ;;  %v214_v31 = vld [vmem:[#allocation3 + $0x1] sm:$0x1]  ;;  %v211_v36 = vsel %vm210_vm12, %v209_v34, -inf  ;;  %p205_p9 = scmp.ge.s32.totalorder %s4680_s21, 5   ;;  %s4783_s2 = smov %s4680_s21 }
  0x8c   : > { %v219_v32 = vsel %vm210_vm12, %v218_v30, -inf  ;;  %v215_v33 = vsel %vm210_vm12, %v214_v31, -inf  ;;  %212 = vmax.xlane.f32.xlu1 %v211_v36  ;;  %p4686_p8 = scmp.ge.f32.partialorder %s3042_s22, %s4142_s26  ;;  %s3978_s18 = smov (%p205_p9), [#allocation17]  }
  0x8d   : > { %220 = vmax.xlane.f32.xlu0 %v219_v32  ;;  %s3114_s15 = sshll.u32 (%p205_p9), %s3978_s18, 4  ;;  %s3115_s15 = int_to_ptr.vmem [resolvable:$true] %s3114_s15 }
  0x8e   : > { %s3044_s1 = scalar_select %p4686_p8, 1.0, 0.0 }
  0x8f   :  { %s3919_s16 = scalar_lea.vmem (%p205_p9), %s3115_s15, 128  ;;  %p3924_p11 = scmp.lt.s32.totalorder (%p205_p9), %s3115_s15, %s3115_s15 }
  0x90   :  { %p3920_p10 = scmp.ne.s32.totalorder (%p205_p9), %s3115_s15, %s3919_s16  ;;  %p3925_p12 = scmp.lt.s32.totalorder (%p205_p9), %s3919_s16, %s3919_s16 }
  0x91   : > { %216 = vmax.xlane.f32.xlu0 %v215_v33 }
  0x92   :  { %p3926_p13 = por (%p205_p9), %p3925_p12, %p3924_p11 }
  0x94   :  { %p3927_p0 = pnand (%p205_p9), %p3926_p13, %p3920_p10 }
  0x95   : > { %224 = vmax.xlane.f32.xlu0 %v223_v37 }
 0x11a   : > { %v4208_v39 = vpop.xlane.xlu0 %220 }
 0x11b   : > { %v236_v40 = vmul.f32 0.017453292, %v4208_v39 }
 0x11d   : > { %v237_v41 = vadd.f32 1.5707964, %v236_v40  ;;  %v260_v42 = vmul.f32 0.31830987, %v236_v40 }
 0x11f   : > { %v238_v43 = vmul.f32 0.31830987, %v237_v41  ;;  %v261_v44 = vadd.f32 0.5, %v260_v42 }
 0x121   : > { %v239_v45 = vadd.f32 0.5, %v238_v43  ;;  %v262_v46 = vfloor.f32 %v261_v44  ;;  %v4222_v43 = vsub.s32 1, %v4139_v3 }
 0x123   : > { %v240_v47 = vfloor.f32 %v239_v45  ;;  %v263_v48 = vmul.f32 3.1415927, %v262_v46  ;;  %v275_v57 = vmul.f32 0.5, %v262_v46 }
 0x125   : > { %v241_v49 = vmul.f32 3.1415927, %v240_v47  ;;  %v264_v50 = vsub.f32 %v236_v40, %v263_v48  ;;  %v253_v60 = vmul.f32 0.5, %v240_v47  ;;  %v276_v63 = vfloor.f32 %v275_v57  ;;  %v4228_v48 = vpop.xlane.xlu0 %216 }
 0x127   : > { %v242_v51 = vsub.f32 %v237_v41, %v241_v49  ;;  %v265_v52 = vmul.f32 %v264_v50, %v264_v50  ;;  %v254_v4 = vfloor.f32 %v253_v60  ;;  %v277_v7 = vmul.f32 2.0, %v276_v63 }
 0x129   : > { %v243_v53 = vmul.f32 %v242_v51, %v242_v51  ;;  %v266_v54 = vmul.f32 2.7557319e-06, %v265_v52  ;;  %v255_v10 = vmul.f32 2.0, %v254_v4  ;;  %v278_v29 = vsub.f32 %v262_v46, %v277_v7 }
 0x12b   : > { %v244_v55 = vmul.f32 2.7557319e-06, %v243_v53  ;;  %v267_v56 = vadd.f32 -0.0001984127, %v266_v54  ;;  %v256_v32 = vsub.f32 %v240_v47, %v255_v10  ;;  %vm279_vm13 = vcmp.gt.f32.partialorder %v278_v29, 0.5 }
 0x12d   : > { %v245_v58 = vadd.f32 -0.0001984127, %v244_v55  ;;  %v268_v59 = vmul.f32 %v267_v56, %v265_v52  ;;  %vm257_vm14 = vcmp.gt.f32.partialorder %v256_v32, 0.5 }
 0x12f   : > { %v246_v61 = vmul.f32 %v245_v58, %v243_v53  ;;  %v269_v62 = vadd.f32 0.008333334, %v268_v59 }
 0x131   : > { %v247_v1 = vadd.f32 0.008333334, %v246_v61  ;;  %v270_v2 = vmul.f32 %v269_v62, %v265_v52 }
 0x133   : > { %v248_v5 = vmul.f32 %v247_v1, %v243_v53  ;;  %v271_v6 = vadd.f32 -0.16666667, %v270_v2 }
 0x135   : > { %v249_v8 = vadd.f32 -0.16666667, %v248_v5  ;;  %v272_v9 = vmul.f32 %v271_v6, %v265_v52  ;;  %v4233_v52 = vpop.xlane.xlu1 %212 }
 0x136   : > { %vm228_vm4 = vcmp.ge.f32.partialorder %v4233_v52, 0.0 }
 0x137   : > { %v250_v27 = vmul.f32 %v249_v8, %v243_v53  ;;  %v273_v28 = vadd.f32 1.0, %v272_v9 }
 0x139   : > { %v251_v30 = vadd.f32 1.0, %v250_v27  ;;  %v274_v31 = vmul.f32 %v273_v28, %v264_v50 }
 0x13b   : > { %v252_v33 = vmul.f32 %v251_v30, %v242_v51  ;;  %v280_v34 = vsub.f32 0.0, %v274_v31 }
 0x13d   : > { %v258_v36 = vsub.f32 0.0, %v252_v33  ;;  %v4214_v37 = vsel %vm279_vm13, %v280_v34, %v274_v31 }
 0x13e   : > { %v282_v40 = vsub.f32 0.0, %v4214_v37 }
 0x13f   : > { %v4217_v41 = vsel %vm257_vm14, %v258_v36, %v252_v33 }
 0x140   : > { %v287_v42 = vrot.slane %v4217_v41, %v4212_v35  ;;  %v307_v44 = vrot.slane %v282_v40, %v4212_v35 }
 0x142   : > { %v323_v45 = vmul.f32 %v307_v44, %v4766_v12  ;;  %v337_v46 = vmul.f32 %v4761_v18, %v287_v42  ;;  %v289_v47 = vmul.f32 %v287_v42, %v4766_v12  ;;  %v309_v49 = vmul.f32 %v4761_v18, %v307_v44 }
 0x144   : > { %v328_v50 = vrot.slane %v323_v45, %v4212_v35  ;;  %v332_v51 = vrot.slane %v323_v45, %v4222_v43  ;;  %v294_v53 = vrot.slane %v289_v47, %v4212_v35  ;;  %v298_v54 = vrot.slane %v289_v47, %v4222_v43 }
 0x145   : > { %v342_v55 = vrot.slane %v337_v46, %v4212_v35  ;;  %v346_v56 = vrot.slane %v337_v46, %v4222_v43  ;;  %v314_v59 = vrot.slane %v309_v49, %v4212_v35  ;;  %v318_v60 = vrot.slane %v309_v49, %v4222_v43 }
 0x146   : > { %v335_v57 = vadd.f32 %v328_v50, %v4228_v48  ;;  %v336_v58 = vadd.f32 %v332_v51, %v4228_v48  ;;  %v301_v61 = vadd.f32 %v294_v53, %v4233_v52  ;;  %v302_v62 = vadd.f32 %v298_v54, %v4233_v52 }
 0x148   : > { %v349_v63 = vadd.f32 %v342_v55, %v335_v57  ;;  %v350_v1 = vadd.f32 %v346_v56, %v336_v58  ;;  %v4245_v2 = vsub.f32 %v301_v61, %v314_v59  ;;  %v4247_v4 = vsub.f32 %v302_v62, %v318_v60 }
 0x14a   : > { %v354_v5 = vrot.slane %v349_v63, %v4212_v35  ;;  %v358_v6 = vrot.slane %v350_v1, %v4212_v35 }
 0x14c   : > { %v360_v7 = vsub.f32 %v4767_v11, %v358_v6  ;;  %v362_v8 = vsub.f32 %v4765_v13, %v358_v6  ;;  %v359_v9 = vsub.f32 %v4767_v11, %v354_v5  ;;  %v361_v10 = vsub.f32 %v4765_v13, %v354_v5 }
 0x14d   : > { %v364_v27 = vsub.f32 %v4764_v14, %v358_v6  ;;  %v366_v28 = vsub.f32 %v4763_v15, %v358_v6  ;;  %v363_v29 = vsub.f32 %v4764_v14, %v354_v5  ;;  %v365_v30 = vsub.f32 %v4763_v15, %v354_v5 }
 0x14e   : > { %v372_v31 = vand.u32 2147483647, %v360_v7  ;;  %v374_v32 = vand.u32 2147483647, %v362_v8  ;;  %v371_v33 = vand.u32 2147483647, %v359_v9  ;;  %v368_v34 = vsub.f32 %v4762_v16, %v358_v6 }
 0x14f   : > { %v373_v36 = vand.u32 2147483647, %v361_v10  ;;  %v376_v40 = vand.u32 2147483647, %v364_v27  ;;  %v378_v42 = vand.u32 2147483647, %v366_v28  ;;  %v370_v44 = vsub.f32 %v4760_v19, %v358_v6 }
 0x150   : > { %v384_v45 = vsub.f32 1.0, %v372_v31  ;;  %v386_v46 = vsub.f32 1.0, %v374_v32  ;;  %v383_v47 = vsub.f32 1.0, %v371_v33  ;;  %v375_v49 = vand.u32 2147483647, %v363_v29 }
 0x151   : > { %v385_v50 = vsub.f32 1.0, %v373_v36  ;;  %v388_v51 = vsub.f32 1.0, %v376_v40  ;;  %v390_v53 = vsub.f32 1.0, %v378_v42  ;;  %v377_v54 = vand.u32 2147483647, %v365_v30 }
 0x152   : > { %v396_v55 = vmax.f32 %v384_v45, 0.0  ;;  %v398_v56 = vmax.f32 %v386_v46, 0.0  ;;  %v395_v57 = vmax.f32 %v383_v47, 0.0  ;;  %v387_v58 = vsub.f32 1.0, %v375_v49 }
 0x153   : > { %v397_v59 = vmax.f32 %v385_v50, 0.0  ;;  %v400_v60 = vmax.f32 %v388_v51, 0.0  ;;  %v402_v61 = vmax.f32 %v390_v53, 0.0  ;;  %v389_v62 = vsub.f32 1.0, %v377_v54 }
 0x154   : > { %v408_v63 = vmin.f32 %v396_v55, 1.0  ;;  %v410_v1 = vmin.f32 %v398_v56, 1.0  ;;  %v407_v7 = vmin.f32 %v395_v57, 1.0  ;;  %v399_v6 = vmax.f32 %v387_v58, 0.0 }
 0x155   : > { %v409_v8 = vmin.f32 %v397_v59, 1.0  ;;  %v412_v9 = vmin.f32 %v400_v60, 1.0  ;;  %v414_v10 = vmin.f32 %v402_v61, 1.0  ;;  %v401_v27 = vmax.f32 %v389_v62, 0.0  ;;  %v3495_v62 = vld [vmem:[%s4722_s3 + $0x8] sm:$0xff]  }
 0x156   : > { %v506_v28 = vpack.c.bf16 %v410_v1, %v408_v63  ;;  %v380_v29 = vand.u32 2147483647, %v368_v34  ;;  %v382_v31 = vand.u32 2147483647, %v370_v44  ;;  %v411_v32 = vmin.f32 %v399_v6, 1.0  ;;  %v3496_v63 = vld [vmem:[%s4722_s3 + $0x10] sm:$0xff]  }
 0x157   : > { %v505_v30 = vpack.c.bf16 %v409_v8, %v407_v7  ;;  %v413_v33 = vmin.f32 %v401_v27, 1.0  ;;  %v367_v36 = vsub.f32 %v4762_v16, %v354_v5  ;;  %v508_v40 = vpack.c.bf16 %v414_v10, %v412_v9  ;;  %v3497_v1 = vld [vmem:[%s4722_s3 + $0x18] sm:$0xff]   ;;  %v3498_v7 = vld [vmem:[%s4722_s3 + $0x20] sm:$0xff]   ;;  %v3499_v6 = vld [vmem:[%s4722_s3 + $0x28] sm:$0xff]  }
 0x158   : > { %584 = vmatprep.subr.bf16.mxu0 %v506_v28  ;;  %v392_v42 = vsub.f32 1.0, %v380_v29  ;;  %v394_v45 = vsub.f32 1.0, %v382_v31  ;;  %v369_v46 = vsub.f32 %v4760_v19, %v354_v5  ;;  %v3494_v5 = vld [vmem:[%s4722_s3] sm:$0xff]   ;;  %v3500_v8 = vld [vmem:[%s4722_s3 + $0x30] sm:$0xff]   ;;  %v3501_v9 = vld [vmem:[%s4722_s3 + $0x38] sm:$0xff]  }
 0x159   : > { %585 = vmatpush1.bf16.msra.mxu0 %v505_v30  ;;  %v379_v47 = vand.u32 2147483647, %v367_v36  ;;  %v507_v53 = vpack.c.bf16 %v413_v33, %v411_v32  ;;  %v3502_v10 = vld [vmem:[%s4722_s3 + $0x40] sm:$0xff]   ;;  %v708_v29 = vld [vmem:[#allocation2 + $0x8] sm:$0xee] }
 0x15a   : > { %586 = vmatprep.subr.bf16.mxu0 %v508_v40  ;;  %v404_v49 = vmax.f32 %v392_v42, 0.0  ;;  %v406_v50 = vmax.f32 %v394_v45, 0.0  ;;  %v381_v51 = vand.u32 2147483647, %v369_v46  ;;  %v707_v27 = vld [vmem:[#allocation2] sm:$0xee] }
 0x15b   : > { %v391_v34 = vsub.f32 1.0, %v379_v47  ;;  %v3163_v28 = vrot.slane %v707_v27, 9  ;;  %v3164_v31 = vrot.slane %v708_v29, 9  ;;  %v709_v30 = vld [vmem:[#allocation2 + $0x10] sm:$0xee]  ;;  %v3503_v33 = vld [vmem:[#allocation10 + $0x140] sm:$0xff]  }
 0x15c   : > { %v416_v44 = vmin.f32 %v404_v49, 1.0  ;;  %v418_v54 = vmin.f32 %v406_v50, 1.0  ;;  %v393_v55 = vsub.f32 1.0, %v381_v51  ;;  %v3165_v32 = vrot.slane %v709_v30, 9  ;;  %v3504_v36 = vld [vmem:[#allocation10 + $0x100] sm:$0xff]   ;;  %v3507_v45 = vld [vmem:[#allocation10 + $0x148] sm:$0xff]  }
 0x15d   : > { %587 = vmatpush1.bf16.msra.mxu0 %v507_v53  ;;  %v403_v56 = vmax.f32 %v391_v34, 0.0  ;;  %722 = vst [vmem:[#allocation2] sm:$0x77] %v3163_v28  ;;  %723 = vst [vmem:[#allocation2 + $0x8] sm:$0x77] %v3164_v31  ;;  %v3505_v40 = vld [vmem:[#allocation10 + $0x40] sm:$0xff]  }
 0x15e   : > { %v510_v57 = vpack.c.bf16 %v418_v54, %v416_v44  ;;  %v405_v58 = vmax.f32 %v393_v55, 0.0  ;;  %724 = vst [vmem:[#allocation2 + $0x10] sm:$0x77] %v3165_v32  ;;  %v3506_v42 = vld [vmem:[#allocation10] sm:$0xff]   ;;  %3356 = vmatprep.subr.bf16.mxu1 %v3505_v40  ;;  %v3509_v46 = vld [vmem:[#allocation10 + $0x48] sm:$0xff]   ;;  %v3511_v50 = vld [vmem:[#allocation10 + $0x50] sm:$0xff]  }
 0x15f   : > { %v415_v59 = vmin.f32 %v403_v56, 1.0  ;;  %3357 = vmatpush3.bf16.msra.mxu1 %v3506_v42  ;;  %v3508_v47 = vld [vmem:[#allocation10 + $0x108] sm:$0xff]   ;;  %v3513_v51 = vld [vmem:[#allocation10 + $0x150] sm:$0xff]   ;;  %v3515_v44 = vld [vmem:[#allocation10 + $0x58] sm:$0xff]  }
 0x160   : > { %588 = vmatprep.subr.bf16.mxu0 %v510_v57  ;;  %v417_v60 = vmin.f32 %v405_v58, 1.0  ;;  %v3510_v49 = vld [vmem:[#allocation10 + $0x8] sm:$0xff]   ;;  %3358 = vmatprep.subr.bf16.mxu1 %v3509_v46  ;;  %v3512_v53 = vld [vmem:[#allocation10 + $0x10] sm:$0xff]   ;;  %v3517_v54 = vld [vmem:[#allocation10 + $0x158] sm:$0xff]  }
 0x161   : > { %v3514_v34 = vld [vmem:[#allocation10 + $0x110] sm:$0xff]   ;;  %v3516_v55 = vld [vmem:[#allocation10 + $0x18] sm:$0xff]   ;;  %v3519_v57 = vld [vmem:[#allocation10 + $0x60] sm:$0xff]  }
 0x162   : > { %v509_v61 = vpack.c.bf16 %v417_v60, %v415_v59  ;;  %v3518_v56 = vld [vmem:[#allocation10 + $0x118] sm:$0xff]   ;;  %v3521_v58 = vld [vmem:[#allocation10 + $0x160] sm:$0xff]   ;;  %v3530_v27 = vld [vmem:[#allocation10 + $0x130] sm:$0xff]  }
 0x163   : > { %3359 = vmatpush3.bf16.msra.mxu1 %v3510_v49  ;;  %v3520_v59 = vld [vmem:[#allocation10 + $0x20] sm:$0xff]   ;;  %v3531_v29 = vld [vmem:[#allocation10 + $0x78] sm:$0xff]  }
 0x164   : > { %589 = vmatpush1.bf16.msra.mxu0 %v509_v61  ;;  %3360 = vmatprep.subr.bf16.mxu1 %v3511_v50  ;;  %v3522_v60 = vld [vmem:[#allocation10 + $0x120] sm:$0xff]   ;;  %v3523_v61 = vld [vmem:[#allocation10 + $0x68] sm:$0xff]   ;;  %v3533_v31 = vld [vmem:[#allocation10 + $0x178] sm:$0xff]  }
 0x165   : > { %3400 = vmatprep.subr.bf16.mxu0 %v3503_v33  ;;  %v3534_v40 = vld [vmem:[#allocation10 + $0x138] sm:$0xff]  }
 0x167   : > { %3154 = vmatmul.mubr.msk.bf16.vlgmr.msra.gmra.mrb[0].mxu0 %vm556_vm15, %v3494_v5  ;;  %3361 = vmatpush3.bf16.msra.mxu1 %v3512_v53  ;;  %v3525_v5 = vld [vmem:[#allocation10 + $0x168] sm:$0xff]  }
 0x168   : > { %626 = vmatprep.mubr.bf16.mxu0 %v4734_v38  ;;  %3401 = vmatpush3.bf16.msra.mxu0 %v3504_v36  ;;  %v3532_v36 = vld [vmem:[#allocation10 + $0x38] sm:$0xff]  }
 0x169   : > { %3402 = vmatprep.subr.bf16.mxu0 %v3507_v45  ;;  %3362 = vmatprep.subr.bf16.mxu1 %v3515_v44 }
 0x16b   : > { %3363 = vmatpush3.bf16.msra.mxu1 %v3516_v55 }
 0x16c   : > { %3403 = vmatpush3.bf16.msra.mxu0 %v3508_v47  ;;  %3364 = vmatprep.subr.bf16.mxu1 %v3519_v57 }
 0x16d   : > { %3404 = vmatprep.subr.bf16.mxu0 %v3513_v51 }
 0x16f   : > { %3155 = vmatmul.mubr.msk.bf16.gmra.mrb[4].mxu0 %vm556_vm15, %v3495_v62  ;;  %v4309_v62 = vrot.slane %v4245_v2, %v4212_v35  ;;  %3365 = vmatpush3.bf16.msra.mxu1 %v3520_v59 }
 0x170   : > { %636 = vmatprep.mubr.bf16.mxu0 %v4734_v38  ;;  %3405 = vmatpush3.bf16.msra.mxu0 %v3514_v34 }
 0x171   : > { %3406 = vmatprep.subr.bf16.mxu0 %v3517_v54  ;;  %3366 = vmatprep.subr.bf16.mxu1 %v3523_v61  ;;  %v429_v2 = vsub.f32 %v4765_v13, %v4309_v62  ;;  %v431_v46 = vsub.f32 %v4764_v14, %v4309_v62  ;;  %v433_v51 = vsub.f32 %v4763_v15, %v4309_v62 }
 0x173   : > { %v441_v33 = vand.u32 2147483647, %v429_v2  ;;  %v443_v54 = vand.u32 2147483647, %v431_v46 }
 0x174   : > { %3407 = vmatpush3.bf16.msra.mxu0 %v3518_v56 }
 0x175   : > { %3408 = vmatprep.subr.bf16.mxu0 %v3521_v58  ;;  %v453_v50 = vsub.f32 1.0, %v441_v33  ;;  %v445_v58 = vand.u32 2147483647, %v433_v51 }
 0x177   : > { %3156 = vmatmul.mubr.msk.bf16.gmra.mrb[8].mxu0 %vm556_vm15, %v3496_v63  ;;  %v4313_v63 = vrot.slane %v4247_v4, %v4212_v35  ;;  %v3528_v4 = vld [vmem:[#allocation10 + $0x30] sm:$0xff]   ;;  %v465_v57 = vmax.f32 %v453_v50, 0.0 }
 0x178   : > { %646 = vmatprep.mubr.bf16.mxu0 %v4734_v38  ;;  %3409 = vmatpush3.bf16.msra.mxu0 %v3522_v60 }
 0x179   : > { %3410 = vmatprep.subr.bf16.mxu0 %v3525_v5  ;;  %v430_v28 = vsub.f32 %v4765_v13, %v4313_v63  ;;  %v432_v49 = vsub.f32 %v4764_v14, %v4313_v63  ;;  %v434_v34 = vsub.f32 %v4763_v15, %v4313_v63  ;;  %v455_v5 = vsub.f32 1.0, %v443_v54 }
 0x17a   : > { %v438_v33 = vsub.f32 %v4760_v19, %v4313_v63 }
 0x17b   : > { %v442_v42 = vand.u32 2147483647, %v430_v28  ;;  %v444_v56 = vand.u32 2147483647, %v432_v49  ;;  %v446_v60 = vand.u32 2147483647, %v434_v34  ;;  %v437_v28 = vsub.f32 %v4760_v19, %v4309_v62 }
 0x17d   : > { %v454_v53 = vsub.f32 1.0, %v442_v42  ;;  %v467_v42 = vmax.f32 %v455_v5, 0.0  ;;  %v449_v51 = vand.u32 2147483647, %v437_v28 }
 0x17f   : > { %3157 = vmatmul.mubr.msk.bf16.gmra.mrb[12].mxu0 %vm556_vm15, %v3497_v1  ;;  %v3524_v1 = vld [vmem:[#allocation10 + $0x28] sm:$0xff]   ;;  %v466_v59 = vmax.f32 %v454_v53, 0.0  ;;  %v4351_v54 = vmin.f32 %v467_v42, 1.0  ;;  %v461_v5 = vsub.f32 1.0, %v449_v51 }
 0x180   : > { %656 = vmatprep.mubr.bf16.mxu0 %v4734_v38  ;;  %3367 = vmatpush3.bf16.msra.mxu1 %v3524_v1  ;;  %v435_v1 = vsub.f32 %v4762_v16, %v4309_v62 }
 0x187   : > { %3158 = vmatmul.mubr.msk.bf16.gmra.mrb[16].mxu0 %vm556_vm15, %v3498_v7  ;;  %v3526_v7 = vld [vmem:[#allocation10 + $0x128] sm:$0xff]  }
 0x188   : > { %666 = vmatprep.mubr.bf16.mxu0 %v4734_v38  ;;  %3411 = vmatpush3.bf16.msra.mxu0 %v3526_v7 }
 0x18f   : > { %3159 = vmatmul.mubr.msk.bf16.gmra.mrb[20].mxu0 %vm556_vm15, %v3499_v6  ;;  %v3527_v6 = vld [vmem:[#allocation10 + $0x70] sm:$0xff]  }
 0x190   : > { %676 = vmatprep.mubr.bf16.mxu0 %v4734_v38  ;;  %3368 = vmatprep.subr.bf16.mxu1 %v3527_v6 }
 0x191   : > { %3369 = vmatpush3.bf16.msra.mxu1 %v3528_v4  ;;  %v4340_v4 = vmin.f32 %v465_v57, 1.0 }
 0x192   : > { %3370 = vmatprep.subr.bf16.mxu1 %v3531_v29 }
 0x195   : > { %3371 = vmatpush3.bf16.msra.mxu1 %v3532_v36 }
 0x197   : > { %3160 = vmatmul.mubr.msk.bf16.gmra.mrb[24].mxu0 %vm556_vm15, %v3500_v8  ;;  %v3529_v8 = vld [vmem:[#allocation10 + $0x170] sm:$0xff]  }
 0x198   : > { %686 = vmatprep.mubr.bf16.mxu0 %v4734_v38  ;;  %3412 = vmatprep.subr.bf16.mxu0 %v3529_v8  ;;  %v456_v8 = vsub.f32 1.0, %v444_v56 }
 0x199   : > { %3413 = vmatpush3.bf16.msra.mxu0 %v3530_v27  ;;  %v457_v27 = vsub.f32 1.0, %v445_v58 }
 0x19a   : > { %3414 = vmatprep.subr.bf16.mxu0 %v3533_v31 }
 0x19d   : > { %3415 = vmatpush3.bf16.msra.mxu0 %v3534_v40 }
 0x19f   : > { %3161 = vmatmul.mubr.msk.bf16.gmra.mrb[28].mxu0 %vm556_vm15, %v3501_v9  ;;  %v427_v9 = vsub.f32 %v4767_v11, %v4309_v62  ;;  %v469_v62 = vmax.f32 %v457_v27, 0.0 }
 0x1a0   : > { %696 = vmatprep.mubr.bf16.mxu0 %v4734_v38 }
 0x1a1   : > { %v439_v30 = vand.u32 2147483647, %v427_v9  ;;  %v436_v9 = vsub.f32 %v4762_v16, %v4313_v63 }
 0x1a3   : > { %v451_v45 = vsub.f32 1.0, %v439_v30  ;;  %v4345_v30 = vmin.f32 %v466_v59, 1.0  ;;  %v448_v49 = vand.u32 2147483647, %v436_v9 }
 0x1a5   : > { %v463_v44 = vmax.f32 %v451_v45, 0.0  ;;  %v447_v45 = vand.u32 2147483647, %v435_v1  ;;  %v460_v57 = vsub.f32 1.0, %v448_v49 }
 0x1a7   : > { %3162 = vmatmul.mubr.msk.bf16.gmra.mrb[32].mxu0 %vm556_vm15, %v3502_v10  ;;  %v428_v10 = vsub.f32 %v4767_v11, %v4313_v63  ;;  %v4331_v61 = vmin.f32 %v463_v44, 1.0  ;;  %v450_v44 = vand.u32 2147483647, %v438_v33  ;;  %v1515_v11 = vld [vmem:[%s4727_s8] sm:$0xf] }
 0x1a8   : > { %v1520_v12 = vrot.slane %v1515_v11, %v4212_v35  ;;  %v1524_v13 = vrot.slane %v1515_v11, %v4222_v43 }
 0x1a9   : > { %v440_v32 = vand.u32 2147483647, %v428_v10  ;;  %v462_v9 = vsub.f32 1.0, %v450_v44 }
 0x1ab   : > { %v452_v47 = vsub.f32 1.0, %v440_v32  ;;  %v458_v32 = vsub.f32 1.0, %v446_v60  ;;  %v4356_v60 = vmin.f32 %v469_v62, 1.0  ;;  %v474_v42 = vmax.f32 %v462_v9, 0.0 }
 0x1ad   : > { %v464_v55 = vmax.f32 %v452_v47, 0.0  ;;  %v468_v47 = vmax.f32 %v456_v8, 0.0  ;;  %v470_v34 = vmax.f32 %v458_v32, 0.0  ;;  %v472_v32 = vmax.f32 %v460_v57, 0.0 }
 0x1af   : > { %v4335_v6 = vmin.f32 %v464_v55, 1.0  ;;  %v459_v55 = vsub.f32 1.0, %v447_v45  ;;  %v4353_v63 = vmin.f32 %v468_v47, 1.0  ;;  %v4359_v8 = vmin.f32 %v470_v34, 1.0 }
 0x1b0   : > { %v4365_v47 = vmin.f32 %v472_v32, 1.0  ;;  %v4371_v34 = vmin.f32 %v474_v42, 1.0 }
 0x1b1   : > { %v471_v28 = vmax.f32 %v459_v55, 0.0 }
 0x1b3   : > { %v4363_v45 = vmin.f32 %v471_v28, 1.0 }
 0x23a   : > { %v618_v7 = vpop.f32.mrb[0].mxu0 }
 0x23b   : > { %v725_v10 = vmul.f32 %v618_v7, %v4331_v61  ;;  %v620_v2 = vpop.f32.mrb[1].mxu0 }
 0x23c   : > { %v726_v29 = vmul.f32 %v620_v2, %v4335_v6  ;;  %v622_v31 = vpop.f32.mrb[2].mxu0 }
 0x23d   : > { %v727_v36 = vmul.f32 %v622_v31, %v4340_v4  ;;  %v624_v40 = vpop.f32.mrb[3].mxu0 }
 0x23e   : > { %v728_v46 = vmul.f32 %v624_v40, %v4345_v30 }
 0x23f   : > { %v737_v50 = vadd.f32 %v727_v36, %v725_v10  ;;  %v473_v36 = vmax.f32 %v461_v5, 0.0 }
 0x240   : > { %v748_v53 = vadd.f32 %v728_v46, %v726_v29 }
 0x241   : > { %v4368_v62 = vmin.f32 %v473_v36, 1.0 }
 0x242   : > { %v628_v56 = vpop.f32.mrb[4].mxu0 }
 0x243   : > { %v729_v58 = vmul.f32 %v628_v56, %v4351_v54  ;;  %v630_v59 = vpop.f32.mrb[5].mxu0 }
 0x244   : > { %v730_v1 = vmul.f32 %v630_v59, %v4353_v63  ;;  %v632_v7 = vpop.f32.mrb[6].mxu0 }
 0x245   : > { %v738_v10 = vadd.f32 %v737_v50, %v729_v58  ;;  %v731_v2 = vmul.f32 %v632_v7, %v4356_v60  ;;  %v634_v27 = vpop.f32.mrb[7].mxu0 }
 0x246   : > { %v749_v29 = vadd.f32 %v748_v53, %v730_v1  ;;  %v732_v31 = vmul.f32 %v634_v27, %v4359_v8 }
 0x247   : > { %v739_v33 = vadd.f32 %v738_v10, %v731_v2 }
 0x248   : > { %v750_v40 = vadd.f32 %v749_v29, %v732_v31  ;;  %v3976_v29 = vmov 1966171168  }
 0x249   : > { %v763_v31 = vunpack.c.l.s4 %v3976_v29 }
 0x24a   : > { %v638_v46 = vpop.f32.mrb[8].mxu0 }
 0x24b   : > { %v733_v49 = vmul.f32 %v638_v46, %v4363_v45  ;;  %v640_v50 = vpop.f32.mrb[9].mxu0 }
 0x24c   : > { %v734_v51 = vmul.f32 %v640_v50, %v4365_v47  ;;  %v642_v53 = vpop.f32.mrb[10].mxu0 }
 0x24d   : > { %v740_v44 = vadd.f32 %v739_v33, %v733_v49  ;;  %v735_v55 = vmul.f32 %v642_v53, %v4368_v62  ;;  %v644_v56 = vpop.f32.mrb[11].mxu0 }
 0x24e   : > { %v751_v57 = vadd.f32 %v750_v40, %v734_v51  ;;  %v736_v58 = vmul.f32 %v644_v56, %v4371_v34 }
 0x24f   : > { %v741_v59 = vadd.f32 %v740_v44, %v735_v55  ;;  %v764_v44 = vunpack.c.0.s8 %v763_v31 }
 0x250   : > { %v752_v5 = vadd.f32 %v751_v57, %v736_v58 }
 0x251   : > { %v742_v1 = vrot.slane %v741_v59, 4 }
 0x252   : > { %v753_v7 = vrot.slane %v752_v5, 4  ;;  %v648_v9 = vpop.f32.mrb[12].mxu0 }
 0x253   : > { %v743_v10 = vadd.f32 %v742_v1, %v741_v59  ;;  %v783_v2 = vmul.f32 %v648_v9, %v4331_v61  ;;  %v650_v27 = vpop.f32.mrb[13].mxu0  ;;  %v4381_v9 = vsub.s32 %v764_v44, %v4139_v3 }
 0x254   : > { %v754_v28 = vadd.f32 %v753_v7, %v752_v5  ;;  %v784_v32 = vmul.f32 %v650_v27, %v4335_v6  ;;  %v652_v33 = vpop.f32.mrb[14].mxu0 }
 0x255   : > { %v744_v36 = vrot.slane %v743_v10, 2  ;;  %v785_v40 = vmul.f32 %v652_v33, %v4340_v4  ;;  %v654_v42 = vpop.f32.mrb[15].mxu0 }
 0x256   : > { %v755_v46 = vrot.slane %v754_v28, 2  ;;  %v786_v49 = vmul.f32 %v654_v42, %v4345_v30 }
 0x257   : > { %v745_v50 = vadd.f32 %v744_v36, %v743_v10  ;;  %v795_v51 = vadd.f32 %v785_v40, %v783_v2 }
 0x258   : > { %v756_v53 = vadd.f32 %v755_v46, %v754_v28  ;;  %v806_v55 = vadd.f32 %v786_v49, %v784_v32 }
 0x259   : > { %v746_v56 = vrot.slane %v745_v50, 1 }
 0x25a   : > { %v757_v57 = vrot.slane %v756_v53, 1  ;;  %v658_v58 = vpop.f32.mrb[16].mxu0 }
 0x25b   : > { %v747_v59 = vadd.f32 %v746_v56, %v745_v50  ;;  %v787_v5 = vmul.f32 %v658_v58, %v4351_v54  ;;  %v660_v1 = vpop.f32.mrb[17].mxu0  ;;  %v3535_v56 = vld [vmem:[#allocation10 + $0xc0] sm:$0xff]  }
 0x25c   : > { %v758_v7 = vadd.f32 %v757_v57, %v756_v53  ;;  %v788_v27 = vmul.f32 %v660_v1, %v4353_v63  ;;  %v662_v29 = vpop.f32.mrb[18].mxu0  ;;  %3378 = vmatprep.subr.bf16.mxu1 %v3535_v56 }
 0x25d   : > { %v796_v33 = vadd.f32 %v795_v51, %v787_v5  ;;  %v789_v10 = vmul.f32 %v662_v29, %v4356_v60  ;;  %v664_v2 = vpop.f32.mrb[19].mxu0 }
 0x25e   : > { %v761_v28 = vcombine.low %v747_v59, %v758_v7  ;;  %v807_v31 = vadd.f32 %v806_v55, %v788_v27  ;;  %v790_v32 = vmul.f32 %v664_v2, %v4359_v8 }
 0x25f   : > { %v797_v36 = vadd.f32 %v796_v33, %v789_v10 }
 0x260   : > { %v768_v40 = vrot.slane %v761_v28, %v4381_v9  ;;  %v808_v42 = vadd.f32 %v807_v31, %v790_v32 }
 0x262   : > { %v775_v49 = vrot.slane %v768_v40, %v4381_v9  ;;  %v668_v50 = vpop.f32.mrb[20].mxu0 }
 0x263   : > { %v791_v51 = vmul.f32 %v668_v50, %v4363_v45  ;;  %v670_v53 = vpop.f32.mrb[21].mxu0 }
 0x264   : > { %782 = vst.msk [vmem:[#allocation2 + $0x3] ss:$4 sm:$0x3] %vm4388_vm0, %v775_v49  ;;  %v792_v44 = vmul.f32 %v670_v53, %v4365_v47  ;;  %v672_v55 = vpop.f32.mrb[22].mxu0 }
 0x265   : > { %v798_v57 = vadd.f32 %v797_v36, %v791_v51  ;;  %v793_v58 = vmul.f32 %v672_v55, %v4368_v62  ;;  %v674_v59 = vpop.f32.mrb[23].mxu0 }
 0x266   : > { %v809_v5 = vadd.f32 %v808_v42, %v792_v44  ;;  %v794_v1 = vmul.f32 %v674_v59, %v4371_v34 }
 0x267   : > { %v799_v7 = vadd.f32 %v798_v57, %v793_v58 }
 0x268   : > { %v810_v27 = vadd.f32 %v809_v5, %v794_v1 }
 0x269   : > { %v800_v29 = vrot.slane %v799_v7, 4 }
 0x26a   : > { %v811_v33 = vrot.slane %v810_v27, 4  ;;  %v678_v10 = vpop.f32.mrb[24].mxu0 }
 0x26b   : > { %v801_v2 = vadd.f32 %v800_v29, %v799_v7  ;;  %v837_v28 = vmul.f32 %v678_v10, %v4331_v61  ;;  %v680_v31 = vpop.f32.mrb[25].mxu0 }
 0x26c   : > { %v812_v32 = vadd.f32 %v811_v33, %v810_v27  ;;  %v838_v40 = vmul.f32 %v680_v31, %v4335_v6  ;;  %v682_v36 = vpop.f32.mrb[26].mxu0 }
 0x26d   : > { %v802_v49 = vrot.slane %v801_v2, 2  ;;  %v839_v50 = vmul.f32 %v682_v36, %v4340_v4  ;;  %v684_v42 = vpop.f32.mrb[27].mxu0 }
 0x26e   : > { %v813_v51 = vrot.slane %v812_v32, 2  ;;  %v840_v53 = vmul.f32 %v684_v42, %v4345_v30 }
 0x26f   : > { %v803_v44 = vadd.f32 %v802_v49, %v801_v2  ;;  %v849_v55 = vadd.f32 %v839_v50, %v837_v28 }
 0x270   : > { %v814_v56 = vadd.f32 %v813_v51, %v812_v32  ;;  %v860_v57 = vadd.f32 %v840_v53, %v838_v40 }
 0x271   : > { %v804_v58 = vrot.slane %v803_v44, 1 }
 0x272   : > { %v815_v59 = vrot.slane %v814_v56, 1  ;;  %v688_v5 = vpop.f32.mrb[28].mxu0 }
 0x273   : > { %v805_v61 = vadd.f32 %v804_v58, %v803_v44  ;;  %v841_v1 = vmul.f32 %v688_v5, %v4351_v54  ;;  %v690_v7 = vpop.f32.mrb[29].mxu0 }
 0x274   : > { %v816_v6 = vadd.f32 %v815_v59, %v814_v56  ;;  %v842_v27 = vmul.f32 %v690_v7, %v4353_v63  ;;  %v692_v29 = vpop.f32.mrb[30].mxu0 }
 0x275   : > { %v850_v4 = vadd.f32 %v849_v55, %v841_v1  ;;  %v843_v33 = vmul.f32 %v692_v29, %v4356_v60  ;;  %v694_v10 = vpop.f32.mrb[31].mxu0 }
 0x276   : > { %v819_v30 = vcombine.low %v805_v61, %v816_v6  ;;  %v861_v2 = vadd.f32 %v860_v57, %v842_v27  ;;  %v844_v28 = vmul.f32 %v694_v10, %v4359_v8  ;;  %v896_v10 = vstv %s4148_s30 }
 0x277   : > { %v851_v31 = vadd.f32 %v850_v4, %v843_v33 }
 0x278   : > { %v826_v32 = vrot.slane %v819_v30, %v4381_v9  ;;  %v862_v40 = vadd.f32 %v861_v2, %v844_v28  ;;  %v891_v30 = vld [vmem:[#allocation2] sm:$0xff]  ;;  %v894_v2 = vstv %s4146_s29 }
 0x27a   : > { %v833_v36 = vrot.slane %v826_v32, %v4381_v9  ;;  %v698_v54 = vpop.f32.mrb[32].mxu0  ;;  %v895_v32 = vmul.f32 %v894_v2, %v891_v30 }
 0x27b   : > { %v845_v49 = vmul.f32 %v698_v54, %v4363_v45  ;;  %v700_v50 = vpop.f32.mrb[33].mxu0 }
 0x27c   : > { %836 = vst.msk [vmem:[#allocation2 + $0xb] ss:$4 sm:$0x3] %vm4388_vm0, %v833_v36  ;;  %v846_v63 = vmul.f32 %v700_v50, %v4365_v47  ;;  %v702_v60 = vpop.f32.mrb[34].mxu0 }
 0x27d   : > { %v852_v42 = vadd.f32 %v851_v31, %v845_v49  ;;  %v847_v51 = vmul.f32 %v702_v60, %v4368_v62  ;;  %v704_v8 = vpop.f32.mrb[35].mxu0  ;;  %v899_v31 = vstv %s4154_s14 }
 0x27e   : > { %v863_v53 = vadd.f32 %v862_v40, %v846_v63  ;;  %v848_v44 = vmul.f32 %v704_v8, %v4371_v34 }
 0x27f   : > { %v853_v55 = vadd.f32 %v852_v42, %v847_v51 }
 0x280   : > { %v864_v56 = vadd.f32 %v863_v53, %v848_v44 }
 0x281   : > { %v854_v57 = vrot.slane %v853_v55, 4 }
 0x282   : > { %v865_v58 = vrot.slane %v864_v56, 4 }
 0x283   : > { %v855_v45 = vadd.f32 %v854_v57, %v853_v55  ;;  %v892_v33 = vld [vmem:[#allocation2 + $0x8] sm:$0xff] }
 0x284   : > { %v866_v59 = vadd.f32 %v865_v58, %v864_v56  ;;  %v897_v28 = vmul.f32 %v896_v10, %v892_v33 }
 0x285   : > { %v856_v5 = vrot.slane %v855_v45, 2 }
 0x286   : > { %v867_v61 = vrot.slane %v866_v59, 2  ;;  %v898_v36 = vadd.f32 %v897_v28, %v895_v32 }
 0x287   : > { %v857_v47 = vadd.f32 %v856_v5, %v855_v45 }
 0x288   : > { %v868_v1 = vadd.f32 %v867_v61, %v866_v59 }
 0x289   : > { %v858_v7 = vrot.slane %v857_v47, 1 }
 0x28a   : > { %v869_v6 = vrot.slane %v868_v1, 1 }
 0x28b   : > { %v859_v62 = vadd.f32 %v858_v7, %v857_v47 }
 0x28c   : > { %v870_v27 = vadd.f32 %v869_v6, %v868_v1 }
 0x28e   : > { %v873_v29 = vcombine.low %v859_v62, %v870_v27 }
 0x290   : > { %v880_v34 = vrot.slane %v873_v29, %v4381_v9 }
 0x292   : > { %v887_v4 = vrot.slane %v880_v34, %v4381_v9 }
 0x294   : > { %890 = vst.msk [vmem:[#allocation2 + $0x13] ss:$4 sm:$0x3] %vm4388_vm0, %v887_v4 }
 0x29b   : > { %v893_v40 = vld [vmem:[#allocation2 + $0x10] sm:$0xff] }
 0x29c   : > { %v900_v54 = vmul.f32 %v899_v31, %v893_v40 }
 0x29e   : > { %v901_v49 = vadd.f32 %v900_v54, %v898_v36 }
 0x2a0   : > { %v903_v50 = vcombine.high %v901_v49, %v901_v49  ;;  %v906_v63 = vsel %vm905_vm1, %v901_v49, -inf }
 0x2a1   : > { %v907_v60 = vrot.slane %v906_v63, 4 }
 0x2a2   : > { %v913_v9 = vsel %vm905_vm1, %v903_v50, -inf }
 0x2a3   : > { %v908_v46 = vmax.f32 %v906_v63, %v907_v60  ;;  %v914_v42 = vrot.slane %v913_v9, 4 }
 0x2a5   : > { %v909_v51 = vrot.slane %v908_v46, 2  ;;  %v915_v8 = vmax.f32 %v913_v9, %v914_v42 }
 0x2a7   : > { %v910_v53 = vmax.f32 %v908_v46, %v909_v51  ;;  %v916_v44 = vrot.slane %v915_v8, 2 }
 0x2a9   : > { %v911_v55 = vrot.slane %v910_v53, 1  ;;  %v917_v56 = vmax.f32 %v915_v8, %v916_v44 }
 0x2ab   : > { %v918_v57 = vrot.slane %v917_v56, 1  ;;  %v912_v58 = vmax.f32 %v910_v53, %v911_v55 }
 0x2ad   : > { %v919_v45 = vmax.f32 %v917_v56, %v918_v57  ;;  %v3536_v56 = vld [vmem:[#allocation10 + $0x80] sm:$0xff]  }
 0x2af   : > { %v922_v59 = vcombine.low %v912_v58, %v919_v45  ;;  %v3537_v45 = vld [vmem:[#allocation10 + $0xc8] sm:$0xff]  }
 0x2b1   : > { %v924_v5 = vsub.f32 %v901_v49, %v922_v59 }
 0x2b3   : > { %v925_v61 = vmul.f32 1.442695, %v924_v5  ;;  %v3538_v5 = vld [vmem:[#allocation10 + $0x88] sm:$0xff]  }
 0x2b5   : > { %3727 = vpow2.f32 %v925_v61  ;;  %v3542_v61 = vld [vmem:[#allocation10 + $0x98] sm:$0xff]  }
 0x2bf   : > { %v3728_v47 = vpop.eup %3727 }
 0x2c0   : > { %v928_v1 = vcombine.high %v3728_v47, %v3728_v47  ;;  %v930_v7 = vsel %vm905_vm1, %v3728_v47, 0.0 }
 0x2c1   : > { %v931_v6 = vrot.slane %v930_v7, 4 }
 0x2c2   : > { %v937_v62 = vsel %vm905_vm1, %v928_v1, 0.0  ;;  %v3544_v1 = vld [vmem:[#allocation10 + $0xa0] sm:$0xff]  }
 0x2c3   : > { %v932_v27 = vadd.f32 %v931_v6, %v930_v7  ;;  %v938_v29 = vrot.slane %v937_v62, 4  ;;  %v3545_v7 = vld [vmem:[#allocation10 + $0xe8] sm:$0xff]  }
 0x2c4   : > { %v3546_v6 = vld [vmem:[#allocation10 + $0xa8] sm:$0xff]  }
 0x2c5   : > { %v933_v34 = vrot.slane %v932_v27, 2  ;;  %v939_v4 = vadd.f32 %v938_v29, %v937_v62  ;;  %v3547_v62 = vld [vmem:[#allocation10 + $0xf0] sm:$0xff]   ;;  %v3549_v29 = vld [vmem:[#allocation10 + $0xf8] sm:$0xff]  }
 0x2c7   : > { %v934_v10 = vadd.f32 %v933_v34, %v932_v27  ;;  %v940_v2 = vrot.slane %v939_v4, 2  ;;  %v3548_v27 = vld [vmem:[#allocation10 + $0xb0] sm:$0xff]   ;;  %v3550_v34 = vld [vmem:[#allocation10 + $0xb8] sm:$0xff]  }
 0x2c9   : > { %v935_v28 = vrot.slane %v934_v10, 1  ;;  %v941_v31 = vadd.f32 %v940_v2, %v939_v4  ;;  %v3553_v2 = vld [vmem:[#allocation11 + $0x4] ss:$16 sps:$4 sm:$0xff]  }
 0x2cb   : > { %v936_v32 = vadd.f32 %v935_v28, %v934_v10  ;;  %v942_v36 = vrot.slane %v941_v31, 1  ;;  %v3551_v10 = vld [vmem:[#allocation11] ss:$16 sps:$4 sm:$0xff]   ;;  %v3554_v28 = vld [vmem:[#allocation11 + $0x8] ss:$16 sps:$4 sm:$0xff]  }
 0x2cd   : > { %v943_v54 = vadd.f32 %v942_v36, %v941_v31  ;;  %3729 = vrcp.f32 %v936_v32  ;;  %v3556_v31 = vld [vmem:[#allocation11 + $0xc] ss:$16 sps:$4 sm:$0xff]   ;;  %v3559_v32 = vld [vmem:[#allocation11 + $0x24] ss:$16 sps:$4 sm:$0xff]  }
 0x2ce   : > { %v3562_v36 = vld [vmem:[#allocation11 + $0x2c] ss:$16 sps:$4 sm:$0xff]   ;;  %1746 = vmatprep.subr.bf16.mxu0 %v3556_v31 }
 0x2cf   : > { %3731 = vrcp.f32 %v943_v54  ;;  %v3557_v54 = vld [vmem:[#allocation11 + $0x20] ss:$16 sps:$4 sm:$0xff]  }
 0x2d7   : > { %v3730_v49 = vpop.eup %3729 }
 0x2d9   : > { %v3732_v50 = vpop.eup %3731 }
 0x2da   : > { %v948_v63 = vcombine.low %v3730_v49, %v3732_v50  ;;  %v3560_v49 = vld [vmem:[#allocation11 + $0x28] ss:$16 sps:$4 sm:$0xff]   ;;  %v3565_v50 = vld [vmem:[#allocation11 + $0x44] ss:$16 sps:$4 sm:$0xff]  }
 0x2dc   : > { %v950_v60 = vmul.f32 %v3728_v47, %v948_v63  ;;  %v3543_v47 = vld [vmem:[#allocation10 + $0xe0] sm:$0xff]   ;;  %v3568_v63 = vld [vmem:[#allocation11 + $0x4c] ss:$16 sps:$4 sm:$0xff]  }
 0x2de   : > { %v951_v9 = vmul.f32 %v950_v60, %v891_v30  ;;  %v953_v46 = vmul.f32 %v950_v60, %v893_v40  ;;  %v952_v42 = vmul.f32 %v950_v60, %v892_v33  ;;  %v3539_v30 = vld [vmem:[#allocation10 + $0xd0] sm:$0xff]   ;;  %v3541_v40 = vld [vmem:[#allocation10 + $0xd8] sm:$0xff]  }
 0x2df   : > { %v3540_v33 = vld [vmem:[#allocation10 + $0x90] sm:$0xff]  }
 0x2e0   : > { %v955_v51 = vcombine.high %v951_v9, %v951_v9  ;;  %v961_v8 = vcombine.high %v953_v46, %v953_v46  ;;  %v958_v53 = vcombine.high %v952_v42, %v952_v42  ;;  %v967_v57 = vpack.c.bf16 %v953_v46, %v953_v46  ;;  %v3563_v60 = vld [vmem:[#allocation11 + $0x40] ss:$16 sps:$4 sm:$0xff]   ;;  %v3571_v46 = vld [vmem:[#allocation11 + $0x64] ss:$16 sps:$4 sm:$0xff]  }
 0x2e1   : > { %v963_v58 = vpack.c.bf16 %v951_v9, %v951_v9  ;;  %v965_v4 = vpack.c.bf16 %v952_v42, %v952_v42  ;;  %v3566_v9 = vld [vmem:[#allocation11 + $0x48] ss:$16 sps:$4 sm:$0xff]   ;;  %v3574_v42 = vld [vmem:[#allocation11 + $0x6c] ss:$16 sps:$4 sm:$0xff]  }
 0x2e2   : > { %v964_v44 = vpack.c.bf16 %v955_v51, %v955_v51  ;;  %v968_v55 = vpack.c.bf16 %v961_v8, %v961_v8  ;;  %v966_v59 = vpack.c.bf16 %v958_v53, %v958_v53  ;;  %v3569_v51 = vld [vmem:[#allocation11 + $0x60] ss:$16 sps:$4 sm:$0xff]   ;;  %v3572_v8 = vld [vmem:[#allocation11 + $0x68] ss:$16 sps:$4 sm:$0xff]  }
 0x2e3   : > { %v3575_v53 = vld [vmem:[#allocation11 + $0x80] ss:$16 sps:$4 sm:$0xff]  }
 0x2e4   : > { %1385 = vmatprep.mubr.bf16.mxu1 %v964_v44  ;;  %1465 = vmatprep.mubr.bf16.mxu0 %v968_v55  ;;  %v3577_v44 = vld [vmem:[#allocation11 + $0x84] ss:$16 sps:$4 sm:$0xff]   ;;  %v3578_v55 = vld [vmem:[#allocation11 + $0x88] ss:$16 sps:$4 sm:$0xff]  }
 0x2e5   : > { %1386 = vmatmul.mubr.bf16.vlgmr.msra.gmra.mrb[0].mxu1 %v963_v58  ;;  %1466 = vmatmul.mubr.bf16.vlgmr.msra.gmra.mrb[36].mxu0 %v967_v57  ;;  %v3583_v57 = vld [vmem:[#allocation11 + $0xa4] ss:$16 sps:$4 sm:$0xff]   ;;  %v3586_v58 = vld [vmem:[#allocation11 + $0xac] ss:$16 sps:$4 sm:$0xff]  }
 0x2e6   : > { %3379 = vmatpush3.bf16.msra.mxu1 %v3536_v56  ;;  %1425 = vmatprep.mubr.bf16.mxu1 %v966_v59  ;;  %v3580_v56 = vld [vmem:[#allocation11 + $0x8c] ss:$16 sps:$4 sm:$0xff]   ;;  %v3584_v59 = vld [vmem:[#allocation11 + $0xa8] ss:$16 sps:$4 sm:$0xff]  }
 0x2e7   : > { %3380 = vmatprep.subr.bf16.mxu1 %v3537_v45  ;;  %1778 = vmatprep.mubr.bf16.mxu0 %v4734_v38  ;;  %v3581_v45 = vld [vmem:[#allocation11 + $0xa0] ss:$16 sps:$4 sm:$0xff]  }
 0x2e8   : > { %1747 = vmatpush1.bf16.msra.mxu0 %v3554_v28 }
 0x2e9   : > { %1748 = vmatprep.subr.bf16.mxu0 %v3562_v36 }
 0x2ea   : > { %3381 = vmatpush3.bf16.msra.mxu1 %v3538_v5  ;;  %v3589_v5 = vld [vmem:[#allocation11 + $0xc4] ss:$16 sps:$4 sm:$0xff]  }
 0x2eb   : > { %3382 = vmatprep.subr.bf16.mxu1 %v3539_v30  ;;  %v3592_v30 = vld [vmem:[#allocation11 + $0xcc] ss:$16 sps:$4 sm:$0xff]  }
 0x2ec   : > { %1749 = vmatpush1.bf16.msra.mxu0 %v3560_v49 }
 0x2ed   : > { %1750 = vmatprep.subr.bf16.mxu0 %v3568_v63 }
 0x2ee   : > { %3383 = vmatpush3.bf16.msra.mxu1 %v3540_v33  ;;  %v3587_v33 = vld [vmem:[#allocation11 + $0xc0] ss:$16 sps:$4 sm:$0xff]  }
 0x2ef   : > { %3384 = vmatprep.subr.bf16.mxu1 %v3541_v40  ;;  %v3590_v40 = vld [vmem:[#allocation11 + $0xc8] ss:$16 sps:$4 sm:$0xff]  }
 0x2f0   : > { %1751 = vmatpush1.bf16.msra.mxu0 %v3566_v9 }
 0x2f1   : > { %1752 = vmatprep.subr.bf16.mxu0 %v3574_v42 }
 0x2f2   : > { %3385 = vmatpush3.bf16.msra.mxu1 %v3542_v61  ;;  %v3595_v61 = vld [vmem:[#allocation11 + $0xe4] ss:$16 sps:$4 sm:$0xff]  }
 0x2f3   : > { %3386 = vmatprep.subr.bf16.mxu1 %v3543_v47  ;;  %v3598_v47 = vld [vmem:[#allocation11 + $0xec] ss:$16 sps:$4 sm:$0xff]  }
 0x2f4   : > { %1753 = vmatpush1.bf16.msra.mxu0 %v3572_v8 }
 0x2f5   : > { %1754 = vmatprep.subr.bf16.mxu0 %v3580_v56 }
 0x2f6   : > { %3387 = vmatpush3.bf16.msra.mxu1 %v3544_v1  ;;  %v3593_v1 = vld [vmem:[#allocation11 + $0xe0] ss:$16 sps:$4 sm:$0xff]  }
 0x2f7   : > { %3388 = vmatprep.subr.bf16.mxu1 %v3545_v7  ;;  %v3596_v7 = vld [vmem:[#allocation11 + $0xe8] ss:$16 sps:$4 sm:$0xff]  }
 0x2f8   : > { %1755 = vmatpush1.bf16.msra.mxu0 %v3578_v55 }
 0x2f9   : > { %1756 = vmatprep.subr.bf16.mxu0 %v3586_v58  ;;  %v4439_v58 = vld [vmem:[#allocation13 + $0x8] ss:$16 sps:$4 sm:$0xff]  }
 0x2fa   : > { %3389 = vmatpush3.bf16.msra.mxu1 %v3546_v6  ;;  %v4428_v6 = vld [vmem:[#allocation13 + $0x4] ss:$16 sps:$4 sm:$0xff]  }
 0x2fb   : > { %3390 = vmatprep.subr.bf16.mxu1 %v3547_v62  ;;  %v4430_v62 = vld [vmem:[#allocation13 + $0xc] ss:$16 sps:$4 sm:$0xff]  }
 0x2fc   : > { %1757 = vmatpush1.bf16.msra.mxu0 %v3584_v59  ;;  %v4441_v59 = vld [vmem:[#allocation13 + $0x24] ss:$16 sps:$4 sm:$0xff]  }
 0x2fd   : > { %1758 = vmatprep.subr.bf16.mxu0 %v3592_v30  ;;  %v4447_v30 = vld [vmem:[#allocation13 + $0x20] ss:$16 sps:$4 sm:$0xff]  }
 0x2fe   : > { %3391 = vmatpush3.bf16.msra.mxu1 %v3548_v27 }
 0x2ff   : > { %3392 = vmatprep.subr.bf16.mxu1 %v3549_v29 }
 0x300   : > { %1759 = vmatpush1.bf16.msra.mxu0 %v3590_v40  ;;  %v4453_v40 = vld [vmem:[#allocation13 + $0x44] ss:$16 sps:$4 sm:$0xff]  }
 0x301   : > { %1760 = vmatprep.subr.bf16.mxu0 %v3598_v47  ;;  %v4461_v47 = vld [vmem:[#allocation13 + $0x40] ss:$16 sps:$4 sm:$0xff]  }
 0x302   : > { %3393 = vmatpush3.bf16.msra.mxu1 %v3550_v34 }
 0x303   : > { %1705 = vmatprep.subr.bf16.mxu1 %v3553_v2 }
 0x304   : > { %1761 = vmatpush1.bf16.msra.mxu0 %v3596_v7  ;;  %v4467_v7 = vld [vmem:[#allocation13 + $0x64] ss:$16 sps:$4 sm:$0xff]  }
 0x305   : > { %1426 = vmatmul.mubr.bf16.vlgmr.msra.gmra.mrb[4].mxu1 %v965_v4  ;;  %2020 = vmatprep.subr.bf16.mxu0 %v4430_v62 }
 0x306   : > { %1737 = vmatprep.mubr.bf16.mxu1 %v4734_v38  ;;  %1706 = vmatpush1.bf16.msra.mxu1 %v3551_v10 }
 0x307   : > { %1707 = vmatprep.subr.bf16.mxu1 %v3559_v32 }
 0x30a   : > { %1708 = vmatpush1.bf16.msra.mxu1 %v3557_v54 }
 0x30b   : > { %1709 = vmatprep.subr.bf16.mxu1 %v3565_v50 }
 0x30e   : > { %1710 = vmatpush1.bf16.msra.mxu1 %v3563_v60 }
 0x30f   : > { %1711 = vmatprep.subr.bf16.mxu1 %v3571_v46  ;;  %v3214_v46 = vld [vmem:[%s4724_s5] ss:$0 sm:$0xff] }
 0x312   : > { %1712 = vmatpush1.bf16.msra.mxu1 %v3569_v51 }
 0x313   : > { %1713 = vmatprep.subr.bf16.mxu1 %v3577_v44 }
 0x316   : > { %1714 = vmatpush1.bf16.msra.mxu1 %v3575_v53 }
 0x317   : > { %1715 = vmatprep.subr.bf16.mxu1 %v3583_v57  ;;  %v4437_v57 = vld [vmem:[#allocation13] ss:$16 sps:$4 sm:$0xff]  }
 0x31a   : > { %1716 = vmatpush1.bf16.msra.mxu1 %v3581_v45 }
 0x31b   : > { %1717 = vmatprep.subr.bf16.mxu1 %v3589_v5  ;;  %v4443_v5 = vld [vmem:[#allocation13 + $0x2c] ss:$16 sps:$4 sm:$0xff]  }
 0x31e   : > { %1718 = vmatpush1.bf16.msra.mxu1 %v3587_v33  ;;  %v4449_v33 = vld [vmem:[#allocation13 + $0x28] ss:$16 sps:$4 sm:$0xff]  }
 0x31f   : > { %1719 = vmatprep.subr.bf16.mxu1 %v3595_v61  ;;  %v4455_v61 = vld [vmem:[#allocation13 + $0x4c] ss:$16 sps:$4 sm:$0xff]  }
 0x322   : > { %1720 = vmatpush1.bf16.msra.mxu1 %v3593_v1  ;;  %v4463_v1 = vld [vmem:[#allocation13 + $0x48] ss:$16 sps:$4 sm:$0xff]  }
 0x323   : > { %1979 = vmatprep.subr.bf16.mxu1 %v4428_v6 }
 0x3b8   : > { %v3372_v27 = vpop.f32.mrb[0].mxu1  ;;  %v3416_v29 = vpop.f32.mrb[36].mxu0 }
 0x3b9   : > { %v3373_v34 = vpop.f32.mrb[1].mxu1  ;;  %v3417_v4 = vpop.f32.mrb[37].mxu0 }
 0x3ba   : > { %v3374_v10 = vadd.f32 %v3373_v34, %v3372_v27  ;;  %v3418_v2 = vadd.f32 %v3417_v4, %v3416_v29  ;;  %v3375_v28 = vpop.f32.mrb[2].mxu1  ;;  %v3419_v31 = vpop.f32.mrb[38].mxu0  ;;  %v4469_v27 = vld [vmem:[#allocation13 + $0x6c] ss:$16 sps:$4 sm:$0xff]   ;;  %v4473_v29 = vld [vmem:[#allocation13 + $0x60] ss:$16 sps:$4 sm:$0xff]  }
 0x3bb   : > { %v3376_v32 = vpop.f32.mrb[3].mxu1  ;;  %v3420_v36 = vpop.f32.mrb[39].mxu0  ;;  %v4475_v34 = vld [vmem:[#allocation13 + $0x68] ss:$16 sps:$4 sm:$0xff]   ;;  %v4479_v4 = vld [vmem:[#allocation13 + $0x84] ss:$16 sps:$4 sm:$0xff]  }
 0x3bc   : > { %v4487_v28 = vld [vmem:[#allocation13 + $0x88] ss:$16 sps:$4 sm:$0xff]   ;;  %v4491_v31 = vld [vmem:[#allocation13 + $0xa4] ss:$16 sps:$4 sm:$0xff]   ;;  %v4493_v32 = vld [vmem:[#allocation13 + $0xac] ss:$16 sps:$4 sm:$0xff]  }
 0x3bd   : > { %v4497_v36 = vld [vmem:[#allocation13 + $0xa0] ss:$16 sps:$4 sm:$0xff]  }
 0x3d8   : > { %v3394_v54 = vpop.f32.mrb[4].mxu1 }
 0x3d9   : > { %v3395_v49 = vpop.f32.mrb[5].mxu1 }
 0x3da   : > { %v3396_v50 = vadd.f32 %v3395_v49, %v3394_v54  ;;  %v3397_v63 = vpop.f32.mrb[6].mxu1  ;;  %v4499_v54 = vld [vmem:[#allocation13 + $0xa8] ss:$16 sps:$4 sm:$0xff]   ;;  %v4503_v49 = vld [vmem:[#allocation13 + $0xc4] ss:$16 sps:$4 sm:$0xff]  }
 0x3db   : > { %v3398_v60 = vpop.f32.mrb[7].mxu1  ;;  %v4509_v63 = vld [vmem:[#allocation13 + $0xc0] ss:$16 sps:$4 sm:$0xff]  }
 0x3dc   : > { %v1428_v9 = vadd.f32 %v3396_v50, %v3374_v10  ;;  %v4481_v10 = vld [vmem:[#allocation13 + $0x8c] ss:$16 sps:$4 sm:$0xff]   ;;  %v4511_v60 = vld [vmem:[#allocation13 + $0xc8] ss:$16 sps:$4 sm:$0xff]  }
 0x3dd   : > { %v4505_v50 = vld [vmem:[#allocation13 + $0xcc] ss:$16 sps:$4 sm:$0xff]  }
 0x3de   : > { %v1468_v42 = vadd.f32 %v3418_v2, %v1428_v9  ;;  %v4485_v2 = vld [vmem:[#allocation13 + $0x80] ss:$16 sps:$4 sm:$0xff]   ;;  %v4515_v9 = vld [vmem:[#allocation13 + $0xe4] ss:$16 sps:$4 sm:$0xff]  }
 0x3e0   : > { %v1480_v51 = vadd.f32 %v3214_v46, %v1468_v42  ;;  %v4517_v46 = vld [vmem:[#allocation13 + $0xec] ss:$16 sps:$4 sm:$0xff]   ;;  %v4521_v42 = vld [vmem:[#allocation13 + $0xe0] ss:$16 sps:$4 sm:$0xff]  }
 0x3e2   : > { %v1481_v8 = vmax.f32 %v1480_v51, 0.0  ;;  %v4523_v51 = vld [vmem:[#allocation13 + $0xe8] ss:$16 sps:$4 sm:$0xff]  }
 0x3e4   : > { %v1482_v53 = vpack.c.bf16 %v1481_v8, %v1481_v8 }
 0x3e6   : > { %v1540_v44 = vshll.u32 %v1482_v53, 16  ;;  %v1538_v55 = vshrl.u32 %v1482_v53, 16 }
 0x3e8   : > { %v1542_v56 = vrot.slane %v1540_v44, 1 }
 0x3ea   : > { %v1543_v45 = vor.u32 %v1542_v56, %v1538_v55 }
 0x3ec   : > { %1738 = vmatmul.mubr.bf16.vlgmr.msra.gmra.mrb[8].mxu1 %v1543_v45  ;;  %1779 = vmatmul.mubr.bf16.vlgmr.msra.gmra.mrb[40].mxu0 %v1543_v45 }
 0x3ed   : > { %1980 = vmatpush1.bf16.msra.mxu1 %v4437_v57  ;;  %2021 = vmatpush1.bf16.msra.mxu0 %v4439_v58 }
 0x3ee   : > { %1981 = vmatprep.subr.bf16.mxu1 %v4441_v59  ;;  %2022 = vmatprep.subr.bf16.mxu0 %v4443_v5 }
 0x3ef   : > { %2011 = vmatprep.mubr.bf16.mxu1 %v4734_v38  ;;  %2052 = vmatprep.mubr.bf16.mxu0 %v4734_v38 }
 0x3f1   : > { %1982 = vmatpush1.bf16.msra.mxu1 %v4447_v30  ;;  %2023 = vmatpush1.bf16.msra.mxu0 %v4449_v33 }
 0x3f2   : > { %1983 = vmatprep.subr.bf16.mxu1 %v4453_v40  ;;  %2024 = vmatprep.subr.bf16.mxu0 %v4455_v61 }
 0x3f5   : > { %1984 = vmatpush1.bf16.msra.mxu1 %v4461_v47  ;;  %2025 = vmatpush1.bf16.msra.mxu0 %v4463_v1 }
 0x3f6   : > { %1985 = vmatprep.subr.bf16.mxu1 %v4467_v7  ;;  %2026 = vmatprep.subr.bf16.mxu0 %v4469_v27 }
 0x3f9   : > { %1986 = vmatpush1.bf16.msra.mxu1 %v4473_v29  ;;  %2027 = vmatpush1.bf16.msra.mxu0 %v4475_v34 }
 0x3fa   : > { %1987 = vmatprep.subr.bf16.mxu1 %v4479_v4  ;;  %2028 = vmatprep.subr.bf16.mxu0 %v4481_v10 }
 0x3fd   : > { %1988 = vmatpush1.bf16.msra.mxu1 %v4485_v2  ;;  %2029 = vmatpush1.bf16.msra.mxu0 %v4487_v28 }
 0x3fe   : > { %1989 = vmatprep.subr.bf16.mxu1 %v4491_v31  ;;  %2030 = vmatprep.subr.bf16.mxu0 %v4493_v32 }
 0x401   : > { %1990 = vmatpush1.bf16.msra.mxu1 %v4497_v36  ;;  %2031 = vmatpush1.bf16.msra.mxu0 %v4499_v54 }
 0x402   : > { %1991 = vmatprep.subr.bf16.mxu1 %v4503_v49  ;;  %2032 = vmatprep.subr.bf16.mxu0 %v4505_v50 }
 0x405   : > { %1992 = vmatpush1.bf16.msra.mxu1 %v4509_v63  ;;  %2033 = vmatpush1.bf16.msra.mxu0 %v4511_v60 }
 0x406   : > { %1993 = vmatprep.subr.bf16.mxu1 %v4515_v9  ;;  %2034 = vmatprep.subr.bf16.mxu0 %v4517_v46 }
 0x409   : > { %1994 = vmatpush1.bf16.msra.mxu1 %v4521_v42  ;;  %2035 = vmatpush1.bf16.msra.mxu0 %v4523_v51 }
 0x40a   : > { %2090 = vmatprep.subr.bf16.mxu1 %v4428_v6  ;;  %2131 = vmatprep.subr.bf16.mxu0 %v4430_v62 }
 0x40c   : > { %2012 = vmatmul.mubr.bf16.vlgmr.msra.gmra.mrb[12].mxu1 %v4734_v38  ;;  %2053 = vmatmul.mubr.bf16.vlgmr.msra.gmra.mrb[44].mxu0 %v4734_v38 }
 0x40d   : > { %2091 = vmatpush1.bf16.msra.mxu1 %v4437_v57  ;;  %2132 = vmatpush1.bf16.msra.mxu0 %v4439_v58 }
 0x40e   : > { %2092 = vmatprep.subr.bf16.mxu1 %v4441_v59  ;;  %2133 = vmatprep.subr.bf16.mxu0 %v4443_v5 }
 0x40f   : > { %2122 = vmatprep.mubr.bf16.mxu1 %v4734_v38  ;;  %2163 = vmatprep.mubr.bf16.mxu0 %v4734_v38 }
 0x411   : > { %2093 = vmatpush1.bf16.msra.mxu1 %v4447_v30  ;;  %2134 = vmatpush1.bf16.msra.mxu0 %v4449_v33 }
 0x412   : > { %2094 = vmatprep.subr.bf16.mxu1 %v4453_v40  ;;  %2135 = vmatprep.subr.bf16.mxu0 %v4455_v61 }
 0x415   : > { %2095 = vmatpush1.bf16.msra.mxu1 %v4461_v47  ;;  %2136 = vmatpush1.bf16.msra.mxu0 %v4463_v1 }
 0x416   : > { %2096 = vmatprep.subr.bf16.mxu1 %v4467_v7  ;;  %2137 = vmatprep.subr.bf16.mxu0 %v4469_v27 }
 0x419   : > { %2097 = vmatpush1.bf16.msra.mxu1 %v4473_v29  ;;  %2138 = vmatpush1.bf16.msra.mxu0 %v4475_v34 }
 0x41a   : > { %2098 = vmatprep.subr.bf16.mxu1 %v4479_v4  ;;  %2139 = vmatprep.subr.bf16.mxu0 %v4481_v10 }
 0x41d   : > { %2099 = vmatpush1.bf16.msra.mxu1 %v4485_v2  ;;  %2140 = vmatpush1.bf16.msra.mxu0 %v4487_v28 }
 0x41e   : > { %2100 = vmatprep.subr.bf16.mxu1 %v4491_v31  ;;  %2141 = vmatprep.subr.bf16.mxu0 %v4493_v32 }
 0x421   : > { %2101 = vmatpush1.bf16.msra.mxu1 %v4497_v36  ;;  %2142 = vmatpush1.bf16.msra.mxu0 %v4499_v54 }
 0x422   : > { %2102 = vmatprep.subr.bf16.mxu1 %v4503_v49  ;;  %2143 = vmatprep.subr.bf16.mxu0 %v4505_v50 }
 0x425   : > { %2103 = vmatpush1.bf16.msra.mxu1 %v4509_v63  ;;  %2144 = vmatpush1.bf16.msra.mxu0 %v4511_v60 }
 0x426   : > { %2104 = vmatprep.subr.bf16.mxu1 %v4515_v9  ;;  %2145 = vmatprep.subr.bf16.mxu0 %v4517_v46 }
 0x429   : > { %2105 = vmatpush1.bf16.msra.mxu1 %v4521_v42  ;;  %2146 = vmatpush1.bf16.msra.mxu0 %v4523_v51 }
 0x42a   : > { %2220 = vmatprep.subr.bf16.mxu1 %v4428_v6  ;;  %2261 = vmatprep.subr.bf16.mxu0 %v4430_v62  ;;  %v4744_v6 = vsub.s32 3, %v4139_v3 }
 0x4bf   : > { %v1739_v8 = vpop.f32.mrb[8].mxu1  ;;  %v1780_v53 = vpop.f32.mrb[40].mxu0 }
 0x4c0   : > { %v1741_v44 = vpop.f32.mrb[9].mxu1  ;;  %v1782_v55 = vpop.f32.mrb[41].mxu0  ;;  %v4573_v14 = vadd.f32 %v1739_v8, %v1520_v12 }
 0x4c1   : > { %v1743_v56 = vpop.f32.mrb[10].mxu1  ;;  %v1784_v45 = vpop.f32.mrb[42].mxu0  ;;  %v4575_v62 = vadd.f32 %v1741_v44, %v1524_v13 }
 0x4c2   : > { %v1744_v0 = vpop.f32.mrb[11].mxu1  ;;  %v1785_v38 = vpop.f32.mrb[43].mxu0  ;;  %v1532_v45 = vrot.slane %v1515_v11, %v4744_v6 }
 0x4c4   : > { %v4582_v44 = vadd.f32 %v1782_v55, %v1532_v45 }
 0x4df   : > { %v2013_v15 = vpop.f32.mrb[12].mxu1  ;;  %v2054_v16 = vpop.f32.mrb[44].mxu0 }
 0x4e0   : > { %v2061_v56 = vadd.f32 %v2013_v15, %v4573_v14  ;;  %v2015_v0 = vpop.f32.mrb[13].mxu1  ;;  %v2056_v38 = vpop.f32.mrb[45].mxu0  ;;  %v1528_v15 = vrot.slane %v1515_v11, %v1527_v25 }
 0x4e1   : > { %v2062_v18 = vadd.f32 %v2015_v0, %v4575_v62  ;;  %v2017_v19 = vpop.f32.mrb[14].mxu1  ;;  %v2058_v26 = vpop.f32.mrb[46].mxu0  ;;  %v2064_v24 = vadd.f32 %v2056_v38, %v4582_v44 }
 0x4e2   : > { %v3279_v20 = vmul.f32 -1.442695, %v2061_v56  ;;  %v2018_v12 = vpop.f32.mrb[15].mxu1  ;;  %v2059_v8 = vpop.f32.mrb[47].mxu0  ;;  %v4587_v6 = vadd.f32 %v1780_v53, %v1528_v15 }
 0x4e3   : > { %v3280_v13 = vmul.f32 -1.442695, %v2062_v18  ;;  %v3281_v0 = vmul.f32 -1.442695, %v2064_v24 }
 0x4e4   : > { %3733 = vpow2.f32 %v3279_v20  ;;  %v2063_v19 = vadd.f32 %v2054_v16, %v4587_v6 }
 0x4e5   : > { %3735 = vpow2.f32 %v3280_v13 }
 0x4e6   : > { %3737 = vpow2.f32 %v3281_v0 }
 0x4e7   : > { %3739 = vtanh.f32 %v2063_v19 }
 0x4ee   : > { %v3734_v26 = vpop.eup %3733 }
 0x4ef   : > { %v3736_v22 = vpop.eup %3735  ;;  %v2068_v56 = vadd.f32 1.0, %v3734_v26 }
 0x4f0   : > { %v2074_v18 = vadd.f32 1.0, %v3736_v22  ;;  %v3738_v20 = vpop.eup %3737  ;;  %v4771_v22 = vmov 0  }
 0x4f1   : > { %3741 = vrcp.f32 %v2068_v56  ;;  %v3740_v55 = vpop.eup %3739  ;;  %v2081_v8 = vadd.f32 1.0, %v3738_v20 }
 0x4f2   : > { %3743 = vrcp.f32 %v2074_v18 }
 0x4f3   : > { %3745 = vrcp.f32 %v2081_v8  ;;  %v3652_v8 = vld [vmem:[#allocation14 + $0xc] ss:$16 sps:$4 sm:$0xff]  }
 0x4fb   : > { %v3742_v45 = vpop.eup %3741 }
 0x4fc   : > { %v3744_v12 = vpop.eup %3743  ;;  %v2085_v11 = vmul.f32 %v3742_v45, %v3740_v55  ;;  %v3647_v45 = vld [vmem:[#allocation14] ss:$16 sps:$4 sm:$0xff]  }
 0x4fd   : > { %v2084_v38 = vmul.f32 0.0, %v3744_v12  ;;  %v3746_v16 = vpop.eup %3745  ;;  %v3649_v12 = vld [vmem:[#allocation14 + $0x4] ss:$16 sps:$4 sm:$0xff]  }
 0x4ff   : > { %v4590_v53 = vadd.f32 %v2085_v11, %v2084_v38  ;;  %v3650_v11 = vld [vmem:[#allocation14 + $0x8] ss:$16 sps:$4 sm:$0xff]   ;;  %v3655_v38 = vld [vmem:[#allocation14 + $0x24] ss:$16 sps:$4 sm:$0xff]  }
 0x501   : > { %3747 = vtanh.f32 %v4590_v53 }
 0x50b   : > { %v3748_v24 = vpop.eup %3747 }
 0x50c   : > { %v2088_v13 = vmul.f32 %v3748_v24, %v3746_v16  ;;  %v3653_v16 = vld [vmem:[#allocation14 + $0x20] ss:$16 sps:$4 sm:$0xff]   ;;  %v3656_v24 = vld [vmem:[#allocation14 + $0x28] ss:$16 sps:$4 sm:$0xff]  }
 0x50e   : > { %v2089_v15 = vpack.c.bf16 %v2088_v13, %v2088_v13  ;;  %v3661_v13 = vld [vmem:[#allocation14 + $0x44] ss:$16 sps:$4 sm:$0xff]  }
 0x510   : > { %2123 = vmatmul.mubr.bf16.vlgmr.msra.gmra.mrb[16].mxu1 %v2089_v15  ;;  %2164 = vmatmul.mubr.bf16.vlgmr.msra.gmra.mrb[48].mxu0 %v2089_v15  ;;  %v3664_v15 = vld [vmem:[#allocation14 + $0x4c] ss:$16 sps:$4 sm:$0xff]  }
 0x511   : > { %2221 = vmatpush1.bf16.msra.mxu1 %v4437_v57  ;;  %2262 = vmatpush1.bf16.msra.mxu0 %v4439_v58 }
 0x512   : > { %2222 = vmatprep.subr.bf16.mxu1 %v4441_v59  ;;  %2263 = vmatprep.subr.bf16.mxu0 %v4443_v5 }
 0x513   : > { %2252 = vmatprep.mubr.bf16.mxu1 %v4771_v22  ;;  %2293 = vmatprep.mubr.bf16.mxu0 %v4771_v22 }
 0x515   : > { %2223 = vmatpush1.bf16.msra.mxu1 %v4447_v30  ;;  %2264 = vmatpush1.bf16.msra.mxu0 %v4449_v33 }
 0x516   : > { %2224 = vmatprep.subr.bf16.mxu1 %v4453_v40  ;;  %2265 = vmatprep.subr.bf16.mxu0 %v4455_v61 }
 0x519   : > { %2225 = vmatpush1.bf16.msra.mxu1 %v4461_v47  ;;  %2266 = vmatpush1.bf16.msra.mxu0 %v4463_v1 }
 0x51a   : > { %2226 = vmatprep.subr.bf16.mxu1 %v4467_v7  ;;  %2267 = vmatprep.subr.bf16.mxu0 %v4469_v27 }
 0x51d   : > { %2227 = vmatpush1.bf16.msra.mxu1 %v4473_v29  ;;  %2268 = vmatpush1.bf16.msra.mxu0 %v4475_v34 }
 0x51e   : > { %2228 = vmatprep.subr.bf16.mxu1 %v4479_v4  ;;  %2269 = vmatprep.subr.bf16.mxu0 %v4481_v10 }
 0x521   : > { %2229 = vmatpush1.bf16.msra.mxu1 %v4485_v2  ;;  %2270 = vmatpush1.bf16.msra.mxu0 %v4487_v28 }
 0x522   : > { %2230 = vmatprep.subr.bf16.mxu1 %v4491_v31  ;;  %2271 = vmatprep.subr.bf16.mxu0 %v4493_v32 }
 0x525   : > { %2231 = vmatpush1.bf16.msra.mxu1 %v4497_v36  ;;  %2272 = vmatpush1.bf16.msra.mxu0 %v4499_v54 }
 0x526   : > { %2232 = vmatprep.subr.bf16.mxu1 %v4503_v49  ;;  %2273 = vmatprep.subr.bf16.mxu0 %v4505_v50 }
 0x529   : > { %2233 = vmatpush1.bf16.msra.mxu1 %v4509_v63  ;;  %2274 = vmatpush1.bf16.msra.mxu0 %v4511_v60 }
 0x52a   : > { %2234 = vmatprep.subr.bf16.mxu1 %v4515_v9  ;;  %2275 = vmatprep.subr.bf16.mxu0 %v4517_v46  ;;  %v2208_v9 = vrot.slane %v4590_v53, 7  ;;  %v3658_v53 = vld [vmem:[#allocation14 + $0x2c] ss:$16 sps:$4 sm:$0xff]  }
 0x52d   : > { %2235 = vmatpush1.bf16.msra.mxu1 %v4521_v42  ;;  %2276 = vmatpush1.bf16.msra.mxu0 %v4523_v51 }
 0x52e   : > { %2563 = vmatprep.subr.bf16.mxu1 %v3649_v12  ;;  %2604 = vmatprep.subr.bf16.mxu0 %v3652_v8 }
 0x5e3   : > { %v2124_v57 = vpop.f32.mrb[16].mxu1  ;;  %v2165_v58 = vpop.f32.mrb[48].mxu0 }
 0x5e4   : > { %v2176_v59 = vrot.slane %v2124_v57, 7  ;;  %v2126_v5 = vpop.f32.mrb[17].mxu1  ;;  %v2167_v30 = vpop.f32.mrb[49].mxu0  ;;  %v2178_v2 = vrot.slane %v2165_v58, 7  ;;  %v3659_v57 = vld [vmem:[#allocation14 + $0x40] ss:$16 sps:$4 sm:$0xff]  }
 0x5e5   : > { %v2177_v33 = vrot.slane %v2126_v5, 7  ;;  %v2128_v40 = vpop.f32.mrb[18].mxu1  ;;  %v2169_v61 = vpop.f32.mrb[50].mxu0  ;;  %v2179_v4 = vrot.slane %v2167_v30, 7  ;;  %v3667_v58 = vld [vmem:[#allocation14 + $0x64] ss:$16 sps:$4 sm:$0xff]  }
 0x5e6   : > { %v2184_v47 = vadd.f32 %v2176_v59, %v4573_v14  ;;  %v2129_v1 = vpop.f32.mrb[19].mxu1  ;;  %v2170_v7 = vpop.f32.mrb[51].mxu0  ;;  %v2186_v31 = vadd.f32 %v2178_v2, %v4587_v6  ;;  %v3670_v59 = vld [vmem:[#allocation14 + $0x6c] ss:$16 sps:$4 sm:$0xff]   ;;  %v3665_v5 = vld [vmem:[#allocation14 + $0x60] ss:$16 sps:$4 sm:$0xff]  }
 0x5e7   : > { %v2185_v27 = vadd.f32 %v2177_v33, %v4575_v62  ;;  %v2187_v10 = vadd.f32 %v2179_v4, %v4582_v44  ;;  %v3668_v30 = vld [vmem:[#allocation14 + $0x68] ss:$16 sps:$4 sm:$0xff]   ;;  %v3673_v33 = vld [vmem:[#allocation14 + $0x84] ss:$16 sps:$4 sm:$0xff]   ;;  %v3676_v40 = vld [vmem:[#allocation14 + $0x8c] ss:$16 sps:$4 sm:$0xff]  }
 0x5e8   : > { %v3282_v29 = vmul.f32 -1.442695, %v2184_v47  ;;  %v3671_v61 = vld [vmem:[#allocation14 + $0x80] ss:$16 sps:$4 sm:$0xff]   ;;  %v3674_v47 = vld [vmem:[#allocation14 + $0x88] ss:$16 sps:$4 sm:$0xff]  }
 0x5e9   : > { %v3283_v34 = vmul.f32 -1.442695, %v2185_v27  ;;  %v3284_v28 = vmul.f32 -1.442695, %v2187_v10  ;;  %v3679_v1 = vld [vmem:[#allocation14 + $0xa4] ss:$16 sps:$4 sm:$0xff]  }
 0x5ea   : > { %3749 = vpow2.f32 %v3282_v29  ;;  %v3682_v7 = vld [vmem:[#allocation14 + $0xac] ss:$16 sps:$4 sm:$0xff]   ;;  %v3677_v27 = vld [vmem:[#allocation14 + $0xa0] ss:$16 sps:$4 sm:$0xff]   ;;  %v3680_v29 = vld [vmem:[#allocation14 + $0xa8] ss:$16 sps:$4 sm:$0xff]  }
 0x5eb   : > { %3751 = vpow2.f32 %v3283_v34  ;;  %v3685_v34 = vld [vmem:[#allocation14 + $0xc4] ss:$16 sps:$4 sm:$0xff]   ;;  %v3688_v4 = vld [vmem:[#allocation14 + $0xcc] ss:$16 sps:$4 sm:$0xff]   ;;  %v3683_v10 = vld [vmem:[#allocation14 + $0xc0] ss:$16 sps:$4 sm:$0xff]  }
 0x5ec   : > { %3753 = vpow2.f32 %v3284_v28  ;;  %v3686_v2 = vld [vmem:[#allocation14 + $0xc8] ss:$16 sps:$4 sm:$0xff]   ;;  %v3691_v28 = vld [vmem:[#allocation14 + $0xe4] ss:$16 sps:$4 sm:$0xff]  }
 0x5ed   : > { %3755 = vtanh.f32 %v2186_v31  ;;  %v3694_v31 = vld [vmem:[#allocation14 + $0xec] ss:$16 sps:$4 sm:$0xff]  }
 0x5f4   : > { %v3750_v32 = vpop.eup %3749 }
 0x5f5   : > { %v3752_v36 = vpop.eup %3751  ;;  %v2191_v54 = vadd.f32 1.0, %v3750_v32  ;;  %v3689_v32 = vld [vmem:[#allocation14 + $0xe0] ss:$16 sps:$4 sm:$0xff]  }
 0x5f6   : > { %v2197_v49 = vadd.f32 1.0, %v3752_v36  ;;  %v3754_v50 = vpop.eup %3753  ;;  %v3692_v36 = vld [vmem:[#allocation14 + $0xe8] ss:$16 sps:$4 sm:$0xff]  }
 0x5f7   : > { %3757 = vrcp.f32 %v2191_v54  ;;  %v3756_v63 = vpop.eup %3755  ;;  %v2204_v51 = vadd.f32 1.0, %v3754_v50  ;;  %v3695_v54 = vld [vmem:[#allocation16 + $0x40] sm:$0xff]  }
 0x5f8   : > { %3759 = vrcp.f32 %v2197_v49  ;;  %v3696_v49 = vld [vmem:[#allocation16 + $0xc0] sm:$0xff]  }
 0x5f9   : > { %3761 = vrcp.f32 %v2204_v51 }
 0x601   : > { %v3758_v60 = vpop.eup %3757 }
 0x602   : > { %v3760_v46 = vpop.eup %3759  ;;  %v2211_v42 = vmul.f32 %v3758_v60, %v3756_v63 }
 0x603   : > { %v2210_v0 = vmul.f32 %v3760_v46, %v2208_v9  ;;  %v3762_v26 = vpop.eup %3761 }
 0x605   : > { %v4630_v19 = vadd.f32 %v2211_v42, %v2210_v0 }
 0x607   : > { %3763 = vtanh.f32 %v4630_v19 }
 0x611   : > { %v3764_v56 = vpop.eup %3763 }
 0x612   : > { %v2214_v18 = vmul.f32 %v3764_v56, %v3762_v26 }
 0x614   : > { %v2215_v20 = vpack.c.bf16 %v2214_v18, %v2214_v18 }
 0x616   : > { %v2217_v55 = vshrl.u32 %v2215_v20, 16 }
 0x618   : > { %2253 = vmatmul.mubr.bf16.vlgmr.msra.gmra.mrb[20].mxu1 %v2217_v55  ;;  %2294 = vmatmul.mubr.bf16.vlgmr.msra.gmra.mrb[52].mxu0 %v2217_v55 }
 0x619   : > { %2595 = vmatprep.mubr.bf16.mxu1 %v4771_v22  ;;  %2636 = vmatprep.mubr.bf16.mxu0 %v4771_v22  ;;  %v3662_v22 = vld [vmem:[#allocation14 + $0x48] ss:$16 sps:$4 sm:$0xff]  }
 0x61a   : > { %2564 = vmatpush1.bf16.msra.mxu1 %v3647_v45  ;;  %2605 = vmatpush1.bf16.msra.mxu0 %v3650_v11 }
 0x61b   : > { %2565 = vmatprep.subr.bf16.mxu1 %v3655_v38  ;;  %2606 = vmatprep.subr.bf16.mxu0 %v3658_v53 }
 0x61e   : > { %2566 = vmatpush1.bf16.msra.mxu1 %v3653_v16  ;;  %2607 = vmatpush1.bf16.msra.mxu0 %v3656_v24 }
 0x61f   : > { %2567 = vmatprep.subr.bf16.mxu1 %v3661_v13  ;;  %2608 = vmatprep.subr.bf16.mxu0 %v3664_v15 }
 0x622   : > { %2568 = vmatpush1.bf16.msra.mxu1 %v3659_v57  ;;  %2609 = vmatpush1.bf16.msra.mxu0 %v3662_v22  ;;  %v2338_v22 = vrot.slane %v4630_v19, 7  ;;  %v3701_v19 = vld [vmem:[#allocation16 + $0x8] sm:$0xff]  }
 0x623   : > { %2569 = vmatprep.subr.bf16.mxu1 %v3667_v58  ;;  %2610 = vmatprep.subr.bf16.mxu0 %v3670_v59 }
 0x626   : > { %2570 = vmatpush1.bf16.msra.mxu1 %v3665_v5  ;;  %2611 = vmatpush1.bf16.msra.mxu0 %v3668_v30 }
 0x627   : > { %2571 = vmatprep.subr.bf16.mxu1 %v3673_v33  ;;  %2612 = vmatprep.subr.bf16.mxu0 %v3676_v40 }
 0x62a   : > { %2572 = vmatpush1.bf16.msra.mxu1 %v3671_v61  ;;  %2613 = vmatpush1.bf16.msra.mxu0 %v3674_v47  ;;  %v3697_v47 = vld [vmem:[#allocation16] sm:$0xff]  }
 0x62b   : > { %2573 = vmatprep.subr.bf16.mxu1 %v3679_v1  ;;  %2614 = vmatprep.subr.bf16.mxu0 %v3682_v7  ;;  %v3698_v1 = vld [vmem:[#allocation16 + $0x80] sm:$0xff]  }
 0x62e   : > { %2574 = vmatpush1.bf16.msra.mxu1 %v3677_v27  ;;  %2615 = vmatpush1.bf16.msra.mxu0 %v3680_v29  ;;  %v3699_v27 = vld [vmem:[#allocation16 + $0x48] sm:$0xff]  }
 0x62f   : > { %2575 = vmatprep.subr.bf16.mxu1 %v3685_v34  ;;  %2616 = vmatprep.subr.bf16.mxu0 %v3688_v4  ;;  %v3700_v29 = vld [vmem:[#allocation16 + $0xc8] sm:$0xff]   ;;  %v3703_v4 = vld [vmem:[#allocation16 + $0x50] sm:$0xff]  }
 0x630   : > { %v3702_v34 = vld [vmem:[#allocation16 + $0x88] sm:$0xff]  }
 0x632   : > { %2576 = vmatpush1.bf16.msra.mxu1 %v3683_v10  ;;  %2617 = vmatpush1.bf16.msra.mxu0 %v3686_v2  ;;  %v3704_v10 = vld [vmem:[#allocation16 + $0xd0] sm:$0xff]  }
 0x633   : > { %2577 = vmatprep.subr.bf16.mxu1 %v3691_v28  ;;  %2618 = vmatprep.subr.bf16.mxu0 %v3694_v31  ;;  %v3705_v2 = vld [vmem:[#allocation16 + $0x10] sm:$0xff]   ;;  %v3707_v31 = vld [vmem:[#allocation16 + $0x58] sm:$0xff]  }
 0x634   : > { %v3706_v28 = vld [vmem:[#allocation16 + $0x90] sm:$0xff]  }
 0x636   : > { %2578 = vmatpush1.bf16.msra.mxu1 %v3689_v32  ;;  %2619 = vmatpush1.bf16.msra.mxu0 %v3692_v36  ;;  %v3708_v32 = vld [vmem:[#allocation16 + $0xd8] sm:$0xff]  }
 0x637   : > { %3422 = vmatprep.subr.bf16.mxu1 %v3695_v54  ;;  %3444 = vmatprep.subr.bf16.mxu0 %v3696_v49  ;;  %v3709_v36 = vld [vmem:[#allocation16 + $0x18] sm:$0xff]   ;;  %v3711_v49 = vld [vmem:[#allocation16 + $0x60] sm:$0xff]  }
 0x638   : > { %v3710_v54 = vld [vmem:[#allocation16 + $0x98] sm:$0xff]  }
 0x6eb   : > { %v2254_v50 = vpop.f32.mrb[20].mxu1  ;;  %v2295_v63 = vpop.f32.mrb[52].mxu0 }
 0x6ec   : > { %v2306_v60 = vrot.slane %v2254_v50, 6  ;;  %v2256_v9 = vpop.f32.mrb[21].mxu1  ;;  %v2297_v46 = vpop.f32.mrb[53].mxu0  ;;  %v2308_v8 = vrot.slane %v2295_v63, 6  ;;  %v3712_v50 = vld [vmem:[#allocation16 + $0xe0] sm:$0xff]  }
 0x6ed   : > { %v2307_v42 = vrot.slane %v2256_v9, 6  ;;  %v2258_v51 = vpop.f32.mrb[22].mxu1  ;;  %v2299_v0 = vpop.f32.mrb[54].mxu0  ;;  %v2309_v12 = vrot.slane %v2297_v46, 6  ;;  %v3713_v63 = vld [vmem:[#allocation16 + $0x20] sm:$0xff]   ;;  %v3715_v9 = vld [vmem:[#allocation16 + $0x68] sm:$0xff]  }
 0x6ee   : > { %v2314_v26 = vadd.f32 %v2306_v60, %v4573_v14  ;;  %v2259_v56 = vpop.f32.mrb[23].mxu1  ;;  %v2300_v18 = vpop.f32.mrb[55].mxu0  ;;  %v2316_v53 = vadd.f32 %v2308_v8, %v4587_v6  ;;  %v3714_v60 = vld [vmem:[#allocation16 + $0xa0] sm:$0xff]   ;;  %v3716_v46 = vld [vmem:[#allocation16 + $0xe8] sm:$0xff]   ;;  %v3719_v0 = vld [vmem:[#allocation16 + $0x70] sm:$0xff]  }
 0x6ef   : > { %v2315_v20 = vadd.f32 %v2307_v42, %v4575_v62  ;;  %v2317_v11 = vadd.f32 %v2309_v12, %v4582_v44  ;;  %v3717_v42 = vld [vmem:[#allocation16 + $0x28] sm:$0xff]   ;;  %v3721_v56 = vld [vmem:[#allocation16 + $0x30] sm:$0xff]   ;;  %v3726_v12 = vld [vmem:[#allocation16 + $0xb8] sm:$0xff]  }
 0x6f0   : > { %v3285_v55 = vmul.f32 -1.442695, %v2314_v26  ;;  %v3718_v51 = vld [vmem:[#allocation16 + $0xa8] sm:$0xff]   ;;  %v3720_v26 = vld [vmem:[#allocation16 + $0xf0] sm:$0xff]  }
 0x6f1   : > { %v3286_v45 = vmul.f32 -1.442695, %v2315_v20  ;;  %v3287_v38 = vmul.f32 -1.442695, %v2317_v11  ;;  %v3722_v18 = vld [vmem:[#allocation16 + $0xb0] sm:$0xff]   ;;  %v3723_v20 = vld [vmem:[#allocation16 + $0x78] sm:$0xff]  }
 0x6f2   : > { %3765 = vpow2.f32 %v3285_v55  ;;  %v3724_v55 = vld [vmem:[#allocation16 + $0xf8] sm:$0xff]   ;;  %v2378_v11 = vld [vmem:[%s4729_s10] sm:$0xf] }
 0x6f3   : > { %3767 = vpow2.f32 %v3286_v45  ;;  %v3725_v45 = vld [vmem:[#allocation16 + $0x38] sm:$0xff]   ;;  %v2546_v8 = vrot.slane %v2378_v11, %v4212_v35 }
 0x6f4   : > { %3769 = vpow2.f32 %v3287_v38  ;;  %v2554_v38 = vrot.slane %v2378_v11, %v1527_v25 }
 0x6f5   : > { %3771 = vtanh.f32 %v2316_v53  ;;  %v2550_v53 = vrot.slane %v2378_v11, %v4222_v43 }
 0x6fc   : > { %v3766_v16 = vpop.eup %3765 }
 0x6fd   : > { %v3768_v24 = vpop.eup %3767  ;;  %v2321_v13 = vadd.f32 1.0, %v3766_v16  ;;  %v4772_v16 = vsub.s32 3, %v4139_v3 }
 0x6fe   : > { %v2327_v14 = vadd.f32 1.0, %v3768_v24  ;;  %v3770_v62 = vpop.eup %3769 }
 0x6ff   : > { %3773 = vrcp.f32 %v2321_v13  ;;  %v3772_v15 = vpop.eup %3771  ;;  %v2334_v44 = vadd.f32 1.0, %v3770_v62  ;;  %v2558_v24 = vrot.slane %v2378_v11, %v4772_v16  ;;  %v225_v16 = vpop.xlane.xlu0 %224 }
 0x700   : > { %3775 = vrcp.f32 %v2327_v14 }
 0x701   : > { %3777 = vrcp.f32 %v2334_v44 }
 0x709   : > { %v3774_v57 = vpop.eup %3773 }
 0x70a   : > { %v3776_v58 = vpop.eup %3775  ;;  %v2341_v59 = vmul.f32 %v3774_v57, %v3772_v15 }
 0x70b   : > { %v2340_v5 = vmul.f32 %v3776_v58, %v2338_v22  ;;  %v3778_v6 = vpop.eup %3777 }
 0x70d   : > { %v2342_v30 = vadd.f32 %v2341_v59, %v2340_v5 }
 0x70f   : > { %3779 = vtanh.f32 %v2342_v30 }
 0x719   : > { %v3780_v33 = vpop.eup %3779 }
 0x71a   : > { %v2344_v40 = vmul.f32 %v3780_v33, %v3778_v6 }
 0x71c   : > { %v2345_v61 = vpack.c.bf16 %v2344_v40, %v2344_v40 }
 0x71e   : > { %v2380_v7 = vrot.slane %v2345_v61, 1 }
 0x720   : > { %2596 = vmatmul.mubr.bf16.vlgmr.msra.gmra.mrb[24].mxu1 %v2380_v7  ;;  %2637 = vmatmul.mubr.bf16.vlgmr.msra.gmra.mrb[56].mxu0 %v2380_v7 }
 0x721   : > { %3423 = vmatpush3.bf16.msra.mxu1 %v3697_v47  ;;  %3445 = vmatpush3.bf16.msra.mxu0 %v3698_v1 }
 0x722   : > { %3424 = vmatprep.subr.bf16.mxu1 %v3699_v27  ;;  %3446 = vmatprep.subr.bf16.mxu0 %v3700_v29 }
 0x725   : > { %3425 = vmatpush3.bf16.msra.mxu1 %v3701_v19  ;;  %3447 = vmatpush3.bf16.msra.mxu0 %v3702_v34  ;;  %v2717_v19 = vld [vmem:[%s4731_s12] sm:$0x1] }
 0x726   : > { %3426 = vmatprep.subr.bf16.mxu1 %v3703_v4  ;;  %3448 = vmatprep.subr.bf16.mxu0 %v3704_v10 }
 0x729   : > { %3427 = vmatpush3.bf16.msra.mxu1 %v3705_v2  ;;  %3449 = vmatpush3.bf16.msra.mxu0 %v3706_v28 }
 0x72a   : > { %3428 = vmatprep.subr.bf16.mxu1 %v3707_v31  ;;  %3450 = vmatprep.subr.bf16.mxu0 %v3708_v32 }
 0x72d   : > { %3429 = vmatpush3.bf16.msra.mxu1 %v3709_v36  ;;  %3451 = vmatpush3.bf16.msra.mxu0 %v3710_v54 }
 0x72e   : > { %3430 = vmatprep.subr.bf16.mxu1 %v3711_v49  ;;  %3452 = vmatprep.subr.bf16.mxu0 %v3712_v50 }
 0x731   : > { %3431 = vmatpush3.bf16.msra.mxu1 %v3713_v63  ;;  %3453 = vmatpush3.bf16.msra.mxu0 %v3714_v60 }
 0x732   : > { %3432 = vmatprep.subr.bf16.mxu1 %v3715_v9  ;;  %3454 = vmatprep.subr.bf16.mxu0 %v3716_v46 }
 0x735   : > { %3433 = vmatpush3.bf16.msra.mxu1 %v3717_v42  ;;  %3455 = vmatpush3.bf16.msra.mxu0 %v3718_v51 }
 0x736   : > { %3434 = vmatprep.subr.bf16.mxu1 %v3719_v0  ;;  %3456 = vmatprep.subr.bf16.mxu0 %v3720_v26  ;;  %v226_v0 = vstv %s4132_s24  ;;  %v230_v26 = vstv %s4134_s11 }
 0x737   : > { %vm227_vm3 = vcmp.le.f32.partialorder %v4233_v52, %v226_v0  ;;  %vm231_vm5 = vcmp.le.f32.partialorder %v4228_v48, %v230_v26 }
 0x738   : > { %vm4662_vm6 = vmand %vm227_vm3, %vm228_vm4 }
 0x739   : > { %3435 = vmatpush3.bf16.msra.mxu1 %v3721_v56  ;;  %3457 = vmatpush3.bf16.msra.mxu0 %v3722_v18  ;;  %vm4666_vm7 = vmand %vm231_vm5, %vm228_vm4  ;;  %v4782_v56 = vld [vmem:[#allocation36_spill] sm:$0xff] }
 0x73a   : > { %3436 = vmatprep.subr.bf16.mxu1 %v3723_v20  ;;  %3458 = vmatprep.subr.bf16.mxu0 %v3724_v55  ;;  %v3006_v20 = vrot.slane %v4214_v37, 7  ;;  %vm233_vm8 = vmand %vm4662_vm6, %vm4666_vm7 }
 0x73d   : > { %3437 = vmatpush3.bf16.msra.mxu1 %v3725_v45  ;;  %3459 = vmatpush3.bf16.msra.mxu0 %v3726_v12 }
 0x7f3   : > { %v2597_v13 = vpop.f32.mrb[24].mxu1  ;;  %v2638_v14 = vpop.f32.mrb[56].mxu0 }
 0x7f4   : > { %v2598_v62 = vadd.f32 %v2597_v13, %v2546_v8  ;;  %v2639_v15 = vadd.f32 %v2638_v14, %v2554_v38  ;;  %v2599_v57 = vpop.f32.mrb[25].mxu1  ;;  %v2640_v22 = vpop.f32.mrb[57].mxu0  ;;  %v3013_v14 = vstv %s4130_s19 }
 0x7f5   : > { %v2600_v58 = vadd.f32 %v2599_v57, %v2550_v53  ;;  %v2641_v59 = vadd.f32 %v2640_v22, %v2558_v24  ;;  %v2601_v44 = vpop.f32.mrb[26].mxu1  ;;  %v2642_v5 = vpop.f32.mrb[58].mxu0  ;;  %v3977_v24 = vmov 0.0  }
 0x7f6   : > { %v2645_v30 = vmax.f32 %v2598_v62, 0.0  ;;  %v2647_v6 = vmax.f32 %v2639_v15, 0.0  ;;  %v2602_v33 = vpop.f32.mrb[27].mxu1  ;;  %v2643_v40 = vpop.f32.mrb[59].mxu0  ;;  %v234_v13 = vsel %vm233_vm8, 1.0, %v3977_v24  ;;  %v3038_v5 = vstv %s3035_s20 }
 0x7f7   : > { %v2646_v25 = vmax.f32 %v2600_v58, 0.0  ;;  %v2648_v61 = vmax.f32 %v2641_v59, 0.0  ;;  %v235_v57 = vmul.f32 %v234_v13, %v225_v16 }
 0x7f8   : > { %v2649_v1 = vpack.c.bf16 %v2645_v30, %v2645_v30  ;;  %v2651_v7 = vpack.c.bf16 %v2647_v6, %v2647_v6 }
 0x7f9   : > { %v2650_v43 = vpack.c.bf16 %v2646_v25, %v2646_v25  ;;  %v2652_v47 = vpack.c.bf16 %v2648_v61, %v2648_v61  ;;  %v3104_v18 = vmul.f32 %v235_v57, %v4782_v56 }
 0x7fb   : > { %2942 = vmatprep.mubr.bf16.mxu1 %v2650_v43  ;;  %2982 = vmatprep.mubr.bf16.mxu0 %v2652_v47 }
 0x7fc   : > { %2943 = vmatmul.mubr.bf16.vlgmr.msra.gmra.mrb[28].mxu1 %v2649_v1  ;;  %2983 = vmatmul.mubr.bf16.vlgmr.msra.gmra.mrb[60].mxu0 %v2651_v7  ;;  %v3052_v1 = vstv %s4144_s28 }
 0x8cf   : > { %v3438_v27 = vpop.f32.mrb[28].mxu1  ;;  %v3460_v29 = vpop.f32.mrb[60].mxu0 }
 0x8d0   : > { %v3439_v34 = vpop.f32.mrb[29].mxu1  ;;  %v3461_v4 = vpop.f32.mrb[61].mxu0 }
 0x8d1   : > { %v3440_v10 = vadd.f32 %v3439_v34, %v3438_v27  ;;  %v3462_v2 = vadd.f32 %v3461_v4, %v3460_v29  ;;  %v3441_v28 = vpop.f32.mrb[30].mxu1  ;;  %v3463_v31 = vpop.f32.mrb[62].mxu0  ;;  %v3054_v27 = vstv %s3044_s1 }
 0x8d2   : > { %v3442_v32 = vpop.f32.mrb[31].mxu1  ;;  %v3464_v36 = vpop.f32.mrb[63].mxu0 }
 0x8d3   : > { %v2945_v54 = vadd.f32 %v3440_v10, %v2717_v19  ;;  %v4779_v32 = vld [vmem:[#allocation34_spill] sm:$0xff] }
 0x8d5   : > { %v2985_v49 = vadd.f32 %v3462_v2, %v2945_v54  ;;  %v4780_v54 = vld [vmem:[#allocation32_spill] sm:$0xff] }
 0x8d7   : > { %v3352_v50 = vmul.f32 -1.442695, %v2985_v49 }
 0x8d9   : > { %3781 = vpow2.f32 %v3352_v50 }
 0x8e3   : > { %v3782_v63 = vpop.eup %3781 }
 0x8e4   : > { %v2993_v60 = vadd.f32 1.0, %v3782_v63  ;;  %v4781_v63 = vld [vmem:[#allocation35_spill] sm:$0xff] }
 0x8e6   : > { %3783 = vrcp.f32 %v2993_v60 }
 0x8f0   : > { %v3784_v9 = vpop.eup %3783 }
 0x8f1   : > { %v2996_v46 = vsel %vm4173_vm2, %v3784_v9, %v2985_v49 }
 0x8f2   : > { %v3000_v42 = vrot.slane %v2996_v46, %v4212_v35  ;;  %v3016_v35 = vrot.slane %v4217_v41, 7 }
 0x8f4   : > { %v3001_v51 = vmul.f32 %v3000_v42, %v4188_v21 }
 0x8f6   : > { %3002 = vadd.xlane.f32.xlu1 %v3001_v51 }
 0x983   : > { %v3003_v55 = vpop.xlane.xlu1 %3002 }
 0x984   : > { %v3018_v45 = vmul.f32 %v3016_v35, %v3003_v55  ;;  %v3008_v12 = vmul.f32 %v3006_v20, %v3003_v55  ;;  %v3015_v11 = vmul.f32 %v3003_v55, %v4214_v37  ;;  %v3004_v38 = vmul.f32 %v3003_v55, %v4217_v41 }
 0x985   : > { %v3029_v59 = vrot.slane %v3003_v55, 2  ;;  %v3040_v41 = vstv %s3037_s6  ;;  %v3089_v10 = vmul.f32 %v3003_v55, %v4192_v23  ;;  %v3094_v36 = vmul.f32 %v3003_v55, %v4779_v32 }
 0x986   : > { %v3020_v8 = vrot.slane %v3018_v45, 1  ;;  %v3010_v53 = vrot.slane %v3008_v12, 1  ;;  %v3099_v60 = vmul.f32 %v3003_v55, %v4781_v63 }
 0x987   : > { %v3031_v33 = vmul.f32 %v3029_v59, %v235_v57  ;;  %v3091_v50 = vrot.slane %v3089_v10, 3  ;;  %v3096_v42 = vrot.slane %v3094_v36, 4 }
 0x988   : > { %v3022_v62 = vadd.f32 %v3020_v8, %v3015_v11  ;;  %v3012_v15 = vsub.f32 %v3004_v38, %v3010_v53  ;;  %v3101_v0 = vrot.slane %v3099_v60, 5 }
 0x989   : > { %v3032_v47 = vadd.f32 %v3031_v33, %v4208_v39  ;;  %v4778_v39 = vld [vmem:[#allocation33_spill] sm:$0xff] }
 0x98a   : > { %v3023_v22 = vmul.f32 %v3022_v62, %v3013_v14  ;;  %v3014_v58 = vmul.f32 %v3013_v14, %v3012_v15 }
 0x98c   : > { %v3026_v37 = vmul.f32 %v3023_v22, %v235_v57  ;;  %v3024_v44 = vmul.f32 %v3014_v58, %v235_v57 }
 0x98e   : > { %v3027_v30 = vadd.f32 %v3026_v37, %v4228_v48  ;;  %v3025_v6 = vadd.f32 %v3024_v44, %v4233_v52  ;;  %v3049_v48 = vstv %s3048_s9 }
 0x990   : > { %3067 = vperm.xlu0 %3493, %v3027_v30   ;;  %v3041_v40 = vsub.f32 %v3027_v30, %v3040_v41  ;;  %3060 = vperm.xlu1 %3492, %v3025_v6   ;;  %v3039_v25 = vsub.f32 %v3025_v6, %v3038_v5 }
 0x992   : > { %v3046_v61 = vmul.f32 %v3041_v40, %v3041_v40  ;;  %v3045_v43 = vmul.f32 %v3039_v25, %v3039_v25 }
 0x994   : > { %v3047_v52 = vadd.f32 %v3046_v61, %v3045_v43  ;;  %3074 = vperm.xlu1 %3492, %v3032_v47  }
 0x996   : > { %vm3050_vm9 = vcmp.gt.f32.partialorder %v3047_v52, %v3049_v48 }
 0x997   : > { %v3051_v7 = vsel %vm3050_vm9, 1.0, %v3977_v24 }
 0x998   : > { %v3053_v29 = vmul.f32 %v3052_v1, %v3051_v7 }
 0x99a   : > { %v3055_v19 = vmul.f32 %v3054_v27, %v3053_v29 }
 0x99c   : > { %v3056_v34 = vsub.f32 1.0, %v3055_v19 }
 0x99e   : > { %v3057_v4 = vmul.f32 %v3056_v34, %v235_v57 }
 0x9a0   : > { %3081 = vperm.xlu1 %3492, %v3057_v4  }
 0xa0f   : > { %v3068_v2 = vpop.permute.xlu0 %3067  ;;  %v3061_v28 = vpop.permute.xlu1 %3060 }
 0xa10   : > { %3071 = vst [vmem:[#allocation3 + $0x1] sm:$0x1] %v3068_v2  ;;  %v3087_v31 = vmul.f32 %v3068_v2, %v4778_v39  ;;  %3064 = vst [vmem:[#allocation3] sm:$0x1] %v3061_v28  ;;  %v3086_v49 = vmul.f32 %v3061_v28, %v4780_v54 }
 0xa12   : > { %v3088_v9 = vadd.f32 %v3087_v31, %v3086_v49 }
 0xa13   : > { %v3075_v46 = vpop.permute.xlu1 %3074 }
 0xa14   : > { %v3093_v51 = vadd.f32 %v3091_v50, %v3088_v9  ;;  %3078 = vst [vmem:[#allocation3 + $0x2] sm:$0x1] %v3075_v46 }
 0xa16   : > { %v3098_v26 = vadd.f32 %v3096_v42, %v3093_v51 }
 0xa18   : > { %v3103_v35 = vadd.f32 %v3101_v0, %v3098_v26 }
 0xa1a   : > { %v3105_v20 = vadd.f32 %v3104_v18, %v3103_v35  ;;  %207 = sbr.rel (!%p205_p9) target bundleno = 133 (0x85), region = 112 }
 0xa1c   : > { %3107 = vst [vmem:[%s3106_s7] sm:$0x1] %v3105_v20 }
 0xa1f   : > { %v3082_v45 = vpop.permute.xlu1 %3081 }
 0xa20   : > { %3085 = vst [vmem:[#allocation3 + $0x3] sm:$0x1] %v3082_v45 }
 0xa21   :  { %3930 = shalt.err (!%p3927_p0)
}
 0xa22   :  { %s3931_s23 = scalar_lea.hbm %s4732_s13, 128 }
 0xa23   :  { %p3932_p1 = scmp.ne.s32.totalorder %s4732_s13, %s3931_s23  ;;  %p3935_p2 = scmp.lt.u32.totalorder %s3931_s23, %s4732_s13 }
 0xa25   :  { %p3937_p3 = pnand %p3935_p2, %p3932_p1 }
 0xa27   :  { %3940 = shalt.err (!%p3937_p3)
}
 0xa28   :  { %3117 = dma.vmem_to_hbm [thread:$0]  %s3115_s15, 128, %s4732_s13, [#allocation6]  }
 0xa29   :  { %3955 = dma.done.wait [#allocation6], 128  }
 0xa2a   :  { %3956 = vsyncadd [#allocation6], 4294967168 }
 0xa2b   :  { %3121 = vsyncpa [#allocation5], 1 }
 0xa2c   :  { %3122 = vsyncpa [#allocation12], 1 }
 0xa2d   :  { %3123 = vsyncpa [#allocation15], 1 }
 0xa2e   :  { %3124 = vsyncpa [#allocation6], 1 }
 0xa2f   :  { %3125 = vsyncpa [#allocation7], 1 }
 0xa30   :  { %3126 = vsyncpa [#allocation9], 1 }

</bundles_post_ra>
